<compile_context>
chip_gen: v7x
topology: tpu7x:2x2x1
jax: 0.10.0
libtpu: 0.0.40
codegen_flags: <defaults>
</compile_context>

<pallas_src>
import functools

import jax
import jax.numpy as jnp
from jax.experimental import pallas as pl
from jax.experimental.pallas import tpu as pltpu


# ----------------------------- Pallas kernel --------------------------------
def _bconv_kernel(x_ref, w_ref, scale_ref, shift_ref, o_ref, lhs_ref,
                  *, k, s, th, wo):
    # x_ref:     (Hp, Wp, Cin)      bf16  full padded image of one batch element
    # w_ref:     (k*k*Cin, tn)      bf16  fused tap weights for this Cout tile
    # scale_ref: (1, tn)            f32   gamma / sqrt(var + eps)
    # shift_ref: (1, tn)            f32   beta + scale * (bias - mean)
    # o_ref:     (th*wo, tn)        bf16  flattened output rows of this tile
    # lhs_ref:   (th*wo, k*k*Cin)   bf16  VMEM scratch: im2col slab of the row tile
    cin = x_ref.shape[-1]
    i = pl.program_id(1)
    row0 = pl.multiple_of(i * (th * s), th * s)

    # Build the im2col slab once per row tile.  The Cout-tile axis (last grid
    # axis) is innermost and marked "arbitrary", so j == 0 runs first for every
    # (n, i) on whichever core owns it; j > 0 reuses the slab from VMEM.
    @pl.when(pl.program_id(2) == 0)
    def _build_lhs():
        for kh in range(k):                       # static, unrolled k*k tap loop
            for kw in range(k):
                if s == 1:
                    win = x_ref[pl.ds(row0 + kh, th), pl.ds(kw, wo), :]
                else:
                    # TODO(synk): for s > 1 pre-deinterleave columns in the
                    # wrapper so these loads are contiguous (no strided sublane
                    # reads per tap).
                    win = x_ref[pl.ds(row0 + kh, th, stride=s),
                                pl.ds(kw, wo, stride=s), :]
                tap = kh * k + kw
                lhs_ref[:, pl.ds(tap * cin, cin)] = win.reshape(th * wo, cin)

    # Single big-K MXU contraction (K = k*k*Cin); accumulation stays in the MXU.
    y = jnp.dot(lhs_ref[...], w_ref[...], preferred_element_type=jnp.float32)
    y = y * scale_ref[...] + shift_ref[...]            # folded bias + BN (f32)
    o_ref[...] = (y * jax.nn.sigmoid(y)).astype(o_ref.dtype)   # SiLU, bf16 store


# ------------------------------ helpers --------------------------------------
def _round_up(x, m):
    return (x + m - 1) // m * m


def _pick_th(Ho, Wo, target_rows=512):
    """Row-tile height: a divisor of Ho (no wasted padded rows) whose flattened
    row count th*Wo is sublane-aligned (unmasked bf16 stores), as large as
    possible within the per-tile matmul row budget."""
    divs = [t for t in range(1, Ho + 1) if Ho % t == 0]
    ok = [t for t in divs if t == Ho or (t * Wo) % 8 == 0]
    fit = [t for t in ok if t * Wo <= max(target_rows, Wo)]
    if fit:
        return max(fit)
    return min(ok)


def _vmem_limit_bytes():
    # Generation-aware budget: ~96 MiB on 128 MiB parts (v5e/v6e), ~48 MiB on
    # 64 MiB parts (v7x).  Falls back to the conservative v7x value.
    try:
        cap = int(pltpu.get_tpu_info().vmem_capacity_bytes)
    except Exception:
        cap = 64 * 1024 * 1024
    return (cap * 3) // 4


# ------------------------------ wrapper --------------------------------------
@functools.partial(jax.jit, static_argnames=("k", "s"))
def bconv_forward(x_nchw, params, *, k, s):
    """Bconv forward: SiLU(BN(Conv2d(x))), padding=k//2, eval-mode BN."""
    assert k % 2 == 1, "padding=k//2 ('same') assumes odd kernel size"
    w = params["conv_w"]          # (Cout, Cin, k, k)  PyTorch layout
    b = params["conv_b"]          # (Cout,)
    gamma = params["bn_gamma"]
    beta = params["bn_beta"]
    mean = params["bn_mean"]      # running_mean (eval-mode BN)
    var = params["bn_var"]        # running_var
    eps = 1e-5

    N, Cin, H, W = x_nchw.shape
    Cout = w.shape[0]
    p = k // 2
    Ho = (H + 2 * p - k) // s + 1
    Wo = (W + 2 * p - k) // s + 1

    # Row tile: ~512 matmul rows, shrunk if the fused-K im2col scratch slab
    # would exceed ~4 MiB of VMEM.
    max_rows_by_vmem = max(8, (4 * 1024 * 1024) // (k * k * Cin * 2))
    th = _pick_th(Ho, Wo, target_rows=min(512, max_rows_by_vmem))
    ho_pad = _round_up(Ho, th)
    n_tiles = ho_pad // th

    # Lane-dense, tiled output channels.
    cout_p = _round_up(max(Cout, 128), 128)
    tn = 256 if cout_p % 256 == 0 else 128
    tn = min(tn, cout_p)
    n_ct = cout_p // tn

    # NCHW -> NHWC once; bf16 operands for the MXU.
    x_nhwc = jnp.transpose(x_nchw, (0, 2, 3, 1)).astype(jnp.bfloat16)
    hp_needed = (ho_pad - 1) * s + k                 # rows the last tile touches
    pad_bottom = max(hp_needed - (H + p), p)
    x_pad = jnp.pad(x_nhwc, ((0, 0), (p, pad_bottom), (p, p), (0, 0)))
    Hp, Wp = x_pad.shape[1], x_pad.shape[2]

    # Weights: (Cout, Cin, k, k) -> (k*k*Cin, Cout_p); tap-major (kh, kw, cin)
    # ordering matches the im2col slab built in the kernel.
    w_fused = jnp.transpose(w, (2, 3, 1, 0)).reshape(k * k * Cin, Cout)
    w_fused = jnp.pad(w_fused, ((0, 0), (0, cout_p - Cout))).astype(jnp.bfloat16)

    # Fold conv bias + eval-mode BN into one scale/shift (f32 epilogue).
    scale = gamma / jnp.sqrt(var + eps)
    shift = beta + scale * (b - mean)
    scale_p = jnp.pad(scale, (0, cout_p - Cout)).reshape(1, cout_p).astype(jnp.float32)
    shift_p = jnp.pad(shift, (0, cout_p - Cout)).reshape(1, cout_p).astype(jnp.float32)

    kernel = functools.partial(_bconv_kernel, k=k, s=s, th=th, wo=Wo)

    flops = 2 * N * ho_pad * Wo * k * k * Cin * cout_p
    bytes_accessed = (N * Hp * Wp * Cin * 2          # bf16 activation, read once
                      + k * k * Cin * cout_p * 2     # bf16 fused weights
                      + N * ho_pad * Wo * cout_p * 2  # bf16 output
                      + 2 * cout_p * 4)
    cost = pl.CostEstimate(flops=flops,
                           transcendentals=N * ho_pad * Wo * cout_p,
                           bytes_accessed=bytes_accessed)

    # Megacore: prefer splitting the batch axis so the two v7x cores do not
    # both DMA the same resident image; fall back to row tiles when N == 1.
    if N >= 2:
        dims = ("parallel", "arbitrary", "arbitrary")
    else:
        dims = ("arbitrary", "parallel", "arbitrary")

    out = pl.pallas_call(
        kernel,
        out_shape=jax.ShapeDtypeStruct((N, ho_pad * Wo, cout_p), jnp.bfloat16),
        grid_spec=pltpu.PrefetchScalarGridSpec(
            num_scalar_prefetch=0,
            grid=(N, n_tiles, n_ct),
            in_specs=[
                # Full padded image of batch n; constant over the row-/Cout-tile
                # axes -> DMA'd once per batch element, resident in VMEM.
                pl.BlockSpec((None, Hp, Wp, Cin), lambda n, i, j: (n, 0, 0, 0)),
                pl.BlockSpec((k * k * Cin, tn), lambda n, i, j: (0, j)),
                pl.BlockSpec((1, tn), lambda n, i, j: (0, j)),
                pl.BlockSpec((1, tn), lambda n, i, j: (0, j)),
            ],
            out_specs=pl.BlockSpec((None, th * Wo, tn), lambda n, i, j: (n, i, j)),
            scratch_shapes=[pltpu.VMEM((th * Wo, k * k * Cin), jnp.bfloat16)],
        ),
        compiler_params=pltpu.CompilerParams(
            dimension_semantics=dims,
            vmem_limit_bytes=_vmem_limit_bytes(),
        ),
        cost_estimate=cost,
    )(x_pad, w_fused, scale_p, shift_p)

    # Drop row / channel padding, restore NCHW f32 (module contract).
    out = out.reshape(N, ho_pad, Wo, cout_p)[:, :Ho, :, :Cout]
    return jnp.transpose(out, (0, 3, 1, 2)).astype(x_nchw.dtype)


# ------------------------------ reference ------------------------------------
def _reference(x_nchw, params, *, k, s, quantize=False):
    w, b = params["conv_w"], params["conv_b"]
    if quantize:  # match the kernel's bf16 operands (f32 accumulation)
        x_nchw = x_nchw.astype(jnp.bfloat16).astype(jnp.float32)
        w = w.astype(jnp.bfloat16).astype(jnp.float32)
    gamma, beta = params["bn_gamma"], params["bn_beta"]
    mean, var = params["bn_mean"], params["bn_var"]
    eps = 1e-5
    p = k // 2
    y = jax.lax.conv_general_dilated(
        x_nchw, w, window_strides=(s, s), padding=[(p, p), (p, p)],
        dimension_numbers=("NCHW", "OIHW", "NCHW"))
    y = y + b.reshape(1, -1, 1, 1)
    y = (y - mean.reshape(1, -1, 1, 1)) / jnp.sqrt(var.reshape(1, -1, 1, 1) + eps)
    y = y * gamma.reshape(1, -1, 1, 1) + beta.reshape(1, -1, 1, 1)
    y = y * jax.nn.sigmoid(y)
    if quantize:  # match the kernel's bf16 output store
        y = y.astype(jnp.bfloat16).astype(jnp.float32)
    return y


# -------------------------------- main ----------------------------------------
if __name__ == "__main__":
    # Small shapes consistent with Bconv(ch_in=4, ch_out=8, k=3, s=1).
    N, Cin, H, W = 2, 4, 16, 16
    Cout, k, s = 8, 3, 1

    key = jax.random.PRNGKey(0)
    kx, kw_, kb, kg, kbt, km, kv = jax.random.split(key, 7)

    x = jax.random.normal(kx, (N, Cin, H, W), dtype=jnp.float32)
    params = {
        "conv_w": jax.random.normal(kw_, (Cout, Cin, k, k), jnp.float32) * 0.1,
        "conv_b": jax.random.normal(kb, (Cout,), jnp.float32) * 0.1,
        "bn_gamma": 1.0 + 0.1 * jax.random.normal(kg, (Cout,), jnp.float32),
        "bn_beta": 0.1 * jax.random.normal(kbt, (Cout,), jnp.float32),
        # Eval-mode BN with (deterministic) running stats.
        "bn_mean": 0.1 * jax.random.normal(km, (Cout,), jnp.float32),
        "bn_var": jnp.abs(1.0 + 0.1 * jax.random.normal(kv, (Cout,), jnp.float32)),
    }

    out = bconv_forward(x, params, k=k, s=s)
    jax.block_until_ready(out)
    assert out.shape == (N, Cout, H, W)

    # Tight check vs a reference fed the same bf16-quantized operands and
    # bf16-rounded output (isolates accumulation-order differences only).
    ref_q = _reference(x, params, k=k, s=s, quantize=True)
    assert jnp.allclose(out, ref_q, atol=2e-2, rtol=2e-2), "mismatch vs bf16-quantized ref"

    # Loose check vs the exact f32 module semantics (bf16 rounding only).
    ref_f = _reference(x, params, k=k, s=s, quantize=False)
    assert jnp.allclose(out, ref_f, atol=5e-2, rtol=5e-2), "mismatch vs f32 reference"

    print("KERNEL_OK")
</pallas_src>

<mosaic_0001>
module attributes {stable_mosaic.version = 11 : i64} {
  func.func @_bconv_kernel(%arg0: i32, %arg1: i32, %arg2: i32, %arg3: memref<1x18x18x4xbf16, #tpu.memory_space<vmem>>, %arg4: memref<36x128xbf16, #tpu.memory_space<vmem>>, %arg5: memref<1x128xf32, #tpu.memory_space<vmem>>, %arg6: memref<1x128xf32, #tpu.memory_space<vmem>>, %arg7: memref<1x256x128xbf16, #tpu.memory_space<vmem>>, %arg8: memref<256x36xbf16, #tpu.memory_space<vmem>>) attributes {dimension_semantics = [#tpu.dimension_semantics<parallel>, #tpu.dimension_semantics<arbitrary>, #tpu.dimension_semantics<arbitrary>], iteration_bounds = array<i64: 2, 1, 1>, scalar_prefetch = 0 : i64, scratch_operands = 1 : i64, tpu.core_type = #tpu.core_type<tc>, window_params = [{transform_indices = @transform_0, window_bounds = array<i64: 1, 18, 18, 4>}, {transform_indices = @transform_1, window_bounds = array<i64: 36, 128>}, {transform_indices = @transform_2, window_bounds = array<i64: 1, 128>}, {transform_indices = @transform_3, window_bounds = array<i64: 1, 128>}, {transform_indices = @transform_4, window_bounds = array<i64: 1, 256, 128>}]} {
    %c16_i32 = arith.constant 16 : i32
    %0 = arith.muli %arg1, %c16_i32 : i32
    %1 = tpu.assume_multiple %0, 16 : i32
    %c0_i32 = arith.constant 0 : i32
    %2 = arith.cmpi eq, %arg2, %c0_i32 : i32
    %3 = arith.extui %2 : i1 to i32
    %c0_i32_0 = arith.constant 0 : i32
    %4 = arith.cmpi ne, %3, %c0_i32_0 : i32
    scf.if %4 {
      %c0_i32_12 = arith.constant 0 : i32
      %24 = arith.addi %1, %c0_i32_12 : i32
      %c0_13 = arith.constant 0 : index
      %25 = arith.index_cast %24 : i32 to index
      %c0_14 = arith.constant 0 : index
      %c0_15 = arith.constant 0 : index
      %26 = vector.load %arg3[%c0_13, %25, %c0_14, %c0_15] : memref<1x18x18x4xbf16, #tpu.memory_space<vmem>>, vector<1x16x16x4xbf16>
      %27 = vector.shape_cast %26 : vector<1x16x16x4xbf16> to vector<16x16x4xbf16>
      %28 = vector.shape_cast %27 : vector<16x16x4xbf16> to vector<256x4xbf16>
      %c0_16 = arith.constant 0 : index
      %c0_17 = arith.constant 0 : index
      %29 = vector.load %arg8[%c0_16, %c0_17] : memref<256x36xbf16, #tpu.memory_space<vmem>>, vector<256x4xbf16>
      tpu.vector_store %arg8[%c0_16, %c0_17], %28 {strides = array<i32>} : memref<256x36xbf16, #tpu.memory_space<vmem>>, vector<256x4xbf16>,
      %c0_i32_18 = arith.constant 0 : i32
      %30 = arith.addi %1, %c0_i32_18 : i32
      %c0_19 = arith.constant 0 : index
      %31 = arith.index_cast %30 : i32 to index
      %c1 = arith.constant 1 : index
      %c0_20 = arith.constant 0 : index
      %32 = vector.load %arg3[%c0_19, %31, %c1, %c0_20] : memref<1x18x18x4xbf16, #tpu.memory_space<vmem>>, vector<1x16x16x4xbf16>
      %33 = vector.shape_cast %32 : vector<1x16x16x4xbf16> to vector<16x16x4xbf16>
      %34 = vector.shape_cast %33 : vector<16x16x4xbf16> to vector<256x4xbf16>
      %c0_21 = arith.constant 0 : index
      %c4 = arith.constant 4 : index
      %35 = vector.load %arg8[%c0_21, %c4] : memref<256x36xbf16, #tpu.memory_space<vmem>>, vector<256x4xbf16>
      tpu.vector_store %arg8[%c0_21, %c4], %34 {strides = array<i32>} : memref<256x36xbf16, #tpu.memory_space<vmem>>, vector<256x4xbf16>,
      %c0_i32_22 = arith.constant 0 : i32
      %36 = arith.addi %1, %c0_i32_22 : i32
      %c0_23 = arith.constant 0 : index
      %37 = arith.index_cast %36 : i32 to index
      %c2 = arith.constant 2 : index
      %c0_24 = arith.constant 0 : index
      %38 = vector.load %arg3[%c0_23, %37, %c2, %c0_24] : memref<1x18x18x4xbf16, #tpu.memory_space<vmem>>, vector<1x16x16x4xbf16>
      %39 = vector.shape_cast %38 : vector<1x16x16x4xbf16> to vector<16x16x4xbf16>
      %40 = vector.shape_cast %39 : vector<16x16x4xbf16> to vector<256x4xbf16>
      %c0_25 = arith.constant 0 : index
      %c8 = arith.constant 8 : index
      %41 = vector.load %arg8[%c0_25, %c8] : memref<256x36xbf16, #tpu.memory_space<vmem>>, vector<256x4xbf16>
      tpu.vector_store %arg8[%c0_25, %c8], %40 {strides = array<i32>} : memref<256x36xbf16, #tpu.memory_space<vmem>>, vector<256x4xbf16>,
      %c1_i32 = arith.constant 1 : i32
      %42 = arith.addi %1, %c1_i32 : i32
      %c0_26 = arith.constant 0 : index
      %43 = arith.index_cast %42 : i32 to index
      %c0_27 = arith.constant 0 : index
      %c0_28 = arith.constant 0 : index
      %44 = vector.load %arg3[%c0_26, %43, %c0_27, %c0_28] : memref<1x18x18x4xbf16, #tpu.memory_space<vmem>>, vector<1x16x16x4xbf16>
      %45 = vector.shape_cast %44 : vector<1x16x16x4xbf16> to vector<16x16x4xbf16>
      %46 = vector.shape_cast %45 : vector<16x16x4xbf16> to vector<256x4xbf16>
      %c0_29 = arith.constant 0 : index
      %c12 = arith.constant 12 : index
      %47 = vector.load %arg8[%c0_29, %c12] : memref<256x36xbf16, #tpu.memory_space<vmem>>, vector<256x4xbf16>
      tpu.vector_store %arg8[%c0_29, %c12], %46 {strides = array<i32>} : memref<256x36xbf16, #tpu.memory_space<vmem>>, vector<256x4xbf16>,
      %c1_i32_30 = arith.constant 1 : i32
      %48 = arith.addi %1, %c1_i32_30 : i32
      %c0_31 = arith.constant 0 : index
      %49 = arith.index_cast %48 : i32 to index
      %c1_32 = arith.constant 1 : index
      %c0_33 = arith.constant 0 : index
      %50 = vector.load %arg3[%c0_31, %49, %c1_32, %c0_33] : memref<1x18x18x4xbf16, #tpu.memory_space<vmem>>, vector<1x16x16x4xbf16>
      %51 = vector.shape_cast %50 : vector<1x16x16x4xbf16> to vector<16x16x4xbf16>
      %52 = vector.shape_cast %51 : vector<16x16x4xbf16> to vector<256x4xbf16>
      %c0_34 = arith.constant 0 : index
      %c16 = arith.constant 16 : index
      %53 = vector.load %arg8[%c0_34, %c16] : memref<256x36xbf16, #tpu.memory_space<vmem>>, vector<256x4xbf16>
      tpu.vector_store %arg8[%c0_34, %c16], %52 {strides = array<i32>} : memref<256x36xbf16, #tpu.memory_space<vmem>>, vector<256x4xbf16>,
      %c1_i32_35 = arith.constant 1 : i32
      %54 = arith.addi %1, %c1_i32_35 : i32
      %c0_36 = arith.constant 0 : index
      %55 = arith.index_cast %54 : i32 to index
      %c2_37 = arith.constant 2 : index
      %c0_38 = arith.constant 0 : index
      %56 = vector.load %arg3[%c0_36, %55, %c2_37, %c0_38] : memref<1x18x18x4xbf16, #tpu.memory_space<vmem>>, vector<1x16x16x4xbf16>
      %57 = vector.shape_cast %56 : vector<1x16x16x4xbf16> to vector<16x16x4xbf16>
      %58 = vector.shape_cast %57 : vector<16x16x4xbf16> to vector<256x4xbf16>
      %c0_39 = arith.constant 0 : index
      %c20 = arith.constant 20 : index
      %59 = vector.load %arg8[%c0_39, %c20] : memref<256x36xbf16, #tpu.memory_space<vmem>>, vector<256x4xbf16>
      tpu.vector_store %arg8[%c0_39, %c20], %58 {strides = array<i32>} : memref<256x36xbf16, #tpu.memory_space<vmem>>, vector<256x4xbf16>,
      %c2_i32 = arith.constant 2 : i32
      %60 = arith.addi %1, %c2_i32 : i32
      %c0_40 = arith.constant 0 : index
      %61 = arith.index_cast %60 : i32 to index
      %c0_41 = arith.constant 0 : index
      %c0_42 = arith.constant 0 : index
      %62 = vector.load %arg3[%c0_40, %61, %c0_41, %c0_42] : memref<1x18x18x4xbf16, #tpu.memory_space<vmem>>, vector<1x16x16x4xbf16>
      %63 = vector.shape_cast %62 : vector<1x16x16x4xbf16> to vector<16x16x4xbf16>
      %64 = vector.shape_cast %63 : vector<16x16x4xbf16> to vector<256x4xbf16>
      %c0_43 = arith.constant 0 : index
      %c24 = arith.constant 24 : index
      %65 = vector.load %arg8[%c0_43, %c24] : memref<256x36xbf16, #tpu.memory_space<vmem>>, vector<256x4xbf16>
      tpu.vector_store %arg8[%c0_43, %c24], %64 {strides = array<i32>} : memref<256x36xbf16, #tpu.memory_space<vmem>>, vector<256x4xbf16>,
      %c2_i32_44 = arith.constant 2 : i32
      %66 = arith.addi %1, %c2_i32_44 : i32
      %c0_45 = arith.constant 0 : index
      %67 = arith.index_cast %66 : i32 to index
      %c1_46 = arith.constant 1 : index
      %c0_47 = arith.constant 0 : index
      %68 = vector.load %arg3[%c0_45, %67, %c1_46, %c0_47] : memref<1x18x18x4xbf16, #tpu.memory_space<vmem>>, vector<1x16x16x4xbf16>
      %69 = vector.shape_cast %68 : vector<1x16x16x4xbf16> to vector<16x16x4xbf16>
      %70 = vector.shape_cast %69 : vector<16x16x4xbf16> to vector<256x4xbf16>
      %c0_48 = arith.constant 0 : index
      %c28 = arith.constant 28 : index
      %71 = vector.load %arg8[%c0_48, %c28] : memref<256x36xbf16, #tpu.memory_space<vmem>>, vector<256x4xbf16>
      tpu.vector_store %arg8[%c0_48, %c28], %70 {strides = array<i32>} : memref<256x36xbf16, #tpu.memory_space<vmem>>, vector<256x4xbf16>,
      %c2_i32_49 = arith.constant 2 : i32
      %72 = arith.addi %1, %c2_i32_49 : i32
      %c0_50 = arith.constant 0 : index
      %73 = arith.index_cast %72 : i32 to index
      %c2_51 = arith.constant 2 : index
      %c0_52 = arith.constant 0 : index
      %74 = vector.load %arg3[%c0_50, %73, %c2_51, %c0_52] : memref<1x18x18x4xbf16, #tpu.memory_space<vmem>>, vector<1x16x16x4xbf16>
      %75 = vector.shape_cast %74 : vector<1x16x16x4xbf16> to vector<16x16x4xbf16>
      %76 = vector.shape_cast %75 : vector<16x16x4xbf16> to vector<256x4xbf16>
      %c0_53 = arith.constant 0 : index
      %c32 = arith.constant 32 : index
      %77 = vector.load %arg8[%c0_53, %c32] : memref<256x36xbf16, #tpu.memory_space<vmem>>, vector<256x4xbf16>
      tpu.vector_store %arg8[%c0_53, %c32], %76 {strides = array<i32>} : memref<256x36xbf16, #tpu.memory_space<vmem>>, vector<256x4xbf16>,
    } else {
    }
    %c0 = arith.constant 0 : index
    %c0_1 = arith.constant 0 : index
    %5 = vector.load %arg8[%c0, %c0_1] : memref<256x36xbf16, #tpu.memory_space<vmem>>, vector<256x36xbf16>
    %c0_2 = arith.constant 0 : index
    %c0_3 = arith.constant 0 : index
    %6 = vector.load %arg4[%c0_2, %c0_3] : memref<36x128xbf16, #tpu.memory_space<vmem>>, vector<36x128xbf16>
    %cst = arith.constant dense<0.000000e+00> : vector<256x128xf32>
    %7 = tpu.matmul %5, %6, %cst {dimension_numbers = #tpu.dot_dimension_numbers<[1], [0], [0], [1], [0, 0, 1, 1], [], []>} : vector<256x36xbf16>, vector<36x128xbf16>, vector<256x128xf32> -> vector<256x128xf32>
    %c0_4 = arith.constant 0 : index
    %c0_5 = arith.constant 0 : index
    %8 = vector.load %arg5[%c0_4, %c0_5] : memref<1x128xf32, #tpu.memory_space<vmem>>, vector<1x128xf32>
    %9 = vector.broadcast %8 : vector<1x128xf32> to vector<256x128xf32>
    %10 = arith.mulf %7, %9 : vector<256x128xf32>
    %c0_6 = arith.constant 0 : index
    %c0_7 = arith.constant 0 : index
    %11 = vector.load %arg6[%c0_6, %c0_7] : memref<1x128xf32, #tpu.memory_space<vmem>>, vector<1x128xf32>
    %12 = vector.broadcast %11 : vector<1x128xf32> to vector<256x128xf32>
    %13 = arith.addf %10, %12 : vector<256x128xf32>
    %14 = arith.negf %13 : vector<256x128xf32>
    %15 = math.exp %14 : vector<256x128xf32>
    %cst_8 = arith.constant 1.000000e+00 : f32
    %16 = vector.broadcast %cst_8 : f32 to vector<256x128xf32>
    %17 = arith.addf %16, %15 : vector<256x128xf32>
    %18 = arith.divf %16, %17 : vector<256x128xf32>
    %19 = arith.mulf %13, %18 : vector<256x128xf32>
    %20 = arith.truncf %19 : vector<256x128xf32> to vector<256x128xbf16>
    %c0_9 = arith.constant 0 : index
    %c0_10 = arith.constant 0 : index
    %c0_11 = arith.constant 0 : index
    %21 = vector.load %arg7[%c0_9, %c0_10, %c0_11] : memref<1x256x128xbf16, #tpu.memory_space<vmem>>, vector<1x256x128xbf16>
    %22 = vector.shape_cast %21 : vector<1x256x128xbf16> to vector<256x128xbf16>
    %23 = vector.shape_cast %20 : vector<256x128xbf16> to vector<1x256x128xbf16>
    tpu.vector_store %arg7[%c0_9, %c0_10, %c0_11], %23 {strides = array<i32>} : memref<1x256x128xbf16, #tpu.memory_space<vmem>>, vector<1x256x128xbf16>,
    return
  }
  func.func @transform_0(%arg0: i32, %arg1: i32, %arg2: i32) -> (i32, i32, i32, i32) {
    %c0_i32 = arith.constant 0 : i32
    %c0_i32_0 = arith.constant 0 : i32
    %c0_i32_1 = arith.constant 0 : i32
    %c0_i32_2 = arith.constant 0 : i32
    return %arg0, %c0_i32, %c0_i32_0, %c0_i32_1 : i32, i32, i32, i32
  }
  func.func @transform_1(%arg0: i32, %arg1: i32, %arg2: i32) -> (i32, i32) {
    %c0_i32 = arith.constant 0 : i32
    %c0_i32_0 = arith.constant 0 : i32
    return %c0_i32, %arg2 : i32, i32
  }
  func.func @transform_2(%arg0: i32, %arg1: i32, %arg2: i32) -> (i32, i32) {
    %c0_i32 = arith.constant 0 : i32
    %c0_i32_0 = arith.constant 0 : i32
    return %c0_i32, %arg2 : i32, i32
  }
  func.func @transform_3(%arg0: i32, %arg1: i32, %arg2: i32) -> (i32, i32) {
    %c0_i32 = arith.constant 0 : i32
    %c0_i32_0 = arith.constant 0 : i32
    return %c0_i32, %arg2 : i32, i32
  }
  func.func @transform_4(%arg0: i32, %arg1: i32, %arg2: i32) -> (i32, i32, i32) {
    %c0_i32 = arith.constant 0 : i32
    return %arg0, %arg1, %arg2 : i32, i32, i32
  }
}

</mosaic_0001>

<bundles_post_ra>
// kernel: bconv_forward.1
= control target key start
LH: loop header
LB: loop body
LE: loop exit
PB: predicated region body
PF: predicated region fallthrough
CT: control target
= control target key end

     0   :  { %s5264_s15 = smov 0   ;;  %s5266_s16 = smov 0   ;;  %s6520_s0 = inlined_call_operand.vmem [shape: bf16[2,18,18,4], index: 0, kind: input, shape index: {}]   ;;  %s6521_s1 = inlined_call_operand.vmem [shape: bf16[36,128], index: 1, kind: input, shape index: {}]   ;;  %s6522_s2 = inlined_call_operand.vmem [shape: f32[1,128], index: 2, kind: input, shape index: {}]   ;;  %s6523_s3 = inlined_call_operand.vmem [shape: f32[1,128], index: 3, kind: input, shape index: {}]   ;;  %s6524_s4 = inlined_call_operand.vmem [shape: bf16[2,256,128], index: 4, kind: output, shape index: {}]  }
   0x1   :  { %s5268_s17 = smov 0  }
   0x2 LB: > { %s33_s18 = sadd.s32 1, %s5225_s16  ;;  %p4263_p0 = scmp.ge.s32.totalorder %s5229_s17, 1  ;;  %s5229_s17 = sphi %s5268_s17, %s14_s17   ;;  %s5225_s16 = sphi %s5266_s16, %s6530_s16   ;;  %s5221_s15 = sphi %s5264_s15, %s6529_s15  }
   0x3   : > { %p35_p1 = scmp.ge.s32.totalorder %s33_s18, 2  ;;  %p210_p2 = scmp.lt.s32.totalorder %s5229_s17, 3 }
   0x5   : > { %s6532_s18 = smov (%p35_p1, %s33_s18), 0  ;;  %p211_p3 = pnand %p4263_p0, %p210_p2 }
   0x6   : > { %p253_p4 = scmp.lt.s32.totalorder (!%p211_p3), %s5221_s15, 1  ;;  %vm1079_vm0 = vcmask (!%p211_p3), 1042432   ;;  %vm1080_vm1 = vcmask (!%p211_p3), 1046532   ;;  %s5231_s23 = smov (!%p211_p3), 12   ;;  %vm483_vm3 = vsmask.f32 (!%p211_p3), 3328 }
   0x7   : > { %214 = sbr.rel (%p211_p3) target bundleno = 691 (0x2b3), region = 36  ;;  %vm5290_vm2 = vmor (!%p211_p3), %vm1079_vm0, %vm1080_vm1  ;;  %vm484_vm4 = vsmask.f32 (!%p211_p3), 7440  ;;  %s5232_s24 = smov (!%p211_p3), 8   ;;  %vm418_vm6 = vcmask (!%p211_p3), 31744   ;;  %vm966_vm7 = vcmask (!%p211_p3), 64544  }
   0x8   : > { %vm5340_vm5 = vmor (!%p211_p3), %vm483_vm3, %vm484_vm4  ;;  %s5233_s25 = smov (!%p211_p3), 4   ;;  %s5234_s26 = smov (!%p211_p3), 16   ;;  %vm1290_vm8 = vcmask (!%p211_p3), 97344   ;;  %vm1471_vm9 = vcmask (!%p211_p3), 130144   ;;  %vm2016_vm10 = vcmask (!%p211_p3), 162944   ;;  %vm2337_vm11 = vcmask (!%p211_p3), 195744  }
   0x9   : > { %s5235_s27 = smov (!%p211_p3), 20   ;;  %s5236_s28 = smov (!%p211_p3), 24   ;;  %vm2518_vm12 = vcmask (!%p211_p3), 228544   ;;  %vm3063_vm13 = vcmask (!%p211_p3), 261344   ;;  %vm3384_vm14 = vcmask (!%p211_p3), 294144   ;;  %vm3437_vm15 = vcmask (!%p211_p3), 293888  }
   0xa   : > { %s5237_s29 = smov (!%p211_p3), 28   ;;  %s5238_s30 = smov (!%p211_p3), 32   ;;  %vm3486_vm0 = vcmask (!%p211_p3), 1041408  }
   0xe   : > { %s6534_s15 = smov (!%p253_p4, %s5221_s15), 1 }
   0xf   : > { %s4995_s19 = smul.u32 216, %s6534_s15 }
  0x11   : > { %s5288_s22 = scalar_lea.vmem %s6520_s0, %s4995_s19  ;;  %s4802_s19 = sshll.u32 %s6534_s15, 7 }
  0x12   : > { %v5028_v1 = vld [vmem:[%s5288_s22 + $0x6c] sm:$0xff]   ;;  %v1007_v3 = vld [vmem:[%s5288_s22 + $0x60] sm:$0xe]  ;;  %v1008_v4 = vld [vmem:[%s5288_s22 + $0x64] sm:$0xf] }
  0x13   : > { %v5029_v2 = vld [vmem:[%s5288_s22 + $0xc] sm:$0xff]   ;;  %1439 = vrot.lane.b32.xlu1 %v5028_v1, %s5231_s23  ;;  %v1009_v5 = vld [vmem:[%s5288_s22 + $0x68] sm:$0x1]  ;;  %v4307_v6 = vrot.slane %v1007_v3, 9  ;;  %v1140_v7 = vrot.slane %v1008_v4, 5 }
  0x14   : > { %1423 = vrot.lane.b32.xlu0 %v5029_v2, %s5231_s23  ;;  %v1143_v8 = vrot.slane %v1009_v5, 5  ;;  %v983_v9 = vld [vmem:[%s5288_s22] sm:$0xe]  ;;  %v984_v10 = vld [vmem:[%s5288_s22 + $0x4] sm:$0xf] }
  0x15   : > { %v985_v11 = vld [vmem:[%s5288_s22 + $0x8] sm:$0x1]  ;;  %v4299_v12 = vrot.slane %v983_v9, 9  ;;  %v1141_v13 = vsel %vm5290_vm2, %v4307_v6, %v1140_v7  ;;  %v1142_v14 = vrot.slane %v1140_v7, 4  ;;  %v1084_v15 = vrot.slane %v984_v10, 5 }
  0x16   : > { %v1087_v16 = vrot.slane %v985_v11, 5  ;;  %v1010_v17 = vld [vmem:[%s5288_s22 + $0x6c] sm:$0xe]  ;;  %v1011_v18 = vld [vmem:[%s5288_s22 + $0x70] sm:$0xf] }
  0x17   : > { %v1012_v19 = vld [vmem:[%s5288_s22 + $0x74] sm:$0x1]  ;;  %v4308_v20 = vrot.slane %v1010_v17, 9  ;;  %v1144_v21 = vsel %vm5290_vm2, %v1142_v14, %v1143_v8  ;;  %v1085_v22 = vsel %vm5290_vm2, %v4299_v12, %v1084_v15  ;;  %v1086_v23 = vrot.slane %v1084_v15, 4  ;;  %v986_v25 = vld [vmem:[%s5288_s22 + $0xc] sm:$0xe] }
  0x18   : > { %v1147_v24 = vrot.slane %v1011_v18, 5  ;;  %v987_v26 = vld [vmem:[%s5288_s22 + $0x10] sm:$0xf]  ;;  %v4323_v27 = vcombine.low %v1141_v13, %v1144_v21  ;;  %v1150_v28 = vrot.slane %v1012_v19, 5  ;;  %v988_v29 = vld [vmem:[%s5288_s22 + $0x14] sm:$0x1] }
  0x19   : > { %v4300_v30 = vrot.slane %v986_v25, 9  ;;  %v1091_v31 = vrot.slane %v987_v26, 5  ;;  %v1088_v32 = vsel %vm5290_vm2, %v1086_v23, %v1087_v16  ;;  %v1094_v35 = vrot.slane %v988_v29, 5  ;;  %v438_v36 = vld [vmem:[%s5288_s22 + $0xc] sm:$0xf] }
  0x1a   : > { %v1148_v33 = vsel %vm5290_vm2, %v4308_v20, %v1147_v24  ;;  %v1149_v34 = vrot.slane %v1147_v24, 4  ;;  %v439_v37 = vld [vmem:[%s5288_s22 + $0x10] sm:$0xf]  ;;  %1258 = vrot.lane.b32.xlu1 %v4323_v27, %s5232_s24  ;;  %v4315_v38 = vcombine.low %v1085_v22, %v1088_v32  ;;  %v440_v41 = vld [vmem:[%s5288_s22 + $0x14] sm:$0x1]  ;;  %v511_v42 = vshrl.u32 %v438_v36, 16 }
  0x1b   : > { %v1092_v39 = vsel %vm5290_vm2, %v4300_v30, %v1091_v31  ;;  %v1093_v40 = vrot.slane %v1091_v31, 4  ;;  %v435_v43 = vld [vmem:[%s5288_s22] sm:$0xf]  ;;  %v514_v45 = vshll.u32 %v438_v36, 16  ;;  %v520_v46 = vshll.u32 %v439_v37, 16 }
  0x1c   : > { %v1151_v44 = vsel %vm5290_vm2, %v1149_v34, %v1150_v28  ;;  %v524_v47 = vshrl.u32 %v439_v37, 16  ;;  %v436_v48 = vld [vmem:[%s5288_s22 + $0x4] sm:$0xf]  ;;  %1242 = vrot.lane.b32.xlu0 %v4315_v38, %s5232_s24  ;;  %v513_v51 = vrot.slane %v511_v42, 4  ;;  %v530_v52 = vshll.u32 %v440_v41, 16 }
  0x1d   : > { %v4324_v49 = vcombine.low %v1148_v33, %v1151_v44  ;;  %v1095_v50 = vsel %vm5290_vm2, %v1093_v40, %v1094_v35  ;;  %v437_v53 = vld [vmem:[%s5288_s22 + $0x8] sm:$0x1]  ;;  %v516_v55 = vrot.slane %v514_v45, 5  ;;  %v522_v56 = vrot.slane %v520_v46, 5  ;;  %v462_v58 = vld [vmem:[%s5288_s22 + $0x6c] sm:$0xf] }
  0x1e   : > { %v4316_v54 = vcombine.low %v1092_v39, %v1095_v50  ;;  %v526_v57 = vrot.slane %v524_v47, 4  ;;  %v532_v59 = vrot.slane %v530_v52, 5  ;;  %v487_v60 = vshrl.u32 %v435_v43, 16  ;;  %v463_v4 = vld [vmem:[%s5288_s22 + $0x70] sm:$0xf] }
  0x1f   : > { %1260 = vrot.lane.b32.xlu1 %v4324_v49, %s5232_s24  ;;  %v490_v61 = vshll.u32 %v435_v43, 16  ;;  %v496_v62 = vshll.u32 %v436_v48, 16  ;;  %v517_v63 = vor.u32 %v516_v55, %v513_v51  ;;  %v500_v2 = vshrl.u32 %v436_v48, 16  ;;  %v464_v9 = vld [vmem:[%s5288_s22 + $0x74] sm:$0x1] }
  0x20   : > { %v527_v1 = vor.u32 %v526_v57, %v522_v56  ;;  %v506_v3 = vshll.u32 %v437_v53, 16  ;;  %1244 = vrot.lane.b32.xlu0 %v4316_v54, %s5232_s24  ;;  %v489_v6 = vrot.slane %v487_v60, 4  ;;  %v703_v10 = vshrl.u32 %v462_v58, 16  ;;  %v459_v11 = vld [vmem:[%s5288_s22 + $0x60] sm:$0xf] }
  0x21   : > { %v492_v7 = vrot.slane %v490_v61, 5  ;;  %v498_v8 = vrot.slane %v496_v62, 5  ;;  %v518_v12 = vrot.slane %v517_v63, 4  ;;  %v502_v14 = vrot.slane %v500_v2, 4  ;;  %v460_v16 = vld [vmem:[%s5288_s22 + $0x64] sm:$0xf] }
  0x22   : > { %v528_v13 = vrot.slane %v527_v1, 4  ;;  %v508_v15 = vrot.slane %v506_v3, 5  ;;  %v705_v18 = vrot.slane %v703_v10, 4  ;;  %v706_v19 = vshll.u32 %v462_v58, 16  ;;  %v461_v35 = vld [vmem:[%s5288_s22 + $0x68] sm:$0x1] }
  0x23   : > { %v493_v17 = vor.u32 %v492_v7, %v489_v6  ;;  %v712_v20 = vshll.u32 %v463_v4, 16  ;;  %v523_v21 = vsel %vm5340_vm5, %v518_v12, %v522_v56  ;;  %v503_v23 = vor.u32 %v502_v14, %v498_v8  ;;  %v4403_v38 = vld [vmem:[%s5288_s22 + $0x6c] sm:$0xf]  ;;  %v4404_v43 = vld [vmem:[%s5288_s22 + $0x70] sm:$0xf]  ;;  %v5030_v6 = vld [vmem:[%s5288_s22 + $0x78] sm:$0xff]  }
  0x24   : > { %v533_v22 = vsel %vm5340_vm5, %v528_v13, %v532_v59  ;;  %v716_v24 = vshrl.u32 %v463_v4, 16  ;;  %v708_v27 = vrot.slane %v706_v19, 5  ;;  %v722_v31 = vshll.u32 %v464_v9, 16  ;;  %v4405_v54 = vld [vmem:[%s5288_s22 + $0x74] sm:$0x1] }
  0x25   : > { %v4284_v25 = vcombine.low %v523_v21, %v533_v22  ;;  %v494_v26 = vrot.slane %v493_v17, 4  ;;  %v714_v28 = vrot.slane %v712_v20, 5  ;;  %v504_v29 = vrot.slane %v503_v23, 4  ;;  %v4379_v57 = vld [vmem:[%s5288_s22 + $0xc] sm:$0xf] }
  0x26   : > { %v718_v30 = vrot.slane %v716_v24, 4  ;;  %v679_v32 = vshrl.u32 %v459_v11, 16  ;;  %v709_v34 = vor.u32 %v708_v27, %v705_v18  ;;  %v682_v36 = vshll.u32 %v459_v11, 16  ;;  %v4380_v62 = vld [vmem:[%s5288_s22 + $0x10] sm:$0xf] }
  0x27   : > { %920 = vrot.lane.b32.xlu1 %v4284_v25, %s5233_s25  ;;  %v499_v33 = vsel %vm5340_vm5, %v494_v26, %v498_v8  ;;  %v688_v37 = vshll.u32 %v460_v16, 16  ;;  %v509_v39 = vsel %vm5340_vm5, %v504_v29, %v508_v15  ;;  %v724_v41 = vrot.slane %v722_v31, 5  ;;  %v4381_v12 = vld [vmem:[%s5288_s22 + $0x14] sm:$0x1]  ;;  %v4406_v15 = vld [vmem:[%s5288_s22 + $0x78] sm:$0xf] }
  0x28   : > { %v719_v40 = vor.u32 %v718_v30, %v714_v28  ;;  %v681_v42 = vrot.slane %v679_v32, 4  ;;  %v4283_v44 = vcombine.low %v499_v33, %v509_v39  ;;  %v710_v45 = vrot.slane %v709_v34, 4  ;;  %v4407_v27 = vld [vmem:[%s5288_s22 + $0x7c] sm:$0xf]  ;;  %v4408_v33 = vld [vmem:[%s5288_s22 + $0x80] sm:$0x1] }
  0x29   : > { %v684_v46 = vrot.slane %v682_v36, 5  ;;  %v690_v47 = vrot.slane %v688_v37, 5  ;;  %v692_v49 = vshrl.u32 %v460_v16, 16  ;;  %v698_v50 = vshll.u32 %v461_v35, 16  ;;  %v4382_v34 = vld [vmem:[%s5288_s22 + $0x18] sm:$0xf] }
  0x2a   : > { %v720_v48 = vrot.slane %v719_v40, 4  ;;  %v1729_v51 = vshrl.u32 %v4403_v38, 16  ;;  %918 = vrot.lane.b32.xlu0 %v4283_v44, %s5233_s25  ;;  %v715_v52 = vsel %vm5340_vm5, %v710_v45, %v714_v28  ;;  %v1732_v55 = vshll.u32 %v4403_v38, 16  ;;  %v4383_v39 = vld [vmem:[%s5288_s22 + $0x1c] sm:$0xf] }
  0x2b   : > { %v685_v53 = vor.u32 %v684_v46, %v681_v42  ;;  %v1738_v56 = vshll.u32 %v4404_v43, 16  ;;  %v694_v59 = vrot.slane %v692_v49, 4  ;;  %v700_v60 = vrot.slane %v698_v50, 5  ;;  %v5031_v40 = vld [vmem:[%s5288_s22 + $0x18] sm:$0xff]   ;;  %v4384_v45 = vld [vmem:[%s5288_s22 + $0x20] sm:$0x1] }
  0x2c   : > { %v725_v58 = vsel %vm5340_vm5, %v720_v48, %v724_v41  ;;  %v1731_v61 = vrot.slane %v1729_v51, 4  ;;  %v1734_v2 = vrot.slane %v1732_v55, 5  ;;  %v1742_v7 = vshrl.u32 %v4404_v43, 16  ;;  %v4467_v50 = vld [vmem:[%s5288_s22 + $0x6c] sm:$0xe] }
  0x2d   : > { %v4292_v63 = vcombine.low %v715_v52, %v725_v58  ;;  %v686_v1 = vrot.slane %v685_v53, 4  ;;  %v1740_v3 = vrot.slane %v1738_v56, 5  ;;  %v695_v4 = vor.u32 %v694_v59, %v690_v47  ;;  %v4468_v55 = vld [vmem:[%s5288_s22 + $0x70] sm:$0xf] }
  0x2e   : > { %v1748_v8 = vshll.u32 %v4405_v54, 16  ;;  %v1537_v9 = vshrl.u32 %v4379_v57, 16  ;;  %v1735_v11 = vor.u32 %v1734_v2, %v1731_v61  ;;  %v1540_v13 = vshll.u32 %v4379_v57, 16  ;;  %v4443_v61 = vld [vmem:[%s5288_s22 + $0xc] sm:$0xe] }
  0x2f   : > { %936 = vrot.lane.b32.xlu1 %v4292_v63, %s5233_s25  ;;  %v691_v10 = vsel %vm5340_vm5, %v686_v1, %v690_v47  ;;  %v1546_v14 = vshll.u32 %v4380_v62, 16  ;;  %v696_v16 = vrot.slane %v695_v4, 4  ;;  %v1744_v17 = vrot.slane %v1742_v7, 4 }
  0x30   : > { %v1750_v18 = vrot.slane %v1748_v8, 5  ;;  %v1539_v19 = vrot.slane %v1537_v9, 4  ;;  %v1736_v20 = vrot.slane %v1735_v11, 4  ;;  %v1542_v21 = vrot.slane %v1540_v13, 5  ;;  %v4445_v9 = vld [vmem:[%s5288_s22 + $0x14] sm:$0x1] }
  0x31   : > { %v1548_v22 = vrot.slane %v1546_v14, 5  ;;  %v1550_v23 = vshrl.u32 %v4380_v62, 16  ;;  %v701_v24 = vsel %vm5340_vm5, %v696_v16, %v700_v60  ;;  %v1745_v25 = vor.u32 %v1744_v17, %v1740_v3  ;;  %v4469_v60 = vld [vmem:[%s5288_s22 + $0x74] sm:$0x1] }
  0x32   : > { %v1556_v26 = vshll.u32 %v4381_v12, 16  ;;  %v1753_v28 = vshrl.u32 %v4406_v15, 16  ;;  %v4291_v29 = vcombine.low %v691_v10, %v701_v24  ;;  %v1741_v30 = vsel %vm5340_vm5, %v1736_v20, %v1740_v3  ;;  %v4444_v3 = vld [vmem:[%s5288_s22 + $0x10] sm:$0xf] }
  0x33   : > { %1441 = vrot.lane.b32.xlu1 %v5030_v6, %s5231_s23  ;;  %v1543_v31 = vor.u32 %v1542_v21, %v1539_v19  ;;  %v1552_v32 = vrot.slane %v1550_v23, 4  ;;  %v1746_v35 = vrot.slane %v1745_v25, 4  ;;  %v1756_v38 = vshll.u32 %v4406_v15, 16 }
  0x34   : > { %v1558_v36 = vrot.slane %v1556_v26, 5  ;;  %v1755_v37 = vrot.slane %v1753_v28, 4  ;;  %934 = vrot.lane.b32.xlu0 %v4291_v29, %s5233_s25  ;;  %v1762_v43 = vshll.u32 %v4407_v27, 16  ;;  %v1766_v44 = vshrl.u32 %v4407_v27, 16  ;;  %v4471_v27 = vld [vmem:[%s5288_s22 + $0x7c] sm:$0xf] }
  0x35   : > { %v1544_v41 = vrot.slane %v1543_v31, 4  ;;  %v1553_v42 = vor.u32 %v1552_v32, %v1548_v22  ;;  %v1751_v46 = vsel %vm5340_vm5, %v1746_v35, %v1750_v18  ;;  %v1758_v47 = vrot.slane %v1756_v38, 5  ;;  %v4472_v28 = vld [vmem:[%s5288_s22 + $0x80] sm:$0x1]  ;;  %v4447_v38 = vld [vmem:[%s5288_s22 + $0x1c] sm:$0xf] }
  0x36   : > { %v1772_v48 = vshll.u32 %v4408_v33, 16  ;;  %v1561_v49 = vshrl.u32 %v4382_v34, 16  ;;  %v4435_v51 = vcombine.low %v1741_v30, %v1751_v46  ;;  %v1764_v54 = vrot.slane %v1762_v43, 5  ;;  %v4446_v33 = vld [vmem:[%s5288_s22 + $0x18] sm:$0xe] }
  0x37   : > { %v1549_v52 = vsel %vm5340_vm5, %v1544_v41, %v1548_v22  ;;  %v1554_v53 = vrot.slane %v1553_v42, 4  ;;  %v1759_v56 = vor.u32 %v1758_v47, %v1755_v37  ;;  %v1768_v57 = vrot.slane %v1766_v44, 4  ;;  %v4470_v22 = vld [vmem:[%s5288_s22 + $0x78] sm:$0xe] }
  0x38   : > { %v1774_v58 = vrot.slane %v1772_v48, 5  ;;  %v1563_v59 = vrot.slane %v1561_v49, 4  ;;  %1425 = vrot.lane.b32.xlu0 %v5031_v40, %s5231_s23  ;;  %1984 = vrot.lane.b32.xlu1 %v4435_v51, %s5234_s26  ;;  %v1564_v63 = vshll.u32 %v4382_v34, 16  ;;  %v1570_v1 = vshll.u32 %v4383_v39, 16  ;;  %v4595_v44 = vld [vmem:[%s5288_s22 + $0x78] sm:$0xf] }
  0x39   : > { %v1559_v62 = vsel %vm5340_vm5, %v1554_v53, %v1558_v36  ;;  %v1574_v2 = vshrl.u32 %v4383_v39, 16  ;;  %v1760_v6 = vrot.slane %v1759_v56, 4  ;;  %v1769_v7 = vor.u32 %v1768_v57, %v1764_v54  ;;  %v4448_v39 = vld [vmem:[%s5288_s22 + $0x20] sm:$0x1] }
  0x3a   : > { %v4427_v4 = vcombine.low %v1549_v52, %v1559_v62  ;;  %v1580_v8 = vshll.u32 %v4384_v45, 16  ;;  %v1566_v10 = vrot.slane %v1564_v63, 5  ;;  %v1572_v11 = vrot.slane %v1570_v1, 5  ;;  %v4596_v45 = vld [vmem:[%s5288_s22 + $0x7c] sm:$0xf] }
  0x3b   : > { %v1576_v12 = vrot.slane %v1574_v2, 4  ;;  %v4499_v13 = vrot.slane %v4467_v50, 9  ;;  %v1765_v14 = vsel %vm5340_vm5, %v1760_v6, %v1764_v54  ;;  %v1770_v15 = vrot.slane %v1769_v7, 4  ;;  %v4597_v54 = vld [vmem:[%s5288_s22 + $0x80] sm:$0x1] }
  0x3c   : > { %v1582_v16 = vrot.slane %v1580_v8, 5  ;;  %v2187_v17 = vrot.slane %v4468_v55, 5  ;;  %1968 = vrot.lane.b32.xlu0 %v4427_v4, %s5234_s26  ;;  %v1567_v18 = vor.u32 %v1566_v10, %v1563_v59  ;;  %v2190_v20 = vrot.slane %v4469_v60, 5  ;;  %v4571_v59 = vld [vmem:[%s5288_s22 + $0x18] sm:$0xf] }
  0x3d   : > { %v1577_v19 = vor.u32 %v1576_v12, %v1572_v11  ;;  %v4491_v21 = vrot.slane %v4443_v61, 9  ;;  %v1775_v23 = vsel %vm5340_vm5, %v1770_v15, %v1774_v58  ;;  %v2131_v26 = vrot.slane %v4444_v3, 5  ;;  %v4572_v1 = vld [vmem:[%s5288_s22 + $0x1c] sm:$0xf]  ;;  %v4573_v10 = vld [vmem:[%s5288_s22 + $0x20] sm:$0x1] }
  0x3e   : > { %v2188_v24 = vsel %vm5290_vm2, %v4499_v13, %v2187_v17  ;;  %v2189_v25 = vrot.slane %v2187_v17, 4  ;;  %v4436_v29 = vcombine.low %v1765_v14, %v1775_v23  ;;  %v1568_v30 = vrot.slane %v1567_v18, 4  ;;  %v5032_v17 = vld [vmem:[%s5288_s22 + $0x78] sm:$0xff]  }
  0x3f   : > { %v1578_v31 = vrot.slane %v1577_v19, 4  ;;  %v2134_v32 = vrot.slane %v4445_v9, 5  ;;  %v2132_v35 = vsel %vm5290_vm2, %v4491_v21, %v2131_v26  ;;  %v2133_v36 = vrot.slane %v2131_v26, 4 }
  0x40   : > { %v2191_v34 = vsel %vm5290_vm2, %v2189_v25, %v2190_v20  ;;  %v4500_v37 = vrot.slane %v4470_v22, 9  ;;  %1986 = vrot.lane.b32.xlu1 %v4436_v29, %s5234_s26  ;;  %v1573_v40 = vsel %vm5340_vm5, %v1568_v30, %v1572_v11  ;;  %v2194_v43 = vrot.slane %v4471_v27, 5  ;;  %v4599_v22 = vld [vmem:[%s5288_s22 + $0x88] sm:$0xf]  ;;  %v5033_v27 = vld [vmem:[%s5288_s22 + $0x18] sm:$0xff]  }
  0x41   : > { %v1583_v41 = vsel %vm5340_vm5, %v1578_v31, %v1582_v16  ;;  %v4515_v42 = vcombine.low %v2188_v24, %v2191_v34  ;;  %v2135_v47 = vsel %vm5290_vm2, %v2133_v36, %v2134_v32  ;;  %v2197_v48 = vrot.slane %v4472_v28, 5  ;;  %v4598_v16 = vld [vmem:[%s5288_s22 + $0x84] sm:$0xf] }
  0x42   : > { %v4428_v46 = vcombine.low %v1573_v40, %v1583_v41  ;;  %v4492_v49 = vrot.slane %v4446_v33, 9  ;;  %v4507_v50 = vcombine.low %v2132_v35, %v2135_v47  ;;  %v2195_v51 = vsel %vm5290_vm2, %v4500_v37, %v2194_v43  ;;  %v4600_v35 = vld [vmem:[%s5288_s22 + $0x8c] sm:$0x1]  ;;  %v4574_v37 = vld [vmem:[%s5288_s22 + $0x24] sm:$0xf] }
  0x43   : > { %v2196_v52 = vrot.slane %v2194_v43, 4  ;;  %v2138_v53 = vrot.slane %v4447_v38, 5  ;;  %v2141_v55 = vrot.slane %v4448_v39, 5  ;;  %v2776_v56 = vshrl.u32 %v4595_v44, 16  ;;  %v5034_v38 = vld [vmem:[%s5288_s22 + $0x84] sm:$0xff]  }
  0x44   : > { %1970 = vrot.lane.b32.xlu0 %v4428_v46, %s5234_s26  ;;  %v2779_v57 = vshll.u32 %v4595_v44, 16  ;;  %v2785_v58 = vshll.u32 %v4596_v45, 16  ;;  %2305 = vrot.lane.b32.xlu1 %v4515_v42, %s5235_s27  ;;  %v2789_v63 = vshrl.u32 %v4596_v45, 16  ;;  %v2795_v9 = vshll.u32 %v4597_v54, 16  ;;  %v4575_v43 = vld [vmem:[%s5288_s22 + $0x28] sm:$0xf] }
  0x45   : > { %v2198_v60 = vsel %vm5290_vm2, %v2196_v52, %v2197_v48  ;;  %v2139_v61 = vsel %vm5290_vm2, %v4492_v49, %v2138_v53  ;;  %v2140_v62 = vrot.slane %v2138_v53, 4  ;;  %v2778_v3 = vrot.slane %v2776_v56, 4  ;;  %v4576_v48 = vld [vmem:[%s5288_s22 + $0x2c] sm:$0x1]  ;;  %v4659_v53 = vld [vmem:[%s5288_s22 + $0x78] sm:$0xe] }
  0x46   : > { %v4516_v2 = vcombine.low %v2195_v51, %v2198_v60  ;;  %v2781_v4 = vrot.slane %v2779_v57, 5  ;;  %v2787_v6 = vrot.slane %v2785_v58, 5  ;;  %v2791_v8 = vrot.slane %v2789_v63, 4  ;;  %v5035_v54 = vld [vmem:[%s5288_s22 + $0x24] sm:$0xff]  }
  0x47   : > { %v2142_v7 = vsel %vm5290_vm2, %v2140_v62, %v2141_v55  ;;  %v2584_v11 = vshrl.u32 %v4571_v59, 16  ;;  %v2587_v14 = vshll.u32 %v4571_v59, 16  ;;  %v2593_v15 = vshll.u32 %v4572_v1, 16  ;;  %v4660_v59 = vld [vmem:[%s5288_s22 + $0x7c] sm:$0xf] }
  0x48   : > { %2289 = vrot.lane.b32.xlu0 %v4507_v50, %s5235_s27  ;;  %v4508_v12 = vcombine.low %v2139_v61, %v2142_v7  ;;  %v2782_v13 = vor.u32 %v2781_v4, %v2778_v3  ;;  %2307 = vrot.lane.b32.xlu1 %v4516_v2, %s5235_s27  ;;  %v2792_v18 = vor.u32 %v2791_v8, %v2787_v6  ;;  %v2797_v19 = vrot.slane %v2795_v9, 5  ;;  %v4635_v7 = vld [vmem:[%s5288_s22 + $0x18] sm:$0xe]  ;;  %v4636_v8 = vld [vmem:[%s5288_s22 + $0x1c] sm:$0xf] }
  0x49   : > { %v2586_v20 = vrot.slane %v2584_v11, 4  ;;  %v2597_v21 = vshrl.u32 %v4572_v1, 16  ;;  %v2589_v24 = vrot.slane %v2587_v14, 5  ;;  %v2595_v25 = vrot.slane %v2593_v15, 5  ;;  %v4661_v1 = vld [vmem:[%s5288_s22 + $0x80] sm:$0x1] }
  0x4a   : > { %v2783_v23 = vrot.slane %v2782_v13, 4  ;;  %v2603_v26 = vshll.u32 %v4573_v10, 16  ;;  %v2793_v28 = vrot.slane %v2792_v18, 4  ;;  %v2800_v30 = vshrl.u32 %v4598_v16, 16 }
  0x4b   : > { %v2599_v29 = vrot.slane %v2597_v21, 4  ;;  %v2803_v31 = vshll.u32 %v4598_v16, 16  ;;  %v2590_v33 = vor.u32 %v2589_v24, %v2586_v20  ;;  %v2809_v36 = vshll.u32 %v4599_v22, 16 }
  0x4c   : > { %2291 = vrot.lane.b32.xlu0 %v4508_v12, %s5235_s27  ;;  %v2788_v32 = vsel %vm5340_vm5, %v2783_v23, %v2787_v6  ;;  %v2605_v34 = vrot.slane %v2603_v26, 5  ;;  %2486 = vrot.lane.b32.xlu1 %v5032_v17, %s5236_s28  ;;  %v2798_v39 = vsel %vm5340_vm5, %v2793_v28, %v2797_v19  ;;  %v2802_v41 = vrot.slane %v2800_v30, 4  ;;  %v4637_v17 = vld [vmem:[%s5288_s22 + $0x20] sm:$0x1] }
  0x4d   : > { %v2600_v40 = vor.u32 %v2599_v29, %v2595_v25  ;;  %v2805_v42 = vrot.slane %v2803_v31, 5  ;;  %v4627_v44 = vcombine.low %v2788_v32, %v2798_v39  ;;  %v2591_v45 = vrot.slane %v2590_v33, 4  ;;  %v467_v32 = vld [vmem:[%s5288_s22 + $0x80] sm:$0x1] }
  0x4e   : > { %v2811_v46 = vrot.slane %v2809_v36, 5  ;;  %v2813_v47 = vshrl.u32 %v4599_v22, 16  ;;  %v2819_v51 = vshll.u32 %v4600_v35, 16  ;;  %v2608_v52 = vshrl.u32 %v4574_v37, 16  ;;  %v465_v22 = vld [vmem:[%s5288_s22 + $0x78] sm:$0xf] }
  0x4f   : > { %v2601_v49 = vrot.slane %v2600_v40, 4  ;;  %v2806_v50 = vor.u32 %v2805_v42, %v2802_v41  ;;  %v2596_v55 = vsel %vm5340_vm5, %v2591_v45, %v2595_v25  ;;  %v2611_v57 = vshll.u32 %v4574_v37, 16  ;;  %v441_v37 = vld [vmem:[%s5288_s22 + $0x18] sm:$0xf] }
  0x50   : > { %2470 = vrot.lane.b32.xlu0 %v5033_v27, %s5236_s28  ;;  %v2815_v56 = vrot.slane %v2813_v47, 4  ;;  %v2617_v58 = vshll.u32 %v4575_v43, 16  ;;  %2488 = vrot.lane.b32.xlu1 %v5034_v38, %s5236_s28  ;;  %v2821_v62 = vrot.slane %v2819_v51, 5  ;;  %v2610_v63 = vrot.slane %v2608_v52, 4  ;;  %v466_v27 = vld [vmem:[%s5288_s22 + $0x7c] sm:$0xf] }
  0x51   : > { %v2606_v60 = vsel %vm5340_vm5, %v2601_v49, %v2605_v34  ;;  %v2807_v61 = vrot.slane %v2806_v50, 4  ;;  %v2613_v4 = vrot.slane %v2611_v57, 5  ;;  %v2621_v10 = vshrl.u32 %v4575_v43, 16  ;;  %v442_v38 = vld [vmem:[%s5288_s22 + $0x1c] sm:$0xf] }
  0x52   : > { %v4619_v2 = vcombine.low %v2596_v55, %v2606_v60  ;;  %v2816_v3 = vor.u32 %v2815_v56, %v2811_v46  ;;  %v2619_v6 = vrot.slane %v2617_v58, 5  ;;  %v2627_v11 = vshll.u32 %v4576_v48, 16  ;;  %v443_v43 = vld [vmem:[%s5288_s22 + $0x20] sm:$0x1]  ;;  %v4662_v48 = vld [vmem:[%s5288_s22 + $0x84] sm:$0xe] }
  0x53   : > { %v2812_v9 = vsel %vm5340_vm5, %v2807_v61, %v2811_v46  ;;  %v4691_v12 = vrot.slane %v4659_v53, 9  ;;  %v2614_v14 = vor.u32 %v2613_v4, %v2610_v63  ;;  %v3234_v15 = vrot.slane %v4660_v59, 5  ;;  %v4663_v53 = vld [vmem:[%s5288_s22 + $0x88] sm:$0xf]  ;;  %v4638_v59 = vld [vmem:[%s5288_s22 + $0x24] sm:$0xe] }
  0x54   : > { %2472 = vrot.lane.b32.xlu0 %v5035_v54, %s5236_s28  ;;  %v2817_v13 = vrot.slane %v2816_v3, 4  ;;  %v3237_v16 = vrot.slane %v4661_v1, 5  ;;  %3031 = vrot.lane.b32.xlu1 %v4627_v44, %s5237_s29  ;;  %v2623_v18 = vrot.slane %v2621_v10, 4  ;;  %v2629_v19 = vrot.slane %v2627_v11, 5  ;;  %v4664_v54 = vld [vmem:[%s5288_s22 + $0x8c] sm:$0x1] }
  0x55   : > { %v4683_v20 = vrot.slane %v4635_v7, 9  ;;  %v3178_v21 = vrot.slane %v4636_v8, 5  ;;  %v2615_v24 = vrot.slane %v2614_v14, 4  ;;  %v3235_v25 = vsel %vm5290_vm2, %v4691_v12, %v3234_v15  ;;  %v4639_v1 = vld [vmem:[%s5288_s22 + $0x28] sm:$0xf] }
  0x56   : > { %v2822_v23 = vsel %vm5340_vm5, %v2817_v13, %v2821_v62  ;;  %v3236_v26 = vrot.slane %v3234_v15, 4  ;;  %v2624_v29 = vor.u32 %v2623_v18, %v2619_v6  ;;  %v3181_v35 = vrot.slane %v4637_v17, 5  ;;  %v4640_v7 = vld [vmem:[%s5288_s22 + $0x2c] sm:$0x1]  ;;  %v468_v12 = vld [vmem:[%s5288_s22 + $0x84] sm:$0xf] }
  0x57   : > { %v4628_v28 = vcombine.low %v2812_v9, %v2822_v23  ;;  %v3179_v30 = vsel %vm5290_vm2, %v4683_v20, %v3178_v21  ;;  %v3180_v31 = vrot.slane %v3178_v21, 4  ;;  %v2620_v33 = vsel %vm5340_vm5, %v2615_v24, %v2619_v6  ;;  %v469_v21 = vld [vmem:[%s5288_s22 + $0x88] sm:$0xf] }
  0x58   : > { %3015 = vrot.lane.b32.xlu0 %v4619_v2, %s5237_s29  ;;  %v3238_v34 = vsel %vm5290_vm2, %v3236_v26, %v3237_v16  ;;  %v727_v36 = vshrl.u32 %v465_v22, 16  ;;  %v2625_v39 = vrot.slane %v2624_v29, 4  ;;  %v730_v41 = vshll.u32 %v465_v22, 16 }
  0x59   : > { %3033 = vrot.lane.b32.xlu1 %v4628_v28, %s5237_s29  ;;  %v4707_v40 = vcombine.low %v3235_v25, %v3238_v34  ;;  %v736_v42 = vshll.u32 %v466_v27, 16  ;;  %v3182_v44 = vsel %vm5290_vm2, %v3180_v31, %v3181_v35  ;;  %v740_v46 = vshrl.u32 %v466_v27, 16 }
  0x5a   : > { %v729_v45 = vrot.slane %v727_v36, 4  ;;  %v746_v47 = vshll.u32 %v467_v32, 16  ;;  %v2630_v49 = vsel %vm5340_vm5, %v2625_v39, %v2629_v19  ;;  %v4699_v50 = vcombine.low %v3179_v30, %v3182_v44  ;;  %v444_v39 = vld [vmem:[%s5288_s22 + $0x24] sm:$0xf] }
  0x5b   : > { %v732_v51 = vrot.slane %v730_v41, 5  ;;  %v738_v52 = vrot.slane %v736_v42, 5  ;;  %v4620_v55 = vcombine.low %v2620_v33, %v2630_v49  ;;  %v742_v56 = vrot.slane %v740_v46, 4  ;;  %v470_v33 = vld [vmem:[%s5288_s22 + $0x8c] sm:$0x1] }
  0x5c   : > { %v748_v57 = vrot.slane %v746_v47, 5  ;;  %v535_v58 = vshrl.u32 %v441_v37, 16  ;;  %v538_v61 = vshll.u32 %v441_v37, 16  ;;  %v544_v62 = vshll.u32 %v442_v38, 16  ;;  %v1013_v46 = vld [vmem:[%s5288_s22 + $0x78] sm:$0xe] }
  0x5d   : > { %3352 = vrot.lane.b32.xlu1 %v4707_v40, %s5238_s30  ;;  %v733_v60 = vor.u32 %v732_v51, %v729_v45  ;;  %v548_v63 = vshrl.u32 %v442_v38, 16  ;;  %3017 = vrot.lane.b32.xlu0 %v4620_v55, %s5237_s29  ;;  %v743_v2 = vor.u32 %v742_v56, %v738_v52  ;;  %v554_v4 = vshll.u32 %v443_v43, 16  ;;  %v445_v40 = vld [vmem:[%s5288_s22 + $0x28] sm:$0xf]  ;;  %v446_v45 = vld [vmem:[%s5288_s22 + $0x2c] sm:$0x1] }
  0x5e   : > { %v537_v3 = vrot.slane %v535_v58, 4  ;;  %v4692_v6 = vrot.slane %v4662_v48, 9  ;;  %v540_v9 = vrot.slane %v538_v61, 5  ;;  %v546_v10 = vrot.slane %v544_v62, 5  ;;  %v1014_v51 = vld [vmem:[%s5288_s22 + $0x7c] sm:$0xf] }
  0x5f   : > { %v734_v8 = vrot.slane %v733_v60, 4  ;;  %v550_v11 = vrot.slane %v548_v63, 4  ;;  %v744_v13 = vrot.slane %v743_v2, 4  ;;  %v556_v14 = vrot.slane %v554_v4, 5  ;;  %v1015_v56 = vld [vmem:[%s5288_s22 + $0x80] sm:$0x1] }
  0x60   : > { %v3241_v15 = vrot.slane %v4663_v53, 5  ;;  %v3244_v16 = vrot.slane %v4664_v54, 5  ;;  %v541_v18 = vor.u32 %v540_v9, %v537_v3  ;;  %v4684_v20 = vrot.slane %v4638_v59, 9  ;;  %v989_v61 = vld [vmem:[%s5288_s22 + $0x18] sm:$0xe] }
  0x61   : > { %v739_v17 = vsel %vm5340_vm5, %v734_v8, %v738_v52  ;;  %v551_v19 = vor.u32 %v550_v11, %v546_v10  ;;  %3336 = vrot.lane.b32.xlu0 %v4699_v50, %s5238_s30  ;;  %v749_v22 = vsel %vm5340_vm5, %v744_v13, %v748_v57  ;;  %v3185_v25 = vrot.slane %v4639_v1, 5  ;;  %v990_v3 = vld [vmem:[%s5288_s22 + $0x1c] sm:$0xf]  ;;  %v991_v9 = vld [vmem:[%s5288_s22 + $0x20] sm:$0x1] }
  0x62   : > { %v3242_v23 = vsel %vm5290_vm2, %v4692_v6, %v3241_v15  ;;  %v3243_v24 = vrot.slane %v3241_v15, 4  ;;  %v4293_v26 = vcombine.low %v739_v17, %v749_v22  ;;  %v542_v27 = vrot.slane %v541_v18, 4  ;;  %v5058_v15 = vld [vmem:[%s6521_s1] sm:$0xff]  }
  0x63   : > { %v552_v28 = vrot.slane %v551_v19, 4  ;;  %v3188_v29 = vrot.slane %v4640_v7, 5  ;;  %v3186_v31 = vsel %vm5290_vm2, %v4684_v20, %v3185_v25  ;;  %v3187_v32 = vrot.slane %v3185_v25, 4  ;;  %v1017_v20 = vld [vmem:[%s5288_s22 + $0x88] sm:$0xf]  ;;  %4949 = vmatprep.subr.bf16.mxu0 %v5058_v15  ;;  %4987 = vmatprep.subr.bf16.mxu1 %v5058_v15 }
  0x64   : > { %v3245_v30 = vsel %vm5290_vm2, %v3243_v24, %v3244_v16  ;;  %v751_v34 = vshrl.u32 %v468_v12, 16  ;;  %938 = vrot.lane.b32.xlu1 %v4293_v26, %s5233_s25  ;;  %v547_v35 = vsel %vm5340_vm5, %v542_v27, %v546_v10  ;;  %v754_v38 = vshll.u32 %v468_v12, 16  ;;  %v992_v26 = vld [vmem:[%s5288_s22 + $0x24] sm:$0xe]  ;;  %v5059_v27 = vld [vmem:[%s6521_s1 + $0x8] sm:$0xff]   ;;  %4950 = vmatpush3.bf16.msra.mxu0 %v5058_v15 }
  0x65   : > { %v557_v36 = vsel %vm5340_vm5, %v552_v28, %v556_v14  ;;  %v4708_v37 = vcombine.low %v3242_v23, %v3245_v30  ;;  %v3189_v42 = vsel %vm5290_vm2, %v3187_v32, %v3188_v29  ;;  %v760_v44 = vshll.u32 %v469_v21, 16  ;;  %v1016_v14 = vld [vmem:[%s5288_s22 + $0x84] sm:$0xe]  ;;  %v993_v32 = vld [vmem:[%s5288_s22 + $0x28] sm:$0xf]  ;;  %4990 = vmatpush3.bf16.msra.mxu1 %v5058_v15  ;;  %4951 = vmatprep.subr.bf16.mxu0 %v5059_v27 }
  0x66   : > { %v4285_v41 = vcombine.low %v547_v35, %v557_v36  ;;  %v753_v43 = vrot.slane %v751_v34, 4  ;;  %v4700_v47 = vcombine.low %v3186_v31, %v3189_v42  ;;  %v756_v48 = vrot.slane %v754_v38, 5  ;;  %v4409_v42 = vld [vmem:[%s5288_s22 + $0x84] sm:$0xf]  ;;  %4988 = vmatprep.subr.bf16.mxu1 %v5059_v27 }
  0x67   : > { %v764_v49 = vshrl.u32 %v469_v21, 16  ;;  %v770_v50 = vshll.u32 %v470_v33, 16  ;;  %v762_v52 = vrot.slane %v760_v44, 5  ;;  %v559_v53 = vshrl.u32 %v444_v39, 16  ;;  %v1018_v21 = vld [vmem:[%s5288_s22 + $0x8c] sm:$0x1] }
  0x68   : > { %922 = vrot.lane.b32.xlu0 %v4285_v41, %s5233_s25  ;;  %v562_v54 = vshll.u32 %v444_v39, 16  ;;  %v568_v55 = vshll.u32 %v445_v40, 16  ;;  %3354 = vrot.lane.b32.xlu1 %v4708_v37, %s5238_s30  ;;  %v757_v57 = vor.u32 %v756_v48, %v753_v43  ;;  %v572_v60 = vshrl.u32 %v445_v40, 16  ;;  %v994_v37 = vld [vmem:[%s5288_s22 + $0x2c] sm:$0x1] }
  0x69   : > { %v766_v58 = vrot.slane %v764_v49, 4  ;;  %v772_v59 = vrot.slane %v770_v50, 5  ;;  %v561_v62 = vrot.slane %v559_v53, 4  ;;  %v578_v2 = vshll.u32 %v446_v45, 16  ;;  %v4410_v43 = vld [vmem:[%s5288_s22 + $0x88] sm:$0xf]  ;;  %4952 = vmatpush3.bf16.msra.mxu0 %v5059_v27  ;;  %4991 = vmatpush3.bf16.msra.mxu1 %v5059_v27 }
  0x6a   : > { %v564_v63 = vrot.slane %v562_v54, 5  ;;  %v570_v1 = vrot.slane %v568_v55, 5  ;;  %v758_v4 = vrot.slane %v757_v57, 4  ;;  %v574_v7 = vrot.slane %v572_v60, 4  ;;  %v4411_v48 = vld [vmem:[%s5288_s22 + $0x8c] sm:$0x1] }
  0x6b   : > { %v767_v6 = vor.u32 %v766_v58, %v762_v52  ;;  %v4309_v8 = vrot.slane %v1013_v46, 9  ;;  %v580_v11 = vrot.slane %v578_v2, 5  ;;  %v1154_v12 = vrot.slane %v1014_v51, 5  ;;  %v4385_v53 = vld [vmem:[%s5288_s22 + $0x24] sm:$0xf] }
  0x6c   : > { %3338 = vrot.lane.b32.xlu0 %v4700_v47, %s5238_s30  ;;  %v565_v10 = vor.u32 %v564_v63, %v561_v62  ;;  %v1157_v13 = vrot.slane %v1015_v56, 5  ;;  %v763_v16 = vsel %vm5340_vm5, %v758_v4, %v762_v52  ;;  %v575_v18 = vor.u32 %v574_v7, %v570_v1  ;;  %v4386_v54 = vld [vmem:[%s5288_s22 + $0x28] sm:$0xf] }
  0x6d   : > { %v768_v17 = vrot.slane %v767_v6, 4  ;;  %v4301_v19 = vrot.slane %v989_v61, 9  ;;  %v1155_v23 = vsel %vm5290_vm2, %v4309_v8, %v1154_v12  ;;  %v1156_v24 = vrot.slane %v1154_v12, 4 }
  0x6e   : > { %v566_v22 = vrot.slane %v565_v10, 4  ;;  %v1098_v25 = vrot.slane %v990_v3, 5  ;;  %v576_v29 = vrot.slane %v575_v18, 4  ;;  %v1101_v30 = vrot.slane %v991_v9, 5 }
  0x6f   : > { %v773_v28 = vsel %vm5340_vm5, %v768_v17, %v772_v59  ;;  %v4310_v31 = vrot.slane %v1016_v14, 9  ;;  %v1158_v35 = vsel %vm5290_vm2, %v1156_v24, %v1157_v13  ;;  %v1161_v41 = vrot.slane %v1017_v20, 5  ;;  %v4387_v59 = vld [vmem:[%s5288_s22 + $0x2c] sm:$0x1]  ;;  %v5036_v20 = vld [vmem:[%s5288_s22 + $0x84] sm:$0xff]  }
  0x70   : > { %v4294_v33 = vcombine.low %v763_v16, %v773_v28  ;;  %v571_v34 = vsel %vm5340_vm5, %v566_v22, %v570_v1  ;;  %v1099_v36 = vsel %vm5290_vm2, %v4301_v19, %v1098_v25  ;;  %v581_v38 = vsel %vm5340_vm5, %v576_v29, %v580_v11  ;;  %v4412_v1 = vld [vmem:[%s5288_s22 + $0x90] sm:$0xf]  ;;  %v4413_v19 = vld [vmem:[%s5288_s22 + $0x94] sm:$0xf]  ;;  %v4414_v29 = vld [vmem:[%s5288_s22 + $0x98] sm:$0x1] }
  0x71   : > { %v4325_v39 = vcombine.low %v1155_v23, %v1158_v35  ;;  %v1100_v40 = vrot.slane %v1098_v25, 4  ;;  %v4286_v44 = vcombine.low %v571_v34, %v581_v38  ;;  %v1164_v45 = vrot.slane %v1018_v21, 5  ;;  %v4388_v35 = vld [vmem:[%s5288_s22 + $0x30] sm:$0xf] }
  0x72   : > { %940 = vrot.lane.b32.xlu1 %v4294_v33, %s5233_s25  ;;  %v4302_v46 = vrot.slane %v992_v26, 9  ;;  %v1105_v47 = vrot.slane %v993_v32, 5  ;;  %v1162_v50 = vsel %vm5290_vm2, %v4310_v31, %v1161_v41  ;;  %v1163_v51 = vrot.slane %v1161_v41, 4  ;;  %v5038_v41 = vld [vmem:[%s5288_s22 + $0x90] sm:$0xff]  }
  0x73   : > { %v1102_v49 = vsel %vm5290_vm2, %v1100_v40, %v1101_v30  ;;  %v1108_v52 = vrot.slane %v994_v37, 5  ;;  %924 = vrot.lane.b32.xlu0 %v4286_v44, %s5233_s25  ;;  %v1777_v58 = vshrl.u32 %v4409_v42, 16  ;;  %v1780_v61 = vshll.u32 %v4409_v42, 16  ;;  %v5037_v30 = vld [vmem:[%s5288_s22 + $0x24] sm:$0xff]   ;;  %v4389_v40 = vld [vmem:[%s5288_s22 + $0x34] sm:$0xf] }
  0x74   : > { %v4317_v55 = vcombine.low %v1099_v36, %v1102_v49  ;;  %v1106_v56 = vsel %vm5290_vm2, %v4302_v46, %v1105_v47  ;;  %v1107_v57 = vrot.slane %v1105_v47, 4  ;;  %v1165_v60 = vsel %vm5290_vm2, %v1163_v51, %v1164_v45  ;;  %v5039_v42 = vld [vmem:[%s5288_s22 + $0x30] sm:$0xff]  }
  0x75   : > { %v1786_v62 = vshll.u32 %v4410_v43, 16  ;;  %v1790_v63 = vshrl.u32 %v4410_v43, 16  ;;  %v4326_v2 = vcombine.low %v1162_v50, %v1165_v60  ;;  %v1779_v4 = vrot.slane %v1777_v58, 4  ;;  %v4390_v50 = vld [vmem:[%s5288_s22 + $0x38] sm:$0x1] }
  0x76   : > { %1262 = vrot.lane.b32.xlu1 %v4325_v39, %s5232_s24  ;;  %v1109_v3 = vsel %vm5290_vm2, %v1107_v57, %v1108_v52  ;;  %v1796_v6 = vshll.u32 %v4411_v48, 16  ;;  %v1782_v8 = vrot.slane %v1780_v61, 5  ;;  %v1585_v12 = vshrl.u32 %v4385_v53, 16  ;;  %v4474_v57 = vld [vmem:[%s5288_s22 + $0x88] sm:$0xf] }
  0x77   : > { %v4318_v7 = vcombine.low %v1106_v56, %v1109_v3  ;;  %v1788_v9 = vrot.slane %v1786_v62, 5  ;;  %v1792_v10 = vrot.slane %v1790_v63, 4  ;;  %1246 = vrot.lane.b32.xlu0 %v4317_v55, %s5232_s24  ;;  %v1588_v13 = vshll.u32 %v4385_v53, 16  ;;  %v4473_v56 = vld [vmem:[%s5288_s22 + $0x84] sm:$0xe] }
  0x78   : > { %v1798_v11 = vrot.slane %v1796_v6, 5  ;;  %v1594_v14 = vshll.u32 %v4386_v54, 16  ;;  %v1783_v15 = vor.u32 %v1782_v8, %v1779_v4  ;;  %v1598_v17 = vshrl.u32 %v4386_v54, 16  ;;  %v4475_v62 = vld [vmem:[%s5288_s22 + $0x8c] sm:$0x1] }
  0x79   : > { %v1793_v16 = vor.u32 %v1792_v10, %v1788_v9  ;;  %v1604_v18 = vshll.u32 %v4387_v59, 16  ;;  %v1587_v21 = vrot.slane %v1585_v12, 4  ;;  %v1590_v22 = vrot.slane %v1588_v13, 5  ;;  %v4449_v63 = vld [vmem:[%s5288_s22 + $0x24] sm:$0xe] }
  0x7a   : > { %1264 = vrot.lane.b32.xlu1 %v4326_v2, %s5232_s24  ;;  %v1596_v23 = vrot.slane %v1594_v14, 5  ;;  %v1801_v24 = vshrl.u32 %v4412_v1, 16  ;;  %v1784_v25 = vrot.slane %v1783_v15, 4  ;;  %v1600_v27 = vrot.slane %v1598_v17, 4  ;;  %v4450_v6 = vld [vmem:[%s5288_s22 + $0x28] sm:$0xf] }
  0x7b   : > { %v1794_v26 = vrot.slane %v1793_v16, 4  ;;  %v1606_v28 = vrot.slane %v1604_v18, 5  ;;  %1248 = vrot.lane.b32.xlu0 %v4318_v7, %s5232_s24  ;;  %v1591_v31 = vor.u32 %v1590_v22, %v1587_v21  ;;  %v1804_v33 = vshll.u32 %v4412_v1, 16  ;;  %v4476_v16 = vld [vmem:[%s5288_s22 + $0x90] sm:$0xe] }
  0x7c   : > { %v1803_v32 = vrot.slane %v1801_v24, 4  ;;  %v1810_v34 = vshll.u32 %v4413_v19, 16  ;;  %v1789_v36 = vsel %vm5340_vm5, %v1784_v25, %v1788_v9  ;;  %v1601_v38 = vor.u32 %v1600_v27, %v1596_v23  ;;  %v4477_v17 = vld [vmem:[%s5288_s22 + $0x94] sm:$0xf]  ;;  %v4478_v22 = vld [vmem:[%s5288_s22 + $0x98] sm:$0x1] }
  0x7d   : > { %v1799_v37 = vsel %vm5340_vm5, %v1794_v26, %v1798_v11  ;;  %v1814_v39 = vshrl.u32 %v4413_v19, 16  ;;  %v1592_v44 = vrot.slane %v1591_v31, 4  ;;  %v1806_v45 = vrot.slane %v1804_v33, 5  ;;  %v4451_v11 = vld [vmem:[%s5288_s22 + $0x2c] sm:$0x1] }
  0x7e   : > { %1443 = vrot.lane.b32.xlu1 %v5036_v20, %s5231_s23  ;;  %v4437_v43 = vcombine.low %v1789_v36, %v1799_v37  ;;  %v1812_v46 = vrot.slane %v1810_v34, 5  ;;  %v1602_v47 = vrot.slane %v1601_v38, 4  ;;  %v1820_v49 = vshll.u32 %v4414_v29, 16  ;;  %v4452_v27 = vld [vmem:[%s5288_s22 + $0x30] sm:$0xe] }
  0x7f   : > { %v1816_v48 = vrot.slane %v1814_v39, 4  ;;  %v1609_v51 = vshrl.u32 %v4388_v35, 16  ;;  %1427 = vrot.lane.b32.xlu0 %v5037_v30, %s5231_s23  ;;  %v1597_v52 = vsel %vm5340_vm5, %v1592_v44, %v1596_v23  ;;  %v1807_v53 = vor.u32 %v1806_v45, %v1803_v32  ;;  %v4453_v32 = vld [vmem:[%s5288_s22 + $0x34] sm:$0xf]  ;;  %v4454_v37 = vld [vmem:[%s5288_s22 + $0x38] sm:$0x1] }
  0x80   : > { %v1612_v54 = vshll.u32 %v4388_v35, 16  ;;  %v1618_v55 = vshll.u32 %v4389_v40, 16  ;;  %v1607_v58 = vsel %vm5340_vm5, %v1602_v47, %v1606_v28  ;;  %v1822_v60 = vrot.slane %v1820_v49, 5  ;;  %v4601_v38 = vld [vmem:[%s5288_s22 + $0x90] sm:$0xf] }
  0x81   : > { %v1817_v59 = vor.u32 %v1816_v48, %v1812_v46  ;;  %v1611_v61 = vrot.slane %v1609_v51, 4  ;;  %v4429_v1 = vcombine.low %v1597_v52, %v1607_v58  ;;  %v1808_v2 = vrot.slane %v1807_v53, 4  ;;  %v4603_v44 = vld [vmem:[%s5288_s22 + $0x98] sm:$0x1]  ;;  %v4577_v45 = vld [vmem:[%s5288_s22 + $0x30] sm:$0xf] }
  0x82   : > { %1445 = vrot.lane.b32.xlu1 %v5038_v41, %s5231_s23  ;;  %v1614_v3 = vrot.slane %v1612_v54, 5  ;;  %v1620_v4 = vrot.slane %v1618_v55, 5  ;;  %v1622_v8 = vshrl.u32 %v4389_v40, 16  ;;  %v1628_v9 = vshll.u32 %v4390_v50, 16 }
  0x83   : > { %v1818_v7 = vrot.slane %v1817_v59, 4  ;;  %v4501_v10 = vrot.slane %v4473_v56, 9  ;;  %1429 = vrot.lane.b32.xlu0 %v5039_v42, %s5231_s23  ;;  %v1813_v12 = vsel %vm5340_vm5, %v1808_v2, %v1812_v46  ;;  %v2201_v14 = vrot.slane %v4474_v57, 5  ;;  %v4578_v59 = vld [vmem:[%s5288_s22 + $0x34] sm:$0xf] }
  0x84   : > { %v1615_v13 = vor.u32 %v1614_v3, %v1611_v61  ;;  %v2204_v15 = vrot.slane %v4475_v62, 5  ;;  %v1624_v19 = vrot.slane %v1622_v8, 4  ;;  %v1630_v20 = vrot.slane %v1628_v9, 5 }
  0x85   : > { %v1823_v18 = vsel %vm5340_vm5, %v1818_v7, %v1822_v60  ;;  %v4493_v21 = vrot.slane %v4449_v63, 9  ;;  %v2202_v25 = vsel %vm5290_vm2, %v4501_v10, %v2201_v14  ;;  %v2203_v26 = vrot.slane %v2201_v14, 4  ;;  %v5636_v46 = vpop.permute.xlu1 %1439 }
  0x86   : > { %1988 = vrot.lane.b32.xlu1 %v4437_v43, %s5234_s26  ;;  %v4438_v23 = vcombine.low %v1813_v12, %v1823_v18  ;;  %v1616_v24 = vrot.slane %v1615_v13, 4  ;;  %v1625_v28 = vor.u32 %v1624_v19, %v1620_v4  ;;  %v2145_v29 = vrot.slane %v4450_v6, 5  ;;  %v4602_v43 = vld [vmem:[%s5288_s22 + $0x94] sm:$0xf]  ;;  %v4604_v12 = vld [vmem:[%s5288_s22 + $0x9c] sm:$0xf] }
  0x87   : > { %v2148_v30 = vrot.slane %v4451_v11, 5  ;;  %v4502_v31 = vrot.slane %v4476_v16, 9  ;;  %1972 = vrot.lane.b32.xlu0 %v4429_v1, %s5234_s26  ;;  %v2205_v34 = vsel %vm5290_vm2, %v2203_v26, %v2204_v15  ;;  %v2208_v35 = vrot.slane %v4477_v17, 5  ;;  %v5655_v11 = vpop.permute.xlu0 %1423  ;;  %v4605_v18 = vld [vmem:[%s5288_s22 + $0xa0] sm:$0xf] }
  0x88   : > { %v1621_v33 = vsel %vm5340_vm5, %v1616_v24, %v1620_v4  ;;  %v2211_v36 = vrot.slane %v4478_v22, 5  ;;  %v1626_v39 = vrot.slane %v1625_v28, 4  ;;  %v4517_v40 = vcombine.low %v2202_v25, %v2205_v34  ;;  %v4579_v4 = vld [vmem:[%s5288_s22 + $0x38] sm:$0x1]  ;;  %v5040_v24 = vld [vmem:[%s5288_s22 + $0x90] sm:$0xff]  }
  0x89   : > { %v2146_v41 = vsel %vm5290_vm2, %v4493_v21, %v2145_v29  ;;  %v2147_v42 = vrot.slane %v2145_v29, 4  ;;  %v2209_v47 = vsel %vm5290_vm2, %v4502_v31, %v2208_v35  ;;  %v2210_v48 = vrot.slane %v2208_v35, 4  ;;  %v4580_v29 = vld [vmem:[%s5288_s22 + $0x3c] sm:$0xf] }
  0x8a   : > { %1990 = vrot.lane.b32.xlu1 %v4438_v23, %s5234_s26  ;;  %v4494_v49 = vrot.slane %v4452_v27, 9  ;;  %v2152_v50 = vrot.slane %v4453_v32, 5  ;;  %v1631_v51 = vsel %vm5340_vm5, %v1626_v39, %v1630_v20  ;;  %v2155_v53 = vrot.slane %v4454_v37, 5  ;;  %v4606_v23 = vld [vmem:[%s5288_s22 + $0xa4] sm:$0x1] }
  0x8b   : > { %v2149_v52 = vsel %vm5290_vm2, %v2147_v42, %v2148_v30  ;;  %v2824_v54 = vshrl.u32 %v4601_v38, 16  ;;  %v4430_v55 = vcombine.low %v1621_v33, %v1631_v51  ;;  %v2212_v57 = vsel %vm5290_vm2, %v2210_v48, %v2211_v36  ;;  %v4581_v51 = vld [vmem:[%s5288_s22 + $0x40] sm:$0xf] }
  0x8c   : > { %v4509_v56 = vcombine.low %v2146_v41, %v2149_v52  ;;  %v2153_v58 = vsel %vm5290_vm2, %v4494_v49, %v2152_v50  ;;  %v4518_v60 = vcombine.low %v2209_v47, %v2212_v57  ;;  %v2154_v61 = vrot.slane %v2152_v50, 4  ;;  %v5658_v13 = vpop.permute.xlu1 %1258  ;;  %v5043_v57 = vld [vmem:[%s5288_s22 + $0x3c] sm:$0xff]  }
  0x8d   : > { %v2826_v62 = vrot.slane %v2824_v54, 4  ;;  %v2827_v63 = vshll.u32 %v4601_v38, 16  ;;  %1974 = vrot.lane.b32.xlu0 %v4430_v55, %s5234_s26  ;;  %v2833_v1 = vshll.u32 %v4602_v43, 16  ;;  %v2837_v2 = vshrl.u32 %v4602_v43, 16  ;;  %v5041_v38 = vld [vmem:[%s5288_s22 + $0x30] sm:$0xff]  }
  0x8e   : > { %2309 = vrot.lane.b32.xlu1 %v4517_v40, %s5235_s27  ;;  %v2843_v3 = vshll.u32 %v4603_v44, 16  ;;  %v2632_v6 = vshrl.u32 %v4577_v45, 16  ;;  %v2156_v7 = vsel %vm5290_vm2, %v2154_v61, %v2155_v53  ;;  %v2635_v9 = vshll.u32 %v4577_v45, 16  ;;  %v5669_v43 = vpop.permute.xlu0 %1242  ;;  %v5042_v45 = vld [vmem:[%s5288_s22 + $0x9c] sm:$0xff]   ;;  %v4582_v55 = vld [vmem:[%s5288_s22 + $0x44] sm:$0x1] }
  0x8f   : > { %v2829_v8 = vrot.slane %v2827_v63, 5  ;;  %v2641_v10 = vshll.u32 %v4578_v59, 16  ;;  %v4510_v14 = vcombine.low %v2153_v58, %v2156_v7  ;;  %v2835_v15 = vrot.slane %v2833_v1, 5 }
  0x90   : > { %v2839_v16 = vrot.slane %v2837_v2, 4  ;;  %v2845_v17 = vrot.slane %v2843_v3, 5  ;;  %v2634_v20 = vrot.slane %v2632_v6, 4  ;;  %v2637_v21 = vrot.slane %v2635_v9, 5 }
  0x91   : > { %v2830_v19 = vor.u32 %v2829_v8, %v2826_v62  ;;  %v2643_v22 = vrot.slane %v2641_v10, 5  ;;  %2293 = vrot.lane.b32.xlu0 %v4509_v56, %s5235_s27  ;;  %v2645_v26 = vshrl.u32 %v4578_v59, 16  ;;  %v2651_v27 = vshll.u32 %v4579_v4, 16  ;;  %v5671_v44 = vpop.permute.xlu1 %1260  ;;  %v4665_v62 = vld [vmem:[%s5288_s22 + $0x90] sm:$0xe] }
  0x92   : > { %2311 = vrot.lane.b32.xlu1 %v4518_v60, %s5235_s27  ;;  %v2840_v25 = vor.u32 %v2839_v16, %v2835_v15  ;;  %v2848_v28 = vshrl.u32 %v4604_v12, 16  ;;  %v2638_v31 = vor.u32 %v2637_v21, %v2634_v20  ;;  %v2851_v32 = vshll.u32 %v4604_v12, 16  ;;  %v4666_v4 = vld [vmem:[%s5288_s22 + $0x94] sm:$0xf]  ;;  %v4667_v10 = vld [vmem:[%s5288_s22 + $0x98] sm:$0x1]  ;;  %v5695_v20 = vpop.permute.xlu0 %1244 }
  0x93   : > { %v2831_v30 = vrot.slane %v2830_v19, 4  ;;  %v2857_v33 = vshll.u32 %v4605_v18, 16  ;;  %v2647_v35 = vrot.slane %v2645_v26, 4  ;;  %v2653_v36 = vrot.slane %v2651_v27, 5  ;;  %v4641_v12 = vld [vmem:[%s5288_s22 + $0x30] sm:$0xe] }
  0x94   : > { %v2841_v34 = vrot.slane %v2840_v25, 4  ;;  %v2850_v37 = vrot.slane %v2848_v28, 4  ;;  %v2639_v40 = vrot.slane %v2638_v31, 4  ;;  %v2853_v41 = vrot.slane %v2851_v32, 5  ;;  %v4643_v19 = vld [vmem:[%s5288_s22 + $0x38] sm:$0x1] }
  0x95   : > { %v2836_v39 = vsel %vm5340_vm5, %v2831_v30, %v2835_v15  ;;  %v2859_v42 = vrot.slane %v2857_v33, 5  ;;  %2295 = vrot.lane.b32.xlu0 %v4510_v14, %s5235_s27  ;;  %v2648_v48 = vor.u32 %v2647_v35, %v2643_v22  ;;  %v2861_v49 = vshrl.u32 %v4605_v18, 16  ;;  %v4642_v18 = vld [vmem:[%s5288_s22 + $0x34] sm:$0xf]  ;;  %v471_v30 = vld [vmem:[%s5288_s22 + $0x90] sm:$0xf] }
  0x96   : > { %2490 = vrot.lane.b32.xlu1 %v5040_v24, %s5236_s28  ;;  %v2846_v47 = vsel %vm5340_vm5, %v2841_v34, %v2845_v17  ;;  %v2867_v50 = vshll.u32 %v4606_v23, 16  ;;  %v2644_v53 = vsel %vm5340_vm5, %v2639_v40, %v2643_v22  ;;  %v2854_v54 = vor.u32 %v2853_v41, %v2850_v37  ;;  %v472_v35 = vld [vmem:[%s5288_s22 + $0x94] sm:$0xf]  ;;  %v473_v40 = vld [vmem:[%s5288_s22 + $0x98] sm:$0x1] }
  0x97   : > { %v4629_v52 = vcombine.low %v2836_v39, %v2846_v47  ;;  %v2656_v56 = vshrl.u32 %v4580_v29, 16  ;;  %v2649_v58 = vrot.slane %v2648_v48, 4  ;;  %v2863_v59 = vrot.slane %v2861_v49, 4  ;;  %v447_v41 = vld [vmem:[%s5288_s22 + $0x30] sm:$0xf] }
  0x98   : > { %v2869_v60 = vrot.slane %v2867_v50, 5  ;;  %v2659_v61 = vshll.u32 %v4580_v29, 16  ;;  %v2855_v63 = vrot.slane %v2854_v54, 4  ;;  %v2665_v2 = vshll.u32 %v4581_v51, 16  ;;  %v448_v49 = vld [vmem:[%s5288_s22 + $0x34] sm:$0xf] }
  0x99   : > { %v2658_v1 = vrot.slane %v2656_v56, 4  ;;  %v2669_v3 = vshrl.u32 %v4581_v51, 16  ;;  %2474 = vrot.lane.b32.xlu0 %v5041_v38, %s5236_s28  ;;  %v2654_v6 = vsel %vm5340_vm5, %v2649_v58, %v2653_v36  ;;  %v2864_v7 = vor.u32 %v2863_v59, %v2859_v42  ;;  %v5697_v21 = vpop.permute.xlu1 %920  ;;  %v449_v50 = vld [vmem:[%s5288_s22 + $0x38] sm:$0x1] }
  0x9a   : > { %2492 = vrot.lane.b32.xlu1 %v5042_v45, %s5236_s28  ;;  %v2661_v8 = vrot.slane %v2659_v61, 5  ;;  %v2675_v9 = vshll.u32 %v4582_v55, 16  ;;  %v4621_v14 = vcombine.low %v2644_v53, %v2654_v6  ;;  %v2860_v15 = vsel %vm5340_vm5, %v2855_v63, %v2859_v42  ;;  %v5047_v6 = vld [vmem:[%s5288_s22 + $0x60] sm:$0xff]  }
  0x9b   : > { %v2667_v16 = vrot.slane %v2665_v2, 5  ;;  %v2671_v17 = vrot.slane %v2669_v3, 4  ;;  %v2865_v22 = vrot.slane %v2864_v7, 4  ;;  %v4693_v25 = vrot.slane %v4665_v62, 9  ;;  %v5044_v2 = vld [vmem:[%s5288_s22 + $0xc] sm:$0xff]   ;;  %v5045_v3 = vld [vmem:[%s5288_s22] sm:$0xff]  }
  0x9c   : > { %v2662_v23 = vor.u32 %v2661_v8, %v2658_v1  ;;  %v2677_v24 = vrot.slane %v2675_v9, 5  ;;  %v3248_v27 = vrot.slane %v4666_v4, 5  ;;  %v3251_v28 = vrot.slane %v4667_v10, 5  ;;  %v5721_v55 = vpop.permute.xlu0 %918  ;;  %v5046_v4 = vld [vmem:[%s5288_s22 + $0x6c] sm:$0xff]   ;;  %v5056_v7 = vld [vmem:[%s5288_s22 + $0x78] sm:$0xff]   ;;  %v5060_v9 = vld [vmem:[%s5288_s22 + $0x84] sm:$0xff]  }
  0x9d   : > { %v2672_v26 = vor.u32 %v2671_v17, %v2667_v16  ;;  %v4685_v29 = vrot.slane %v4641_v12, 9  ;;  %2476 = vrot.lane.b32.xlu0 %v5043_v57, %s5236_s28  ;;  %v2870_v31 = vsel %vm5340_vm5, %v2865_v22, %v2869_v60  ;;  %v3192_v33 = vrot.slane %v4642_v18, 5  ;;  %v5057_v8 = vld [vmem:[%s5288_s22 + $0x18] sm:$0xff]   ;;  %420 = vst.msk [vmem:[#allocation2 + $0x8] sm:$0xff] %vm418_vm6, %v5044_v2  ;;  %419 = vst.msk [vmem:[#allocation2] sm:$0xff] %vm418_vm6, %v5045_v3 }
  0x9e   : > { %3035 = vrot.lane.b32.xlu1 %v4629_v52, %s5237_s29  ;;  %v2663_v32 = vrot.slane %v2662_v23, 4  ;;  %v3195_v34 = vrot.slane %v4643_v19, 5  ;;  %v4630_v36 = vcombine.low %v2860_v15, %v2870_v31  ;;  %v3249_v38 = vsel %vm5290_vm2, %v4693_v25, %v3248_v27  ;;  %v4669_v23 = vld [vmem:[%s5288_s22 + $0xa0] sm:$0xf]  ;;  %v4644_v25 = vld [vmem:[%s5288_s22 + $0x3c] sm:$0xe] }
  0x9f   : > { %v2673_v37 = vrot.slane %v2672_v26, 4  ;;  %v3250_v39 = vrot.slane %v3248_v27, 4  ;;  %v5713_v45 = vsel %vm5290_vm2, %v4685_v29, %v3192_v33  ;;  %v3194_v47 = vrot.slane %v3192_v33, 4  ;;  %v5061_v26 = vld [vmem:[%s5288_s22 + $0x24] sm:$0xff]   ;;  %428 = vst.msk [vmem:[#allocation2 + $0x48] sm:$0xff] %vm418_vm6, %v5046_v4  ;;  %427 = vst.msk [vmem:[#allocation2 + $0x40] sm:$0xff] %vm418_vm6, %v5047_v6 }
  0xa0   : > { %v2668_v42 = vsel %vm5340_vm5, %v2663_v32, %v2667_v16  ;;  %v775_v48 = vshrl.u32 %v471_v30, 16  ;;  %v778_v53 = vshll.u32 %v471_v30, 16  ;;  %v784_v54 = vshll.u32 %v472_v35, 16  ;;  %v5740_v16 = vld [vmem:[%s5288_s22 + $0x9c] sm:$0xe]  ;;  %429 = vst.msk [vmem:[#allocation2 + $0x50] sm:$0xff] %vm418_vm6, %v5056_v7 }
  0xa1   : > { %v2678_v51 = vsel %vm5340_vm5, %v2673_v37, %v2677_v24  ;;  %v3252_v52 = vsel %vm5290_vm2, %v3250_v39, %v3251_v28  ;;  %v5723_v56 = vpop.permute.xlu1 %936  ;;  %3019 = vrot.lane.b32.xlu0 %v4621_v14, %s5237_s29  ;;  %v3196_v59 = vsel %vm5290_vm2, %v3194_v47, %v3195_v34  ;;  %v788_v1 = vshrl.u32 %v472_v35, 16  ;;  %v5744_v24 = vld [vmem:[%s5288_s22 + $0xa4] sm:$0x1]  ;;  %v4645_v35 = vld [vmem:[%s5288_s22 + $0x40] sm:$0xf]  ;;  %421 = vst.msk [vmem:[#allocation2 + $0x10] sm:$0xff] %vm418_vm6, %v5057_v8 }
  0xa2   : > { %3037 = vrot.lane.b32.xlu1 %v4630_v36, %s5237_s29  ;;  %v4622_v57 = vcombine.low %v2668_v42, %v2678_v51  ;;  %v4709_v58 = vcombine.low %v3249_v38, %v3252_v52  ;;  %v777_v60 = vrot.slane %v775_v48, 4  ;;  %v4701_v61 = vcombine.low %v5713_v45, %v3196_v59  ;;  %v4646_v39 = vld [vmem:[%s5288_s22 + $0x44] sm:$0x1]  ;;  %430 = vst.msk [vmem:[#allocation2 + $0x58] sm:$0xff] %vm418_vm6, %v5060_v9  ;;  %v474_v51 = vld [vmem:[%s5288_s22 + $0x9c] sm:$0xf] }
  0xa3   : > { %v780_v62 = vrot.slane %v778_v53, 5  ;;  %v5730_v63 = vrot.slane %v784_v54, 5  ;;  %v794_v10 = vshll.u32 %v473_v40, 16  ;;  %v583_v12 = vshrl.u32 %v447_v41, 16  ;;  %422 = vst.msk [vmem:[#allocation2 + $0x18] sm:$0xff] %vm418_vm6, %v5061_v26 }
  0xa4   : > { %v586_v14 = vshll.u32 %v447_v41, 16  ;;  %v592_v15 = vshll.u32 %v448_v49, 16  ;;  %v790_v18 = vrot.slane %v788_v1, 4  ;;  %v596_v19 = vshrl.u32 %v448_v49, 16  ;;  %968 = vst.msk [vmem:[#allocation2 + $0x8] sm:$0xff] %vm966_vm7, %v5697_v21  ;;  %967 = vst.msk [vmem:[#allocation2] sm:$0xff] %vm966_vm7, %v5721_v55 }
  0xa5   : > { %v781_v17 = vor.u32 %v780_v62, %v777_v60  ;;  %v602_v22 = vshll.u32 %v449_v50, 16  ;;  %3021 = vrot.lane.b32.xlu0 %v4622_v57, %s5237_s29  ;;  %v796_v27 = vrot.slane %v794_v10, 5  ;;  %v585_v28 = vrot.slane %v583_v12, 4  ;;  %v5752_v37 = vpop.permute.xlu1 %1441  ;;  %976 = vst.msk [vmem:[#allocation2 + $0x48] sm:$0xff] %vm966_vm7, %v5723_v56  ;;  %v475_v55 = vld [vmem:[%s5288_s22 + $0xa0] sm:$0xf] }
  0xa6   : > { %3356 = vrot.lane.b32.xlu1 %v4709_v58, %s5238_s30  ;;  %v588_v29 = vrot.slane %v586_v14, 5  ;;  %v594_v30 = vrot.slane %v592_v15, 5  ;;  %v791_v32 = vor.u32 %v790_v18, %v5730_v63  ;;  %v598_v33 = vrot.slane %v596_v19, 4  ;;  %v935_v36 = vpop.permute.xlu0 %934  ;;  %1291 = vst.msk [vmem:[#allocation2] sm:$0xff] %vm1290_vm8, %v5669_v43  ;;  %1292 = vst.msk [vmem:[#allocation2 + $0x8] sm:$0xff] %vm1290_vm8, %v5695_v20 }
  0xa7   : > { %v782_v31 = vrot.slane %v781_v17, 4  ;;  %v604_v34 = vrot.slane %v602_v22, 5  ;;  %v4694_v45 = vrot.slane %v5740_v16, 9  ;;  %v3255_v48 = vrot.slane %v4669_v23, 5  ;;  %975 = vst.msk [vmem:[#allocation2 + $0x40] sm:$0xff] %vm966_vm7, %v935_v36 }
  0xa8   : > { %v589_v38 = vor.u32 %v588_v29, %v585_v28  ;;  %v792_v41 = vrot.slane %v791_v32, 4  ;;  %v599_v42 = vor.u32 %v598_v33, %v594_v30  ;;  %v3258_v49 = vrot.slane %v5744_v24, 5  ;;  %1300 = vst.msk [vmem:[#allocation2 + $0x48] sm:$0xff] %vm1290_vm8, %v5671_v44  ;;  %1299 = vst.msk [vmem:[#allocation2 + $0x40] sm:$0xff] %vm1290_vm8, %v5658_v13  ;;  %v476_v60 = vld [vmem:[%s5288_s22 + $0xa4] sm:$0x1] }
  0xa9   : > { %v787_v40 = vsel %vm5340_vm5, %v782_v31, %v5730_v63  ;;  %3340 = vrot.lane.b32.xlu0 %v4701_v61, %s5238_s30  ;;  %v4686_v50 = vrot.slane %v4644_v25, 9  ;;  %v3199_v21 = vrot.slane %v4645_v35, 5  ;;  %v3202_v54 = vrot.slane %v4646_v39, 5  ;;  %v450_v4 = vld [vmem:[%s5288_s22 + $0x3c] sm:$0xf]  ;;  %1481 = vst.msk [vmem:[#allocation2 + $0x48] sm:$0xff] %vm1471_vm9, %v5752_v37 }
  0xaa   : > { %v590_v47 = vrot.slane %v589_v38, 4  ;;  %v797_v52 = vsel %vm5340_vm5, %v792_v41, %v796_v27  ;;  %v600_v53 = vrot.slane %v599_v42, 4  ;;  %v1426_v56 = vpop.permute.xlu0 %1425  ;;  %v3256_v43 = vsel %vm5290_vm2, %v4694_v45, %v3255_v48  ;;  %v5797_v62 = vpop.permute.xlu1 %1984  ;;  %v451_v6 = vld [vmem:[%s5288_s22 + $0x40] sm:$0xf]  ;;  %v452_v12 = vld [vmem:[%s5288_s22 + $0x44] sm:$0x1] }
  0xab   : > { %v4295_v57 = vcombine.low %v787_v40, %v797_v52  ;;  %v3257_v20 = vrot.slane %v3255_v48, 4  ;;  %v3200_v44 = vsel %vm5290_vm2, %v4686_v50, %v3199_v21  ;;  %v3201_v13 = vrot.slane %v3199_v21, 4  ;;  %v1019_v18 = vld [vmem:[%s5288_s22 + $0x90] sm:$0xe]  ;;  %v1020_v19 = vld [vmem:[%s5288_s22 + $0x94] sm:$0xf] }
  0xac   : > { %v595_v58 = vsel %vm5340_vm5, %v590_v47, %v594_v30  ;;  %v605_v59 = vsel %vm5340_vm5, %v600_v53, %v604_v34  ;;  %v799_v61 = vshrl.u32 %v474_v51, 16  ;;  %v802_v2 = vshll.u32 %v474_v51, 16  ;;  %v1021_v27 = vld [vmem:[%s5288_s22 + $0x98] sm:$0x1]  ;;  %v995_v32 = vld [vmem:[%s5288_s22 + $0x30] sm:$0xe] }
  0xad   : > { %942 = vrot.lane.b32.xlu1 %v4295_v57, %s5233_s25  ;;  %v4287_v63 = vcombine.low %v595_v58, %v605_v59  ;;  %v3259_v1 = vsel %vm5290_vm2, %v3257_v20, %v3258_v49  ;;  %v808_v3 = vshll.u32 %v475_v55, 16  ;;  %v3203_v8 = vsel %vm5290_vm2, %v3201_v13, %v3202_v54  ;;  %v996_v38 = vld [vmem:[%s5288_s22 + $0x34] sm:$0xf]  ;;  %v997_v47 = vld [vmem:[%s5288_s22 + $0x38] sm:$0x1]  ;;  %1472 = vst.msk [vmem:[#allocation2] sm:$0xff] %vm1471_vm9, %v5655_v11 }
  0xae   : > { %v4710_v7 = vcombine.low %v3256_v43, %v3259_v1  ;;  %v801_v9 = vrot.slane %v799_v61, 4  ;;  %v812_v10 = vshrl.u32 %v475_v55, 16  ;;  %v4702_v14 = vcombine.low %v3200_v44, %v3203_v8  ;;  %v5810_v22 = vpop.permute.xlu0 %1968  ;;  %v5071_v40 = vld [vmem:[%s5288_s22 + $0x90] sm:$0xff]   ;;  %1480 = vst.msk [vmem:[#allocation2 + $0x40] sm:$0xff] %vm1471_vm9, %v5636_v46  ;;  %1473 = vst.msk [vmem:[#allocation2 + $0x8] sm:$0xff] %vm1471_vm9, %v1426_v56 }
  0xaf   : > { %926 = vrot.lane.b32.xlu0 %v4287_v63, %s5233_s25  ;;  %v804_v15 = vrot.slane %v802_v2, 5  ;;  %v810_v16 = vrot.slane %v808_v3, 5  ;;  %v818_v17 = vshll.u32 %v476_v60, 16  ;;  %v607_v24 = vshrl.u32 %v450_v4, 16  ;;  %v1022_v52 = vld [vmem:[%s5288_s22 + $0x9c] sm:$0xe] }
  0xb0   : > { %v814_v23 = vrot.slane %v812_v10, 4  ;;  %v610_v25 = vshll.u32 %v450_v4, 16  ;;  %v616_v26 = vshll.u32 %v451_v6, 16  ;;  %v620_v30 = vshrl.u32 %v451_v6, 16  ;;  %431 = vst.msk [vmem:[#allocation2 + $0x60] sm:$0xff] %vm418_vm6, %v5071_v40  ;;  %v5072_v53 = vld [vmem:[%s5288_s22 + $0x30] sm:$0xff]  }
  0xb1   : > { %3358 = vrot.lane.b32.xlu1 %v4710_v7, %s5238_s30  ;;  %v805_v28 = vor.u32 %v804_v15, %v801_v9  ;;  %v820_v29 = vrot.slane %v818_v17, 5  ;;  %v626_v31 = vshll.u32 %v452_v12, 16  ;;  %v609_v34 = vrot.slane %v607_v24, 4  ;;  %v1023_v11 = vld [vmem:[%s5288_s22 + $0xa0] sm:$0xf]  ;;  %423 = vst.msk [vmem:[#allocation2 + $0x20] sm:$0xff] %vm418_vm6, %v5072_v53 }
  0xb2   : > { %v815_v33 = vor.u32 %v814_v23, %v810_v16  ;;  %v612_v35 = vrot.slane %v610_v25, 5  ;;  %v618_v36 = vrot.slane %v616_v26, 5  ;;  %v1987_v39 = vpop.permute.xlu1 %1986  ;;  %v622_v42 = vrot.slane %v620_v30, 4  ;;  %v5833_v57 = vld [vmem:[%s5288_s22 + $0xa4] sm:$0x1]  ;;  %2025 = vst.msk [vmem:[#allocation2 + $0x40] sm:$0xff] %vm2016_vm10, %v5797_v62 }
  0xb3   : > { %3342 = vrot.lane.b32.xlu0 %v4702_v14, %s5238_s30  ;;  %v806_v41 = vrot.slane %v805_v28, 4  ;;  %v628_v45 = vrot.slane %v626_v31, 5  ;;  %v4311_v50 = vrot.slane %v1019_v18, 9  ;;  %v1168_v51 = vrot.slane %v1020_v19, 5  ;;  %v998_v46 = vld [vmem:[%s5288_s22 + $0x3c] sm:$0xe] }
  0xb4   : > { %v816_v48 = vrot.slane %v815_v33, 4  ;;  %v613_v49 = vor.u32 %v612_v35, %v609_v34  ;;  %v623_v37 = vor.u32 %v622_v42, %v618_v36  ;;  %v1171_v54 = vrot.slane %v1021_v27, 5  ;;  %v999_v44 = vld [vmem:[%s5288_s22 + $0x40] sm:$0xf]  ;;  %v1000_v13 = vld [vmem:[%s5288_s22 + $0x44] sm:$0x1] }
  0xb5   : > { %v811_v21 = vsel %vm5340_vm5, %v806_v41, %v810_v16  ;;  %v4303_v55 = vrot.slane %v995_v32, 9  ;;  %v1169_v20 = vsel %vm5290_vm2, %v4311_v50, %v1168_v51  ;;  %v1170_v59 = vrot.slane %v1168_v51, 4  ;;  %v4415_v3 = vld [vmem:[%s5288_s22 + $0x9c] sm:$0xf]  ;;  %v4416_v8 = vld [vmem:[%s5288_s22 + $0xa0] sm:$0xf] }
  0xb6   : > { %v1971_v56 = vpop.permute.xlu0 %1970  ;;  %v821_v58 = vsel %vm5340_vm5, %v816_v48, %v820_v29  ;;  %v614_v43 = vrot.slane %v613_v49, 4  ;;  %v2306_v60 = vpop.permute.xlu1 %2305  ;;  %v624_v63 = vrot.slane %v623_v37, 4  ;;  %v1112_v1 = vrot.slane %v996_v38, 5  ;;  %2017 = vst.msk [vmem:[#allocation2] sm:$0xff] %vm2016_vm10, %v5810_v22  ;;  %2026 = vst.msk [vmem:[#allocation2 + $0x48] sm:$0xff] %vm2016_vm10, %v1987_v39  ;;  %v5073_v17 = vld [vmem:[%s5288_s22 + $0x9c] sm:$0xff]  }
  0xb7   : > { %v4296_v61 = vcombine.low %v811_v21, %v821_v58  ;;  %v1115_v2 = vrot.slane %v997_v47, 5  ;;  %v1172_v6 = vsel %vm5290_vm2, %v1170_v59, %v1171_v54  ;;  %v4312_v7 = vrot.slane %v1022_v52, 9  ;;  %2018 = vst.msk [vmem:[#allocation2 + $0x8] sm:$0xff] %vm2016_vm10, %v1971_v56  ;;  %v4417_v16 = vld [vmem:[%s5288_s22 + $0xa4] sm:$0x1]  ;;  %v5074_v26 = vld [vmem:[%s5288_s22 + $0x3c] sm:$0xff]  }
  0xb8   : > { %v619_v4 = vsel %vm5340_vm5, %v614_v43, %v618_v36  ;;  %v629_v9 = vsel %vm5340_vm5, %v624_v63, %v628_v45  ;;  %v4327_v10 = vcombine.low %v1169_v20, %v1172_v6  ;;  %v1113_v12 = vsel %vm5290_vm2, %v4303_v55, %v1112_v1  ;;  %v4391_v28 = vld [vmem:[%s5288_s22 + $0x3c] sm:$0xf]  ;;  %432 = vst.msk [vmem:[#allocation2 + $0x68] sm:$0xff] %vm418_vm6, %v5073_v17  ;;  %v4392_v33 = vld [vmem:[%s5288_s22 + $0x40] sm:$0xf] }
  0xb9   : > { %944 = vrot.lane.b32.xlu1 %v4296_v61, %s5233_s25  ;;  %v1114_v14 = vrot.slane %v1112_v1, 4  ;;  %v4288_v18 = vcombine.low %v619_v4, %v629_v9  ;;  %v1175_v19 = vrot.slane %v1023_v11, 5  ;;  %v1178_v23 = vrot.slane %v5833_v57, 5  ;;  %2346 = vst.msk [vmem:[#allocation2 + $0x40] sm:$0xff] %vm2337_vm11, %v2306_v60  ;;  %v4393_v52 = vld [vmem:[%s5288_s22 + $0x44] sm:$0x1] }
  0xba   : > { %v2290_v15 = vpop.permute.xlu0 %2289  ;;  %v4304_v24 = vrot.slane %v998_v46, 9  ;;  %v2308_v25 = vpop.permute.xlu1 %2307  ;;  %v1119_v22 = vrot.slane %v999_v44, 5  ;;  %v1122_v27 = vrot.slane %v1000_v13, 5  ;;  %v1825_v32 = vshrl.u32 %v4415_v3, 16  ;;  %424 = vst.msk [vmem:[#allocation2 + $0x28] sm:$0xff] %vm418_vm6, %v5074_v26  ;;  %v5048_v55 = vld [vmem:[%s5288_s22 + $0x9c] sm:$0xff]  }
  0xbb   : > { %v1116_v62 = vsel %vm5290_vm2, %v1114_v14, %v1115_v2  ;;  %928 = vrot.lane.b32.xlu0 %v4288_v18, %s5233_s25  ;;  %v1176_v30 = vsel %vm5290_vm2, %v4312_v7, %v1175_v19  ;;  %v1177_v31 = vrot.slane %v1175_v19, 4  ;;  %2338 = vst.msk [vmem:[#allocation2] sm:$0xff] %vm2337_vm11, %v2290_v15  ;;  %2347 = vst.msk [vmem:[#allocation2 + $0x48] sm:$0xff] %vm2337_vm11, %v2308_v25  ;;  %v1828_v38 = vshll.u32 %v4415_v3, 16  ;;  %v4418_v43 = vld [vmem:[%s5288_s22 + $0xa8] sm:$0xf] }
  0xbc   : > { %v4319_v29 = vcombine.low %v1113_v12, %v1116_v62  ;;  %v1120_v34 = vsel %vm5290_vm2, %v4304_v24, %v1119_v22  ;;  %v1121_v35 = vrot.slane %v1119_v22, 4  ;;  %v1834_v39 = vshll.u32 %v4416_v8, 16  ;;  %v4419_v13 = vld [vmem:[%s5288_s22 + $0xac] sm:$0xf]  ;;  %v5049_v3 = vld [vmem:[%s5288_s22 + $0x3c] sm:$0xff]  }
  0xbd   : > { %1266 = vrot.lane.b32.xlu1 %v4327_v10, %s5232_s24  ;;  %v1179_v40 = vsel %vm5290_vm2, %v1177_v31, %v1178_v23  ;;  %v1827_v41 = vrot.slane %v1825_v32, 4  ;;  %v1838_v42 = vshrl.u32 %v4416_v8, 16  ;;  %v1844_v45 = vshll.u32 %v4417_v16, 16  ;;  %v5050_v9 = vld [vmem:[%s5288_s22 + $0xa8] sm:$0xff]   ;;  %v4420_v15 = vld [vmem:[%s5288_s22 + $0xb0] sm:$0x1] }
  0xbe   : > { %v2292_v36 = vpop.permute.xlu0 %2291  ;;  %v2487_v47 = vpop.permute.xlu1 %2486  ;;  %v4328_v48 = vcombine.low %v1176_v30, %v1179_v40  ;;  %v1123_v49 = vsel %vm5290_vm2, %v1121_v35, %v1122_v27  ;;  %v1830_v50 = vrot.slane %v1828_v38, 5  ;;  %v1836_v51 = vrot.slane %v1834_v39, 5  ;;  %v4394_v17 = vld [vmem:[%s5288_s22 + $0x48] sm:$0xf]  ;;  %v4395_v26 = vld [vmem:[%s5288_s22 + $0x4c] sm:$0xf] }
  0xbf   : > { %2339 = vst.msk [vmem:[#allocation2 + $0x8] sm:$0xff] %vm2337_vm11, %v2292_v36  ;;  %1250 = vrot.lane.b32.xlu0 %v4319_v29, %s5232_s24  ;;  %v4320_v53 = vcombine.low %v1120_v34, %v1123_v49  ;;  %v1840_v21 = vrot.slane %v1838_v42, 4  ;;  %v1846_v37 = vrot.slane %v1844_v45, 5  ;;  %v1633_v54 = vshrl.u32 %v4391_v28, 16  ;;  %v4396_v30 = vld [vmem:[%s5288_s22 + $0x50] sm:$0x1] }
  0xc0   : > { %v1831_v11 = vor.u32 %v1830_v50, %v1827_v41  ;;  %v1636_v57 = vshll.u32 %v4391_v28, 16  ;;  %v1642_v46 = vshll.u32 %v4392_v33, 16  ;;  %v1646_v56 = vshrl.u32 %v4392_v33, 16  ;;  %2527 = vst.msk [vmem:[#allocation2 + $0x40] sm:$0xff] %vm2518_vm12, %v2487_v47  ;;  %v4479_v31 = vld [vmem:[%s5288_s22 + $0x9c] sm:$0xe] }
  0xc1   : > { %1268 = vrot.lane.b32.xlu1 %v4328_v48, %s5232_s24  ;;  %v1841_v20 = vor.u32 %v1840_v21, %v1836_v51  ;;  %v1635_v59 = vrot.slane %v1633_v54, 4  ;;  %v1652_v44 = vshll.u32 %v4393_v52, 16  ;;  %v1849_v7 = vshrl.u32 %v4418_v43, 16  ;;  %v5051_v32 = vld [vmem:[%s5288_s22 + $0x48] sm:$0xff]   ;;  %v4480_v38 = vld [vmem:[%s5288_s22 + $0xa0] sm:$0xf] }
  0xc2   : > { %v2471_v58 = vpop.permute.xlu0 %2470  ;;  %v2489_v60 = vpop.permute.xlu1 %2488  ;;  %v1832_v61 = vrot.slane %v1831_v11, 4  ;;  %v1638_v63 = vrot.slane %v1636_v57, 5  ;;  %v1644_v1 = vrot.slane %v1642_v46, 5  ;;  %v1648_v2 = vrot.slane %v1646_v56, 4  ;;  %v4481_v39 = vld [vmem:[%s5288_s22 + $0xa4] sm:$0x1] }
  0xc3   : > { %2519 = vst.msk [vmem:[#allocation2] sm:$0xff] %vm2518_vm12, %v2471_v58  ;;  %2528 = vst.msk [vmem:[#allocation2 + $0x48] sm:$0xff] %vm2518_vm12, %v2489_v60  ;;  %1252 = vrot.lane.b32.xlu0 %v4320_v53, %s5232_s24  ;;  %v1842_v4 = vrot.slane %v1841_v20, 4  ;;  %v1654_v6 = vrot.slane %v1652_v44, 5  ;;  %v1852_v8 = vshll.u32 %v4418_v43, 16  ;;  %v1858_v16 = vshll.u32 %v4419_v13, 16 }
  0xc4   : > { %v1837_v10 = vsel %vm5340_vm5, %v1832_v61, %v1836_v51  ;;  %v1639_v12 = vor.u32 %v1638_v63, %v1635_v59  ;;  %v1649_v14 = vor.u32 %v1648_v2, %v1644_v1  ;;  %v1851_v23 = vrot.slane %v1849_v7, 4  ;;  %v4455_v47 = vld [vmem:[%s5288_s22 + $0x3c] sm:$0xe]  ;;  %v4456_v48 = vld [vmem:[%s5288_s22 + $0x40] sm:$0xf] }
  0xc5   : > { %1447 = vrot.lane.b32.xlu1 %v5048_v55, %s5231_s23  ;;  %v1847_v19 = vsel %vm5340_vm5, %v1842_v4, %v1846_v37  ;;  %v1854_v24 = vrot.slane %v1852_v8, 5  ;;  %v1862_v25 = vshrl.u32 %v4419_v13, 16  ;;  %v1860_v29 = vrot.slane %v1858_v16, 5  ;;  %v4457_v13 = vld [vmem:[%s5288_s22 + $0x44] sm:$0x1] }
  0xc6   : > { %v2473_v18 = vpop.permute.xlu0 %2472  ;;  %v5905_v62 = vpop.permute.xlu1 %3031  ;;  %v4439_v22 = vcombine.low %v1837_v10, %v1847_v19  ;;  %v1640_v27 = vrot.slane %v1639_v12, 4  ;;  %v1650_v28 = vrot.slane %v1649_v14, 4  ;;  %v1868_v35 = vshll.u32 %v4420_v15, 16  ;;  %v4482_v2 = vld [vmem:[%s5288_s22 + $0xa8] sm:$0xe] }
  0xc7   : > { %2520 = vst.msk [vmem:[#allocation2 + $0x8] sm:$0xff] %vm2518_vm12, %v2473_v18  ;;  %1431 = vrot.lane.b32.xlu0 %v5049_v3, %s5231_s23  ;;  %v1855_v33 = vor.u32 %v1854_v24, %v1851_v23  ;;  %v1864_v34 = vrot.slane %v1862_v25, 4  ;;  %v1657_v36 = vshrl.u32 %v4394_v17, 16  ;;  %v1660_v42 = vshll.u32 %v4394_v17, 16  ;;  %v4483_v8 = vld [vmem:[%s5288_s22 + $0xac] sm:$0xf] }
  0xc8   : > { %v1645_v40 = vsel %vm5340_vm5, %v1640_v27, %v1644_v1  ;;  %v1655_v41 = vsel %vm5340_vm5, %v1650_v28, %v1654_v6  ;;  %v1666_v45 = vshll.u32 %v4395_v26, 16  ;;  %v1870_v53 = vrot.slane %v1868_v35, 5  ;;  %v4458_v17 = vld [vmem:[%s5288_s22 + $0x48] sm:$0xe]  ;;  %v4459_v25 = vld [vmem:[%s5288_s22 + $0x4c] sm:$0xf] }
  0xc9   : > { %1449 = vrot.lane.b32.xlu1 %v5050_v9, %s5231_s23  ;;  %v4431_v50 = vcombine.low %v1645_v40, %v1655_v41  ;;  %v1856_v51 = vrot.slane %v1855_v33, 4  ;;  %v1865_v52 = vor.u32 %v1864_v34, %v1860_v29  ;;  %v1659_v37 = vrot.slane %v1657_v36, 4  ;;  %v4484_v9 = vld [vmem:[%s5288_s22 + $0xb0] sm:$0x1]  ;;  %3072 = vst.msk [vmem:[#allocation2 + $0x40] sm:$0xff] %vm3063_vm13, %v5905_v62 }
  0xca   : > { %v3016_v49 = vpop.permute.xlu0 %3015  ;;  %v1662_v54 = vrot.slane %v1660_v42, 5  ;;  %v1668_v55 = vrot.slane %v1666_v45, 5  ;;  %v1670_v11 = vshrl.u32 %v4395_v26, 16  ;;  %v1676_v56 = vshll.u32 %v4396_v30, 16  ;;  %v4607_v30 = vld [vmem:[%s5288_s22 + $0xa8] sm:$0xf] }
  0xcb   : > { %v3034_v21 = vpop.permute.xlu1 %3033  ;;  %1433 = vrot.lane.b32.xlu0 %v5051_v32, %s5231_s23  ;;  %v1861_v57 = vsel %vm5340_vm5, %v1856_v51, %v1860_v29  ;;  %v1866_v46 = vrot.slane %v1865_v52, 4  ;;  %v4503_v58 = vrot.slane %v4479_v31, 9  ;;  %v2215_v59 = vrot.slane %v4480_v38, 5  ;;  %3064 = vst.msk [vmem:[#allocation2] sm:$0xff] %vm3063_vm13, %v3016_v49  ;;  %v4460_v29 = vld [vmem:[%s5288_s22 + $0x50] sm:$0x1] }
  0xcc   : > { %v1663_v43 = vor.u32 %v1662_v54, %v1659_v37  ;;  %v1672_v20 = vrot.slane %v1670_v11, 4  ;;  %v2218_v44 = vrot.slane %v4481_v39, 5  ;;  %v1678_v61 = vrot.slane %v1676_v56, 5  ;;  %3073 = vst.msk [vmem:[#allocation2 + $0x48] sm:$0xff] %vm3063_vm13, %v3034_v21  ;;  %v4608_v35 = vld [vmem:[%s5288_s22 + $0xac] sm:$0xf] }
  0xcd   : > { %1992 = vrot.lane.b32.xlu1 %v4439_v22, %s5234_s26  ;;  %v1871_v60 = vsel %vm5340_vm5, %v1866_v46, %v1870_v53  ;;  %v4495_v63 = vrot.slane %v4455_v47, 9  ;;  %v2159_v1 = vrot.slane %v4456_v48, 5  ;;  %v2216_v7 = vsel %vm5290_vm2, %v4503_v58, %v2215_v59  ;;  %v4609_v41 = vld [vmem:[%s5288_s22 + $0xb0] sm:$0x1]  ;;  %v4583_v48 = vld [vmem:[%s5288_s22 + $0x48] sm:$0xf] }
  0xce   : > { %v4440_v3 = vcombine.low %v1861_v57, %v1871_v60  ;;  %v1664_v4 = vrot.slane %v1663_v43, 4  ;;  %v1673_v6 = vor.u32 %v1672_v20, %v1668_v55  ;;  %v2217_v12 = vrot.slane %v2215_v59, 4  ;;  %v4584_v11 = vld [vmem:[%s5288_s22 + $0x4c] sm:$0xf]  ;;  %v4585_v58 = vld [vmem:[%s5288_s22 + $0x50] sm:$0x1] }
  0xcf   : > { %v3018_v10 = vpop.permute.xlu0 %3017  ;;  %1976 = vrot.lane.b32.xlu0 %v4431_v50, %s5234_s26  ;;  %v5935_v14 = vsel %vm5290_vm2, %v4495_v63, %v2159_v1  ;;  %v2161_v15 = vrot.slane %v2159_v1, 4  ;;  %v2162_v16 = vrot.slane %v4457_v13, 5  ;;  %v3353_v18 = vpop.permute.xlu1 %3352  ;;  %v4504_v24 = vrot.slane %v4482_v2, 9  ;;  %v5052_v59 = vld [vmem:[%s5288_s22 + $0xa8] sm:$0xff]   ;;  %v4610_v63 = vld [vmem:[%s5288_s22 + $0xb4] sm:$0xf] }
  0xd0   : > { %v1669_v19 = vsel %vm5340_vm5, %v1664_v4, %v1668_v55  ;;  %v1674_v23 = vrot.slane %v1673_v6, 4  ;;  %v2219_v26 = vsel %vm5290_vm2, %v2217_v12, %v2218_v44  ;;  %v2222_v27 = vrot.slane %v4483_v8, 5  ;;  %3065 = vst.msk [vmem:[#allocation2 + $0x8] sm:$0xff] %vm3063_vm13, %v3018_v10  ;;  %v4611_v12 = vld [vmem:[%s5288_s22 + $0xb8] sm:$0xf] }
  0xd1   : > { %1994 = vrot.lane.b32.xlu1 %v4440_v3, %s5234_s26  ;;  %v2163_v22 = vsel %vm5290_vm2, %v2161_v15, %v2162_v16  ;;  %v2225_v28 = vrot.slane %v4484_v9, 5  ;;  %v4519_v32 = vcombine.low %v2216_v7, %v2219_v26  ;;  %v4496_v34 = vrot.slane %v4458_v17, 9  ;;  %3393 = vst.msk [vmem:[#allocation2 + $0x40] sm:$0xff] %vm3384_vm14, %v3353_v18  ;;  %v4612_v16 = vld [vmem:[%s5288_s22 + $0xbc] sm:$0x1]  ;;  %v5054_v18 = vld [vmem:[%s5288_s22 + $0xb4] sm:$0xff]  }
  0xd2   : > { %v1679_v31 = vsel %vm5340_vm5, %v1674_v23, %v1678_v61  ;;  %v4511_v33 = vcombine.low %v5935_v14, %v2163_v22  ;;  %v2223_v38 = vsel %vm5290_vm2, %v4504_v24, %v2222_v27  ;;  %v2224_v39 = vrot.slane %v2222_v27, 4 }
  0xd3   : > { %v3337_v62 = vpop.permute.xlu0 %3336  ;;  %v4432_v36 = vcombine.low %v1669_v19, %v1679_v31  ;;  %v2166_v40 = vrot.slane %v4459_v25, 5  ;;  %v2169_v42 = vrot.slane %v4460_v29, 5  ;;  %v2872_v45 = vshrl.u32 %v4607_v30, 16 }
  0xd4   : > { %v2875_v47 = vshll.u32 %v4607_v30, 16  ;;  %v2226_v49 = vsel %vm5290_vm2, %v2224_v39, %v2225_v28  ;;  %3385 = vst.msk [vmem:[#allocation2] sm:$0xff] %vm3384_vm14, %v3337_v62  ;;  %v2881_v53 = vshll.u32 %v4608_v35, 16  ;;  %v2885_v55 = vshrl.u32 %v4608_v35, 16  ;;  %v5053_v28 = vld [vmem:[%s5288_s22 + $0x48] sm:$0xff]  }
  0xd5   : > { %2313 = vrot.lane.b32.xlu1 %v4519_v32, %s5235_s27  ;;  %1978 = vrot.lane.b32.xlu0 %v4432_v36, %s5234_s26  ;;  %v2167_v50 = vsel %vm5290_vm2, %v4496_v34, %v2166_v40  ;;  %v2168_v51 = vrot.slane %v2166_v40, 4  ;;  %v4520_v21 = vcombine.low %v2223_v38, %v2226_v49  ;;  %v2874_v37 = vrot.slane %v2872_v45, 4  ;;  %v4587_v38 = vld [vmem:[%s5288_s22 + $0x58] sm:$0xf]  ;;  %v4588_v45 = vld [vmem:[%s5288_s22 + $0x5c] sm:$0x1] }
  0xd6   : > { %v939_v52 = vpop.permute.xlu1 %938  ;;  %v2877_v54 = vrot.slane %v2875_v47, 5  ;;  %v2883_v46 = vrot.slane %v2881_v53, 5  ;;  %v2891_v56 = vshll.u32 %v4609_v41, 16  ;;  %v2680_v43 = vshrl.u32 %v4583_v48, 16 }
  0xd7   : > { %977 = vst.msk [vmem:[#allocation2 + $0x50] sm:$0xff] %vm966_vm7, %v939_v52  ;;  %v2170_v57 = vsel %vm5290_vm2, %v2168_v51, %v2169_v42  ;;  %v2887_v60 = vrot.slane %v2885_v55, 4  ;;  %v2683_v61 = vshll.u32 %v4583_v48, 16  ;;  %v2689_v3 = vshll.u32 %v4584_v11, 16  ;;  %v5055_v52 = vld [vmem:[%s5288_s22 + $0x54] sm:$0xff]  }
  0xd8   : > { %v4512_v20 = vcombine.low %v2167_v50, %v2170_v57  ;;  %v2878_v13 = vor.u32 %v2877_v54, %v2874_v37  ;;  %v2893_v1 = vrot.slane %v2891_v56, 5  ;;  %v2682_v2 = vrot.slane %v2680_v43, 4  ;;  %v3409_v27 = vld [vmem:[#allocation2 + $0x40] sm:$0xff]  ;;  %v5062_v51 = vld [vmem:[%s6521_s1 + $0x10] ss:$0 sps:$4 sm:$0x33]  }
  0xd9   : > { %2315 = vrot.lane.b32.xlu1 %v4520_v21, %s5235_s27  ;;  %2297 = vrot.lane.b32.xlu0 %v4511_v33, %s5235_s27  ;;  %v2693_v4 = vshrl.u32 %v4584_v11, 16  ;;  %v2888_v8 = vor.u32 %v2887_v60, %v2883_v46  ;;  %v2685_v9 = vrot.slane %v2683_v61, 5  ;;  %v2699_v10 = vshll.u32 %v4585_v58, 16  ;;  %v4586_v33 = vld [vmem:[%s5288_s22 + $0x54] sm:$0xf] }
  0xda   : > { %v923_v44 = vpop.permute.xlu0 %922  ;;  %v3355_v6 = vpop.permute.xlu1 %3354  ;;  %v2879_v7 = vrot.slane %v2878_v13, 4  ;;  %v2691_v14 = vrot.slane %v2689_v3, 5  ;;  %v2896_v17 = vshrl.u32 %v4610_v63, 16  ;;  %v2899_v31 = vshll.u32 %v4610_v63, 16  ;;  %4971 = vmatprep.mubr.msk.bf16.mxu1 %vm3437_vm15, %v3409_v27  ;;  %v4671_v55 = vld [vmem:[%s5288_s22 + $0xa8] sm:$0xe]  ;;  %4993 = vmatprep.subr.msk.bf16.mxu0 %vm3486_vm0, %v5062_v51 }
  0xdb   : > { %969 = vst.msk [vmem:[#allocation2 + $0x10] sm:$0xff] %vm966_vm7, %v923_v44  ;;  %v2695_v15 = vrot.slane %v2693_v4, 4  ;;  %v2889_v23 = vrot.slane %v2888_v8, 4  ;;  %v2686_v24 = vor.u32 %v2685_v9, %v2682_v2  ;;  %v2701_v25 = vrot.slane %v2699_v10, 5  ;;  %v3401_v22 = vld [vmem:[#allocation2] sm:$0xff]  ;;  %4994 = vmatprep.subr.msk.bf16.mxu1 %vm3486_vm0, %v5062_v51 }
  0xdc   : > { %3394 = vst.msk [vmem:[#allocation2 + $0x48] sm:$0xff] %vm3384_vm14, %v3355_v6  ;;  %v2884_v19 = vsel %vm5340_vm5, %v2879_v7, %v2883_v46  ;;  %4955 = vmatprep.mubr.msk.bf16.mxu0 %vm3437_vm15, %v3401_v22  ;;  %v2898_v30 = vrot.slane %v2896_v17, 4  ;;  %v2905_v32 = vshll.u32 %v4611_v12, 16  ;;  %v2909_v35 = vshrl.u32 %v4611_v12, 16  ;;  %v4672_v43 = vld [vmem:[%s5288_s22 + $0xac] sm:$0xf] }
  0xdd   : > { %2494 = vrot.lane.b32.xlu1 %v5052_v59, %s5236_s28  ;;  %2299 = vrot.lane.b32.xlu0 %v4512_v20, %s5235_s27  ;;  %v2696_v29 = vor.u32 %v2695_v15, %v2691_v14  ;;  %v2894_v34 = vsel %vm5340_vm5, %v2889_v23, %v2893_v1  ;;  %v2687_v62 = vrot.slane %v2686_v24, 4  ;;  %v2915_v36 = vshll.u32 %v4612_v16, 16  ;;  %v4673_v20 = vld [vmem:[%s5288_s22 + $0xb0] sm:$0x1]  ;;  %v4647_v61 = vld [vmem:[%s5288_s22 + $0x48] sm:$0xe] }
  0xde   : > { %v3339_v26 = vpop.permute.xlu0 %3338  ;;  %v4631_v39 = vcombine.low %v2884_v19, %v2894_v34  ;;  %v2901_v41 = vrot.slane %v2899_v31, 5  ;;  %v2907_v42 = vrot.slane %v2905_v32, 5  ;;  %v2911_v48 = vrot.slane %v2909_v35, 4  ;;  %v4648_v4 = vld [vmem:[%s5288_s22 + $0x4c] sm:$0xf] }
  0xdf   : > { %3386 = vst.msk [vmem:[#allocation2 + $0x8] sm:$0xff] %vm3384_vm14, %v3339_v26  ;;  %v2697_v40 = vrot.slane %v2696_v29, 4  ;;  %v2692_v47 = vsel %vm5340_vm5, %v2687_v62, %v2691_v14  ;;  %v2917_v49 = vrot.slane %v2915_v36, 5  ;;  %v2704_v50 = vshrl.u32 %v4586_v33, 16  ;;  %v4649_v10 = vld [vmem:[%s5288_s22 + $0x50] sm:$0x1] }
  0xe0   : > { %v2902_v21 = vor.u32 %v2901_v41, %v2898_v30  ;;  %v2707_v37 = vshll.u32 %v4586_v33, 16  ;;  %v2713_v54 = vshll.u32 %v4587_v38, 16  ;;  %v2912_v57 = vor.u32 %v2911_v48, %v2907_v42  ;;  %v478_v19 = vld [vmem:[%s5288_s22 + $0xac] sm:$0xf]  ;;  %v479_v33 = vld [vmem:[%s5288_s22 + $0xb0] sm:$0x1] }
  0xe1   : > { %2496 = vrot.lane.b32.xlu1 %v5054_v18, %s5236_s28  ;;  %2478 = vrot.lane.b32.xlu0 %v5053_v28, %s5236_s28  ;;  %v2702_v53 = vsel %vm5340_vm5, %v2697_v40, %v2701_v25  ;;  %v2706_v46 = vrot.slane %v2704_v50, 4  ;;  %v2717_v56 = vshrl.u32 %v4587_v38, 16  ;;  %v2723_v60 = vshll.u32 %v4588_v45, 16  ;;  %v477_v18 = vld [vmem:[%s5288_s22 + $0xa8] sm:$0xf] }
  0xe2   : > { %v4623_v11 = vcombine.low %v2692_v47, %v2702_v53  ;;  %v2903_v59 = vrot.slane %v2902_v21, 4  ;;  %v2709_v44 = vrot.slane %v2707_v37, 5  ;;  %v2715_v13 = vrot.slane %v2713_v54, 5  ;;  %v453_v34 = vld [vmem:[%s5288_s22 + $0x48] sm:$0xf] }
  0xe3   : > { %v2913_v63 = vrot.slane %v2912_v57, 4  ;;  %v2719_v1 = vrot.slane %v2717_v56, 4  ;;  %v4695_v3 = vrot.slane %v4671_v55, 9  ;;  %v2725_v8 = vrot.slane %v2723_v60, 5  ;;  %v3410_v27 = vld [vmem:[#allocation2 + $0x48] sm:$0xff] }
  0xe4   : > { %v941_v58 = vpop.permute.xlu1 %940  ;;  %v2908_v6 = vsel %vm5340_vm5, %v2903_v59, %v2907_v42  ;;  %v2710_v7 = vor.u32 %v2709_v44, %v2706_v46  ;;  %v3488_v9 = vsel %vm3486_vm0, %v5062_v51, 0  ;;  %v3262_v15 = vrot.slane %v4672_v43, 5  ;;  %v454_v62 = vld [vmem:[%s5288_s22 + $0x4c] sm:$0xf]  ;;  %v455_v40 = vld [vmem:[%s5288_s22 + $0x50] sm:$0x1] }
  0xe5   : > { %978 = vst.msk [vmem:[#allocation2 + $0x58] sm:$0xff] %vm966_vm7, %v941_v58  ;;  %3039 = vrot.lane.b32.xlu1 %v4631_v39, %s5237_s29  ;;  %v925_v2 = vpop.permute.xlu0 %924  ;;  %2480 = vrot.lane.b32.xlu0 %v5055_v52, %s5236_s28  ;;  %v2918_v12 = vsel %vm5340_vm5, %v2913_v63, %v2917_v49  ;;  %v2720_v14 = vor.u32 %v2719_v1, %v2715_v13  ;;  %v3265_v16 = vrot.slane %v4673_v20, 5  ;;  %v4687_v25 = vrot.slane %v4647_v61, 9  ;;  %v5075_v53 = vld [vmem:[%s5288_s22 + $0xa8] sm:$0xff]   ;;  %v4674_v57 = vld [vmem:[%s5288_s22 + $0xb4] sm:$0xe] }
  0xe6   : > { %970 = vst.msk [vmem:[#allocation2 + $0x18] sm:$0xff] %vm966_vm7, %v925_v2  ;;  %4954 = vmatpush3.bf16.msra.mxu0 %v3488_v9  ;;  %v4632_v23 = vcombine.low %v2908_v6, %v2918_v12  ;;  %v2711_v24 = vrot.slane %v2710_v7, 4  ;;  %4992 = vmatpush3.bf16.msra.mxu1 %v3488_v9  ;;  %v3206_v26 = vrot.slane %v4648_v4, 5  ;;  %v3402_v22 = vld [vmem:[#allocation2 + $0x8] sm:$0xff]  ;;  %v3263_v29 = vsel %vm5290_vm2, %v4695_v3, %v3262_v15  ;;  %v4675_v46 = vld [vmem:[%s5288_s22 + $0xb8] sm:$0xf] }
  0xe7   : > { %v2721_v28 = vrot.slane %v2720_v14, 4  ;;  %v3264_v30 = vrot.slane %v3262_v15, 4  ;;  %v3209_v31 = vrot.slane %v4649_v10, 5  ;;  %v823_v39 = vshrl.u32 %v477_v18, 16  ;;  %v5076_v56 = vld [vmem:[%s5288_s22 + $0x48] sm:$0xff]   ;;  %433 = vst.msk [vmem:[#allocation2 + $0x70] sm:$0xff] %vm418_vm6, %v5075_v53 }
  0xe8   : > { %v1263_v17 = vpop.permute.xlu1 %1262  ;;  %v2716_v35 = vsel %vm5340_vm5, %v2711_v24, %v2715_v13  ;;  %v3207_v36 = vsel %vm5290_vm2, %v4687_v25, %v3206_v26  ;;  %v3208_v38 = vrot.slane %v3206_v26, 4  ;;  %v826_v45 = vshll.u32 %v477_v18, 16  ;;  %v4676_v44 = vld [vmem:[%s5288_s22 + $0xbc] sm:$0x1]  ;;  %v4650_v1 = vld [vmem:[%s5288_s22 + $0x54] sm:$0xe] }
  0xe9   : > { %1301 = vst.msk [vmem:[#allocation2 + $0x50] sm:$0xff] %vm1290_vm8, %v1263_v17  ;;  %v1247_v32 = vpop.permute.xlu0 %1246  ;;  %3023 = vrot.lane.b32.xlu0 %v4623_v11, %s5237_s29  ;;  %3041 = vrot.lane.b32.xlu1 %v4632_v23, %s5237_s29  ;;  %v2726_v41 = vsel %vm5340_vm5, %v2721_v28, %v2725_v8  ;;  %v3266_v42 = vsel %vm5290_vm2, %v3264_v30, %v3265_v16  ;;  %v832_v47 = vshll.u32 %v478_v19, 16  ;;  %v825_v52 = vrot.slane %v823_v39, 4  ;;  %v4651_v8 = vld [vmem:[%s5288_s22 + $0x58] sm:$0xf] }
  0xea   : > { %1293 = vst.msk [vmem:[#allocation2 + $0x10] sm:$0xff] %vm1290_vm8, %v1247_v32  ;;  %4956 = vmatmul.mubr.msk.bf16.vlgmr.msra.gmra.mrb[0].mxu0 %vm3437_vm15, %v3402_v22  ;;  %4972 = vmatmul.mubr.msk.bf16.vlgmr.msra.gmra.mrb[0].mxu1 %vm3437_vm15, %v3410_v27  ;;  %v4624_v49 = vcombine.low %v2716_v35, %v2726_v41  ;;  %v4711_v50 = vcombine.low %v3263_v29, %v3266_v42  ;;  %v828_v37 = vrot.slane %v826_v45, 5  ;;  %v836_v55 = vshrl.u32 %v478_v19, 16  ;;  %v4652_v15 = vld [vmem:[%s5288_s22 + $0x5c] sm:$0x1]  ;;  %v5077_v39 = vld [vmem:[%s5288_s22 + $0xb4] sm:$0xff]  }
  0xeb   : > { %v3210_v51 = vsel %vm5290_vm2, %v3208_v38, %v3209_v31  ;;  %v834_v54 = vrot.slane %v832_v47, 5  ;;  %v842_v58 = vshll.u32 %v479_v33, 16  ;;  %v631_v43 = vshrl.u32 %v453_v34, 16  ;;  %425 = vst.msk [vmem:[#allocation2 + $0x30] sm:$0xff] %vm418_vm6, %v5076_v56  ;;  %v480_v24 = vld [vmem:[%s5288_s22 + $0xb4] sm:$0xf] }
  0xec   : > { %v1265_v48 = vpop.permute.xlu1 %1264  ;;  %v4703_v21 = vcombine.low %v3207_v36, %v3210_v51  ;;  %v634_v20 = vshll.u32 %v453_v34, 16  ;;  %v640_v59 = vshll.u32 %v454_v62, 16  ;;  %v829_v13 = vor.u32 %v828_v37, %v825_v52  ;;  %v481_v35 = vld [vmem:[%s5288_s22 + $0xb8] sm:$0xf]  ;;  %v482_v47 = vld [vmem:[%s5288_s22 + $0xbc] sm:$0x1] }
  0xed   : > { %1302 = vst.msk [vmem:[#allocation2 + $0x58] sm:$0xff] %vm1290_vm8, %v1265_v48  ;;  %v1249_v11 = vpop.permute.xlu0 %1248  ;;  %3025 = vrot.lane.b32.xlu0 %v4624_v49, %s5237_s29  ;;  %3360 = vrot.lane.b32.xlu1 %v4711_v50, %s5238_s30  ;;  %v838_v60 = vrot.slane %v836_v55, 4  ;;  %v644_v61 = vshrl.u32 %v454_v62, 16  ;;  %v650_v63 = vshll.u32 %v455_v40, 16  ;;  %v844_v3 = vrot.slane %v842_v58, 5 }
  0xee   : > { %1294 = vst.msk [vmem:[#allocation2 + $0x18] sm:$0xff] %vm1290_vm8, %v1249_v11  ;;  %v633_v4 = vrot.slane %v631_v43, 4  ;;  %v636_v6 = vrot.slane %v634_v20, 5  ;;  %v642_v7 = vrot.slane %v640_v59, 5  ;;  %v830_v9 = vrot.slane %v829_v13, 4 }
  0xef   : > { %v839_v10 = vor.u32 %v838_v60, %v834_v54  ;;  %v646_v12 = vrot.slane %v644_v61, 4  ;;  %v652_v14 = vrot.slane %v650_v63, 5  ;;  %v4696_v18 = vrot.slane %v4674_v57, 9  ;;  %v456_v48 = vld [vmem:[%s5288_s22 + $0x54] sm:$0xf]  ;;  %434 = vst.msk [vmem:[#allocation2 + $0x78] sm:$0xff] %vm418_vm6, %v5077_v39 }
  0xf0   : > { %v1444_v2 = vpop.permute.xlu1 %1443  ;;  %v637_v17 = vor.u32 %v636_v6, %v633_v4  ;;  %v3269_v19 = vrot.slane %v4675_v46, 5  ;;  %v3272_v23 = vrot.slane %v4676_v44, 5  ;;  %v835_v25 = vsel %vm5340_vm5, %v830_v9, %v834_v54  ;;  %v457_v53 = vld [vmem:[%s5288_s22 + $0x58] sm:$0xf]  ;;  %v458_v57 = vld [vmem:[%s5288_s22 + $0x5c] sm:$0x1] }
  0xf1   : > { %1482 = vst.msk [vmem:[#allocation2 + $0x50] sm:$0xff] %vm1471_vm9, %v1444_v2  ;;  %v1428_v16 = vpop.permute.xlu0 %1427  ;;  %3344 = vrot.lane.b32.xlu0 %v4703_v21, %s5238_s30  ;;  %v840_v26 = vrot.slane %v839_v10, 4  ;;  %v647_v22 = vor.u32 %v646_v12, %v642_v7  ;;  %v4688_v27 = vrot.slane %v4650_v1, 9  ;;  %v3213_v32 = vrot.slane %v4651_v8, 5  ;;  %v5078_v46 = vld [vmem:[%s5288_s22 + $0x54] sm:$0xff]  }
  0xf2   : > { %1474 = vst.msk [vmem:[#allocation2 + $0x10] sm:$0xff] %vm1471_vm9, %v1428_v16  ;;  %v638_v29 = vrot.slane %v637_v17, 4  ;;  %v3270_v30 = vsel %vm5290_vm2, %v4696_v18, %v3269_v19  ;;  %v3271_v31 = vrot.slane %v3269_v19, 4  ;;  %v3216_v62 = vrot.slane %v4652_v15, 5  ;;  %v1025_v59 = vld [vmem:[%s5288_s22 + $0xa8] sm:$0xe] }
  0xf3   : > { %v845_v33 = vsel %vm5340_vm5, %v840_v26, %v844_v3  ;;  %v648_v34 = vrot.slane %v647_v22, 4  ;;  %v847_v36 = vshrl.u32 %v480_v24, 16  ;;  %v3214_v45 = vsel %vm5290_vm2, %v4688_v27, %v3213_v32  ;;  %v1026_v1 = vld [vmem:[%s5288_s22 + $0xac] sm:$0xf]  ;;  %426 = vst.msk [vmem:[#allocation2 + $0x38] sm:$0xff] %vm418_vm6, %v5078_v46 }
  0xf4   : > { %v1446_v28 = vpop.permute.xlu1 %1445  ;;  %v4297_v40 = vcombine.low %v835_v25, %v845_v33  ;;  %v643_v41 = vsel %vm5340_vm5, %v638_v29, %v642_v7  ;;  %v3273_v42 = vsel %vm5290_vm2, %v3271_v31, %v3272_v23  ;;  %v3215_v51 = vrot.slane %v3213_v32, 4  ;;  %v1027_v7 = vld [vmem:[%s5288_s22 + $0xb0] sm:$0x1]  ;;  %v1001_v15 = vld [vmem:[%s5288_s22 + $0x48] sm:$0xe] }
  0xf5   : > { %1483 = vst.msk [vmem:[#allocation2 + $0x58] sm:$0xff] %vm1471_vm9, %v1446_v28  ;;  %v1430_v38 = vpop.permute.xlu0 %1429  ;;  %v653_v49 = vsel %vm5340_vm5, %v648_v34, %v652_v14  ;;  %v4712_v50 = vcombine.low %v3270_v30, %v3273_v42  ;;  %v849_v52 = vrot.slane %v847_v36, 4  ;;  %v850_v54 = vshll.u32 %v480_v24, 16  ;;  %v1002_v16 = vld [vmem:[%s5288_s22 + $0x4c] sm:$0xf] }
  0xf6   : > { %1475 = vst.msk [vmem:[#allocation2 + $0x18] sm:$0xff] %vm1471_vm9, %v1430_v38  ;;  %946 = vrot.lane.b32.xlu1 %v4297_v40, %s5233_s25  ;;  %v4289_v37 = vcombine.low %v643_v41, %v653_v49  ;;  %v856_v55 = vshll.u32 %v481_v35, 16  ;;  %v860_v11 = vshrl.u32 %v481_v35, 16  ;;  %v3217_v56 = vsel %vm5290_vm2, %v3215_v51, %v3216_v62  ;;  %v1003_v24 = vld [vmem:[%s5288_s22 + $0x50] sm:$0x1] }
  0xf7   : > { %v866_v58 = vshll.u32 %v482_v47, 16  ;;  %v655_v43 = vshrl.u32 %v456_v48, 16  ;;  %v658_v20 = vshll.u32 %v456_v48, 16  ;;  %v4704_v13 = vcombine.low %v3214_v45, %v3217_v56  ;;  %v1028_v25 = vld [vmem:[%s5288_s22 + $0xb4] sm:$0xe] }
  0xf8   : > { %v1989_v21 = vpop.permute.xlu1 %1988  ;;  %930 = vrot.lane.b32.xlu0 %v4289_v37, %s5233_s25  ;;  %v852_v60 = vrot.slane %v850_v54, 5  ;;  %v858_v61 = vrot.slane %v856_v55, 5  ;;  %v862_v63 = vrot.slane %v860_v11, 4  ;;  %v664_v6 = vshll.u32 %v457_v53, 16  ;;  %v1029_v29 = vld [vmem:[%s5288_s22 + $0xb8] sm:$0xf] }
  0xf9   : > { %2027 = vst.msk [vmem:[#allocation2 + $0x50] sm:$0xff] %vm2016_vm10, %v1989_v21  ;;  %v1973_v44 = vpop.permute.xlu0 %1972  ;;  %v868_v2 = vrot.slane %v866_v58, 5  ;;  %v657_v3 = vrot.slane %v655_v43, 4  ;;  %v660_v4 = vrot.slane %v658_v20, 5  ;;  %v668_v12 = vshrl.u32 %v457_v53, 16 }
  0xfa   : > { %2019 = vst.msk [vmem:[#allocation2 + $0x10] sm:$0xff] %vm2016_vm10, %v1973_v44  ;;  %3362 = vrot.lane.b32.xlu1 %v4712_v50, %s5238_s30  ;;  %v853_v9 = vor.u32 %v852_v60, %v849_v52  ;;  %v863_v10 = vor.u32 %v862_v63, %v858_v61  ;;  %v674_v14 = vshll.u32 %v458_v57, 16  ;;  %v666_v18 = vrot.slane %v664_v6, 5  ;;  %v1030_v30 = vld [vmem:[%s5288_s22 + $0xbc] sm:$0x1] }
  0xfb   : > { %v661_v17 = vor.u32 %v660_v4, %v657_v3  ;;  %v4313_v19 = vrot.slane %v1025_v59, 9  ;;  %v1182_v23 = vrot.slane %v1026_v1, 5  ;;  %v670_v27 = vrot.slane %v668_v12, 4  ;;  %v1004_v62 = vld [vmem:[%s5288_s22 + $0x54] sm:$0xe] }
  0xfc   : > { %v1991_v8 = vpop.permute.xlu1 %1990  ;;  %3346 = vrot.lane.b32.xlu0 %v4704_v13, %s5238_s30  ;;  %v854_v26 = vrot.slane %v853_v9, 4  ;;  %v864_v22 = vrot.slane %v863_v10, 4  ;;  %v676_v28 = vrot.slane %v674_v14, 5  ;;  %v1185_v34 = vrot.slane %v1027_v7, 5  ;;  %v1005_v35 = vld [vmem:[%s5288_s22 + $0x58] sm:$0xf] }
  0xfd   : > { %2028 = vst.msk [vmem:[#allocation2 + $0x58] sm:$0xff] %vm2016_vm10, %v1991_v8  ;;  %v662_v31 = vrot.slane %v661_v17, 4  ;;  %v1183_v32 = vsel %vm5290_vm2, %v4313_v19, %v1182_v23  ;;  %v1184_v33 = vrot.slane %v1182_v23, 4  ;;  %v671_v41 = vor.u32 %v670_v27, %v666_v18  ;;  %v1006_v45 = vld [vmem:[%s5288_s22 + $0x5c] sm:$0x1] }
  0xfe   : > { %v859_v39 = vsel %vm5340_vm5, %v854_v26, %v858_v61  ;;  %v869_v40 = vsel %vm5340_vm5, %v864_v22, %v868_v2  ;;  %v4305_v42 = vrot.slane %v1001_v15, 9  ;;  %v1126_v50 = vrot.slane %v1002_v16, 5  ;;  %v4421_v51 = vld [vmem:[%s5288_s22 + $0xb4] sm:$0xf]  ;;  %v4422_v54 = vld [vmem:[%s5288_s22 + $0xb8] sm:$0xf] }
  0xff   : > { %v1975_v36 = vpop.permute.xlu0 %1974  ;;  %v4298_v47 = vcombine.low %v859_v39, %v869_v40  ;;  %v667_v48 = vsel %vm5340_vm5, %v662_v31, %v666_v18  ;;  %v1186_v49 = vsel %vm5290_vm2, %v1184_v33, %v1185_v34  ;;  %v672_v52 = vrot.slane %v671_v41, 4  ;;  %v4423_v43 = vld [vmem:[%s5288_s22 + $0xbc] sm:$0x1]  ;;  %v4397_v2 = vld [vmem:[%s5288_s22 + $0x54] sm:$0xf] }
 0x100   : > { %v2310_v38 = vpop.permute.xlu1 %2309  ;;  %2020 = vst.msk [vmem:[#allocation2 + $0x18] sm:$0xff] %vm2016_vm10, %v1975_v36  ;;  %v4329_v53 = vcombine.low %v1183_v32, %v1186_v49  ;;  %v1129_v21 = vrot.slane %v1003_v24, 5  ;;  %v4314_v37 = vrot.slane %v1028_v25, 9  ;;  %v1127_v55 = vsel %vm5290_vm2, %v4305_v42, %v1126_v50  ;;  %v4398_v3 = vld [vmem:[%s5288_s22 + $0x58] sm:$0xf] }
 0x101   : > { %2348 = vst.msk [vmem:[#allocation2 + $0x50] sm:$0xff] %vm2337_vm11, %v2310_v38  ;;  %948 = vrot.lane.b32.xlu1 %v4298_v47, %s5233_s25  ;;  %v1128_v11 = vrot.slane %v1126_v50, 4  ;;  %v1189_v57 = vrot.slane %v1029_v29, 5  ;;  %v1192_v46 = vrot.slane %v1030_v30, 5  ;;  %v677_v20 = vsel %vm5340_vm5, %v672_v52, %v676_v28  ;;  %v4399_v24 = vld [vmem:[%s5288_s22 + $0x5c] sm:$0x1] }
 0x102   : > { %v4306_v59 = vrot.slane %v1004_v62, 9  ;;  %v1133_v44 = vrot.slane %v1005_v35, 5  ;;  %v1136_v13 = vrot.slane %v1006_v45, 5  ;;  %v4290_v60 = vcombine.low %v667_v48, %v677_v20  ;;  %v4424_v28 = vld [vmem:[%s5288_s22 + $0xc0] sm:$0xf]  ;;  %v5063_v33 = vld [vmem:[%s5288_s22 + $0xb4] sm:$0xff]  }
 0x103   : > { %v2294_v56 = vpop.permute.xlu0 %2293  ;;  %v1130_v61 = vsel %vm5290_vm2, %v1128_v11, %v1129_v21  ;;  %v1190_v63 = vsel %vm5290_vm2, %v4314_v37, %v1189_v57  ;;  %v1191_v1 = vrot.slane %v1189_v57, 4  ;;  %v1873_v8 = vshrl.u32 %v4421_v51, 16  ;;  %v4425_v39 = vld [vmem:[%s5288_s22 + $0xc4] sm:$0xf]  ;;  %v4426_v52 = vld [vmem:[%s5288_s22 + $0xc8] sm:$0x1] }
 0x104   : > { %v2312_v58 = vpop.permute.xlu1 %2311  ;;  %2340 = vst.msk [vmem:[#allocation2 + $0x10] sm:$0xff] %vm2337_vm11, %v2294_v56  ;;  %v4321_v4 = vcombine.low %v1127_v55, %v1130_v61  ;;  %v1134_v6 = vsel %vm5290_vm2, %v4306_v59, %v1133_v44  ;;  %v1135_v7 = vrot.slane %v1133_v44, 4  ;;  %932 = vrot.lane.b32.xlu0 %v4290_v60, %s5233_s25  ;;  %v1876_v12 = vshll.u32 %v4421_v51, 16  ;;  %v4400_v11 = vld [vmem:[%s5288_s22 + $0x60] sm:$0xf] }
 0x105   : > { %2349 = vst.msk [vmem:[#allocation2 + $0x58] sm:$0xff] %vm2337_vm11, %v2312_v58  ;;  %1270 = vrot.lane.b32.xlu1 %v4329_v53, %s5232_s24  ;;  %v1193_v9 = vsel %vm5290_vm2, %v1191_v1, %v1192_v46  ;;  %v1882_v14 = vshll.u32 %v4422_v54, 16  ;;  %v1886_v15 = vshrl.u32 %v4422_v54, 16  ;;  %v1875_v19 = vrot.slane %v1873_v8, 4  ;;  %v5064_v53 = vld [vmem:[%s5288_s22 + $0x54] sm:$0xff]   ;;  %v5065_v57 = vld [vmem:[%s5288_s22 + $0xc0] sm:$0xff]  }
 0x106   : > { %v4330_v17 = vcombine.low %v1190_v63, %v1193_v9  ;;  %v1137_v18 = vsel %vm5290_vm2, %v1135_v7, %v1136_v13  ;;  %v1892_v23 = vshll.u32 %v4423_v43, 16  ;;  %v1878_v26 = vrot.slane %v1876_v12, 5  ;;  %v4401_v20 = vld [vmem:[%s5288_s22 + $0x64] sm:$0xf]  ;;  %v4402_v1 = vld [vmem:[%s5288_s22 + $0x68] sm:$0x1] }
 0x107   : > { %v2296_v10 = vpop.permute.xlu0 %2295  ;;  %v4322_v25 = vcombine.low %v1134_v6, %v1137_v18  ;;  %v1884_v22 = vrot.slane %v1882_v14, 5  ;;  %v1888_v27 = vrot.slane %v1886_v15, 4  ;;  %v1681_v30 = vshrl.u32 %v4397_v2, 16  ;;  %v4486_v9 = vld [vmem:[%s5288_s22 + $0xb8] sm:$0xf] }
 0x108   : > { %v2491_v16 = vpop.permute.xlu1 %2490  ;;  %2341 = vst.msk [vmem:[#allocation2 + $0x18] sm:$0xff] %vm2337_vm11, %v2296_v10  ;;  %v1894_v29 = vrot.slane %v1892_v23, 5  ;;  %v1684_v31 = vshll.u32 %v4397_v2, 16  ;;  %v1690_v32 = vshll.u32 %v4398_v3, 16  ;;  %1254 = vrot.lane.b32.xlu0 %v4321_v4, %s5232_s24  ;;  %v1879_v34 = vor.u32 %v1878_v26, %v1875_v19  ;;  %v4485_v2 = vld [vmem:[%s5288_s22 + $0xb4] sm:$0xe] }
 0x109   : > { %2529 = vst.msk [vmem:[#allocation2 + $0x50] sm:$0xff] %vm2518_vm12, %v2491_v16  ;;  %1272 = vrot.lane.b32.xlu1 %v4330_v17, %s5232_s24  ;;  %v1889_v62 = vor.u32 %v1888_v27, %v1884_v22  ;;  %v1694_v35 = vshrl.u32 %v4398_v3, 16  ;;  %v1700_v36 = vshll.u32 %v4399_v24, 16  ;;  %v1683_v41 = vrot.slane %v1681_v30, 4  ;;  %v5066_v3 = vld [vmem:[%s5288_s22 + $0x60] sm:$0xff]  }
 0x10a   : > { %v1686_v42 = vrot.slane %v1684_v31, 5  ;;  %v1692_v45 = vrot.slane %v1690_v32, 5  ;;  %v1897_v47 = vshrl.u32 %v4424_v28, 16  ;;  %v1880_v48 = vrot.slane %v1879_v34, 4  ;;  %v4487_v10 = vld [vmem:[%s5288_s22 + $0xbc] sm:$0x1] }
 0x10b   : > { %v2475_v38 = vpop.permute.xlu0 %2474  ;;  %v1890_v49 = vrot.slane %v1889_v62, 4  ;;  %v1696_v50 = vrot.slane %v1694_v35, 4  ;;  %v1702_v51 = vrot.slane %v1700_v36, 5  ;;  %v1900_v54 = vshll.u32 %v4424_v28, 16  ;;  %v4461_v17 = vld [vmem:[%s5288_s22 + $0x54] sm:$0xe] }
 0x10c   : > { %v2493_v40 = vpop.permute.xlu1 %2492  ;;  %2521 = vst.msk [vmem:[#allocation2 + $0x10] sm:$0xff] %vm2518_vm12, %v2475_v38  ;;  %v1687_v21 = vor.u32 %v1686_v42, %v1683_v41  ;;  %v1899_v37 = vrot.slane %v1897_v47, 4  ;;  %v1906_v55 = vshll.u32 %v4425_v39, 16  ;;  %1256 = vrot.lane.b32.xlu0 %v4322_v25, %s5232_s24  ;;  %v1885_v46 = vsel %vm5340_vm5, %v1880_v48, %v1884_v22  ;;  %v4462_v30 = vld [vmem:[%s5288_s22 + $0x58] sm:$0xf] }
 0x10d   : > { %2530 = vst.msk [vmem:[#allocation2 + $0x58] sm:$0xff] %vm2518_vm12, %v2493_v40  ;;  %1451 = vrot.lane.b32.xlu1 %v5063_v33, %s5231_s23  ;;  %v1895_v56 = vsel %vm5340_vm5, %v1890_v49, %v1894_v29  ;;  %v1697_v58 = vor.u32 %v1696_v50, %v1692_v45  ;;  %v1910_v43 = vshrl.u32 %v4425_v39, 16  ;;  %v1902_v61 = vrot.slane %v1900_v54, 5  ;;  %v4463_v62 = vld [vmem:[%s5288_s22 + $0x5c] sm:$0x1] }
 0x10e   : > { %v4441_v13 = vcombine.low %v1885_v46, %v1895_v56  ;;  %v1688_v60 = vrot.slane %v1687_v21, 4  ;;  %v1908_v63 = vrot.slane %v1906_v55, 5  ;;  %v1916_v7 = vshll.u32 %v4426_v52, 16  ;;  %v4488_v40 = vld [vmem:[%s5288_s22 + $0xc0] sm:$0xe] }
 0x10f   : > { %v2477_v59 = vpop.permute.xlu0 %2476  ;;  %v1698_v4 = vrot.slane %v1697_v58, 4  ;;  %v1912_v6 = vrot.slane %v1910_v43, 4  ;;  %v1705_v8 = vshrl.u32 %v4400_v11, 16  ;;  %v1903_v14 = vor.u32 %v1902_v61, %v1899_v37  ;;  %v4489_v41 = vld [vmem:[%s5288_s22 + $0xc4] sm:$0xf] }
 0x110   : > { %v3036_v44 = vpop.permute.xlu1 %3035  ;;  %2522 = vst.msk [vmem:[#allocation2 + $0x18] sm:$0xff] %vm2518_vm12, %v2477_v59  ;;  %v1693_v12 = vsel %vm5340_vm5, %v1688_v60, %v1692_v45  ;;  %v1708_v15 = vshll.u32 %v4400_v11, 16  ;;  %v1714_v16 = vshll.u32 %v4401_v20, 16  ;;  %1435 = vrot.lane.b32.xlu0 %v5064_v53, %s5231_s23  ;;  %v1918_v23 = vrot.slane %v1916_v7, 5  ;;  %v4490_v49 = vld [vmem:[%s5288_s22 + $0xc8] sm:$0x1] }
 0x111   : > { %3074 = vst.msk [vmem:[#allocation2 + $0x50] sm:$0xff] %vm3063_vm13, %v3036_v44  ;;  %1453 = vrot.lane.b32.xlu1 %v5065_v57, %s5231_s23  ;;  %v1703_v18 = vsel %vm5340_vm5, %v1698_v4, %v1702_v51  ;;  %v1913_v19 = vor.u32 %v1912_v6, %v1908_v63  ;;  %v1707_v24 = vrot.slane %v1705_v8, 4  ;;  %v1904_v27 = vrot.slane %v1903_v14, 4  ;;  %v4464_v54 = vld [vmem:[%s5288_s22 + $0x60] sm:$0xe] }
 0x112   : > { %v4433_v22 = vcombine.low %v1693_v12, %v1703_v18  ;;  %v1710_v28 = vrot.slane %v1708_v15, 5  ;;  %v6179_v29 = vrot.slane %v1714_v16, 5  ;;  %v1718_v32 = vshrl.u32 %v4401_v20, 16  ;;  %v4465_v56 = vld [vmem:[%s5288_s22 + $0x64] sm:$0xf] }
 0x113   : > { %v3020_v25 = vpop.permute.xlu0 %3019  ;;  %v1914_v31 = vrot.slane %v1913_v19, 4  ;;  %v1724_v33 = vshll.u32 %v4402_v1, 16  ;;  %v4505_v34 = vrot.slane %v4485_v2, 9  ;;  %v1909_v35 = vsel %vm5340_vm5, %v1904_v27, %v1908_v63  ;;  %v4466_v44 = vld [vmem:[%s5288_s22 + $0x68] sm:$0x1] }
 0x114   : > { %v3038_v26 = vpop.permute.xlu1 %3037  ;;  %3066 = vst.msk [vmem:[#allocation2 + $0x10] sm:$0xff] %vm3063_vm13, %v3020_v25  ;;  %v1711_v36 = vor.u32 %v1710_v28, %v1707_v24  ;;  %v2229_v38 = vrot.slane %v4486_v9, 5  ;;  %v2232_v39 = vrot.slane %v4487_v10, 5  ;;  %1437 = vrot.lane.b32.xlu0 %v5066_v3, %s5231_s23  ;;  %v1720_v45 = vrot.slane %v1718_v32, 4  ;;  %v4614_v3 = vld [vmem:[%s5288_s22 + $0xc4] sm:$0xf] }
 0x115   : > { %3075 = vst.msk [vmem:[#allocation2 + $0x58] sm:$0xff] %vm3063_vm13, %v3038_v26  ;;  %1996 = vrot.lane.b32.xlu1 %v4441_v13, %s5234_s26  ;;  %v1919_v42 = vsel %vm5340_vm5, %v1914_v31, %v1918_v23  ;;  %v1726_v47 = vrot.slane %v1724_v33, 5  ;;  %v4497_v48 = vrot.slane %v4461_v17, 9  ;;  %v2173_v11 = vrot.slane %v4462_v30, 5  ;;  %v4613_v13 = vld [vmem:[%s5288_s22 + $0xc0] sm:$0xf] }
 0x116   : > { %v4442_v52 = vcombine.low %v1909_v35, %v1919_v42  ;;  %v1712_v53 = vrot.slane %v1711_v36, 4  ;;  %v2230_v21 = vsel %vm5290_vm2, %v4505_v34, %v2229_v38  ;;  %v2231_v37 = vrot.slane %v2229_v38, 4  ;;  %v4615_v4 = vld [vmem:[%s5288_s22 + $0xc8] sm:$0x1]  ;;  %v4589_v6 = vld [vmem:[%s5288_s22 + $0x60] sm:$0xf] }
 0x117   : > { %v3022_v50 = vpop.permute.xlu0 %3021  ;;  %v1721_v55 = vor.u32 %v1720_v45, %v6179_v29  ;;  %v2176_v57 = vrot.slane %v4463_v62, 5  ;;  %v4506_v46 = vrot.slane %v4488_v40, 9  ;;  %v2236_v20 = vrot.slane %v4489_v41, 5  ;;  %v4590_v12 = vld [vmem:[%s5288_s22 + $0x64] sm:$0xf] }
 0x118   : > { %v3357_v51 = vpop.permute.xlu1 %3356  ;;  %3067 = vst.msk [vmem:[#allocation2 + $0x18] sm:$0xff] %vm3063_vm13, %v3022_v50  ;;  %v1717_v58 = vsel %vm5340_vm5, %v1712_v53, %v6179_v29  ;;  %v2233_v43 = vsel %vm5290_vm2, %v2231_v37, %v2232_v39  ;;  %v2239_v59 = vrot.slane %v4490_v49, 5  ;;  %1980 = vrot.lane.b32.xlu0 %v4433_v22, %s5234_s26  ;;  %v2174_v63 = vsel %vm5290_vm2, %v4497_v48, %v2173_v11  ;;  %v4591_v29 = vld [vmem:[%s5288_s22 + $0x68] sm:$0x1]  ;;  %v4616_v40 = vld [vmem:[%s5288_s22 + $0xcc] sm:$0xf] }
 0x119   : > { %3395 = vst.msk [vmem:[#allocation2 + $0x50] sm:$0xff] %vm3384_vm14, %v3357_v51  ;;  %1998 = vrot.lane.b32.xlu1 %v4442_v52, %s5234_s26  ;;  %v1722_v60 = vrot.slane %v1721_v55, 4  ;;  %v4521_v61 = vcombine.low %v2230_v21, %v2233_v43  ;;  %v2175_v1 = vrot.slane %v2173_v11, 4  ;;  %v2237_v7 = vsel %vm5290_vm2, %v4506_v46, %v2236_v20  ;;  %v4617_v48 = vld [vmem:[%s5288_s22 + $0xd0] sm:$0xf]  ;;  %v5067_v49 = vld [vmem:[%s5288_s22 + $0xc0] sm:$0xff]  }
 0x11a   : > { %v2238_v8 = vrot.slane %v2236_v20, 4  ;;  %v4498_v9 = vrot.slane %v4464_v54, 9  ;;  %v2180_v10 = vrot.slane %v4465_v56, 5  ;;  %v2183_v16 = vrot.slane %v4466_v44, 5  ;;  %v4618_v43 = vld [vmem:[%s5288_s22 + $0xd4] sm:$0x1] }
 0x11b   : > { %v3341_v2 = vpop.permute.xlu0 %3340  ;;  %v1727_v14 = vsel %vm5340_vm5, %v1722_v60, %v1726_v47  ;;  %v2177_v15 = vsel %vm5290_vm2, %v2175_v1, %v2176_v57  ;;  %v2920_v17 = vshrl.u32 %v4613_v13, 16  ;;  %v2923_v28 = vshll.u32 %v4613_v13, 16  ;;  %v5069_v1 = vld [vmem:[%s5288_s22 + $0xcc] sm:$0xff]  }
 0x11c   : > { %3387 = vst.msk [vmem:[#allocation2 + $0x10] sm:$0xff] %vm3384_vm14, %v3341_v2  ;;  %v4434_v18 = vcombine.low %v1717_v58, %v1727_v14  ;;  %v4513_v19 = vcombine.low %v2174_v63, %v2177_v15  ;;  %v2240_v23 = vsel %vm5290_vm2, %v2238_v8, %v2239_v59  ;;  %v2181_v24 = vsel %vm5290_vm2, %v4498_v9, %v2180_v10  ;;  %v4592_v63 = vld [vmem:[%s5288_s22 + $0x6c] sm:$0xf]  ;;  %v4593_v14 = vld [vmem:[%s5288_s22 + $0x70] sm:$0xf] }
 0x11d   : > { %2317 = vrot.lane.b32.xlu1 %v4521_v61, %s5235_s27  ;;  %v4522_v25 = vcombine.low %v2237_v7, %v2240_v23  ;;  %v2182_v26 = vrot.slane %v2180_v10, 4  ;;  %v2922_v27 = vrot.slane %v2920_v17, 4  ;;  %v2929_v31 = vshll.u32 %v4614_v3, 16  ;;  %v5068_v7 = vld [vmem:[%s5288_s22 + $0x60] sm:$0xff]  }
 0x11e   : > { %1982 = vrot.lane.b32.xlu0 %v4434_v18, %s5234_s26  ;;  %v2933_v32 = vshrl.u32 %v4614_v3, 16  ;;  %v2939_v33 = vshll.u32 %v4615_v4, 16  ;;  %v2728_v34 = vshrl.u32 %v4589_v6, 16  ;;  %v2925_v36 = vrot.slane %v2923_v28, 5  ;;  %v4594_v18 = vld [vmem:[%s5288_s22 + $0x74] sm:$0x1] }
 0x11f   : > { %v943_v22 = vpop.permute.xlu1 %942  ;;  %v2184_v62 = vsel %vm5290_vm2, %v2182_v26, %v2183_v16  ;;  %v2731_v38 = vshll.u32 %v4589_v6, 16  ;;  %v2737_v39 = vshll.u32 %v4590_v12, 16  ;;  %v2931_v42 = vrot.slane %v2929_v31, 5  ;;  %v4677_v23 = vld [vmem:[%s5288_s22 + $0xc0] sm:$0xe] }
 0x120   : > { %v3411_v30 = vld [vmem:[#allocation2 + $0x50] sm:$0xff]  ;;  %979 = vst.msk [vmem:[#allocation2 + $0x60] sm:$0xff] %vm966_vm7, %v943_v22  ;;  %v4514_v41 = vcombine.low %v2181_v24, %v2184_v62  ;;  %v2935_v45 = vrot.slane %v2933_v32, 4  ;;  %v2941_v47 = vrot.slane %v2939_v33, 5  ;;  %v2926_v50 = vor.u32 %v2925_v36, %v2922_v27  ;;  %v4678_v27 = vld [vmem:[%s5288_s22 + $0xc4] sm:$0xf] }
 0x121   : > { %4975 = vmatprep.mubr.msk.bf16.mxu1 %vm3437_vm15, %v3411_v30  ;;  %v927_v35 = vpop.permute.xlu0 %926  ;;  %2319 = vrot.lane.b32.xlu1 %v4522_v25, %s5235_s27  ;;  %v2730_v51 = vrot.slane %v2728_v34, 4  ;;  %v2733_v52 = vrot.slane %v2731_v38, 5  ;;  %v6239_v53 = vrot.slane %v2737_v39, 5  ;;  %v2741_v55 = vshrl.u32 %v4590_v12, 16  ;;  %v4679_v28 = vld [vmem:[%s5288_s22 + $0xc8] sm:$0x1] }
 0x122   : > { %971 = vst.msk [vmem:[#allocation2 + $0x20] sm:$0xff] %vm966_vm7, %v927_v35  ;;  %2301 = vrot.lane.b32.xlu0 %v4513_v19, %s5235_s27  ;;  %v2936_v54 = vor.u32 %v2935_v45, %v2931_v42  ;;  %v2747_v11 = vshll.u32 %v4591_v29, 16  ;;  %v2944_v57 = vshrl.u32 %v4616_v40, 16  ;;  %v2927_v46 = vrot.slane %v2926_v50, 4  ;;  %v5070_v29 = vld [vmem:[%s5288_s22 + $0x6c] sm:$0xff]  }
 0x123   : > { %v3359_v21 = vpop.permute.xlu1 %3358  ;;  %v3403_v37 = vld [vmem:[#allocation2 + $0x10] sm:$0xff]  ;;  %v2734_v56 = vor.u32 %v2733_v52, %v2730_v51  ;;  %v2947_v20 = vshll.u32 %v4616_v40, 16  ;;  %v2953_v59 = vshll.u32 %v4617_v48, 16  ;;  %v2743_v13 = vrot.slane %v2741_v55, 4  ;;  %v4653_v40 = vld [vmem:[%s5288_s22 + $0x60] sm:$0xe] }
 0x124   : > { %3396 = vst.msk [vmem:[#allocation2 + $0x58] sm:$0xff] %vm3384_vm14, %v3359_v21  ;;  %4959 = vmatprep.mubr.msk.bf16.mxu0 %vm3437_vm15, %v3403_v37  ;;  %v2937_v44 = vrot.slane %v2936_v54, 4  ;;  %v2749_v60 = vrot.slane %v2747_v11, 5  ;;  %v2946_v61 = vrot.slane %v2944_v57, 4  ;;  %v2932_v2 = vsel %vm5340_vm5, %v2927_v46, %v2931_v42  ;;  %v4680_v54 = vld [vmem:[%s5288_s22 + $0xcc] sm:$0xe] }
 0x125   : > { %v3343_v58 = vpop.permute.xlu0 %3342  ;;  %2498 = vrot.lane.b32.xlu1 %v5067_v49, %s5236_s28  ;;  %v2735_v3 = vrot.slane %v2734_v56, 4  ;;  %v2949_v4 = vrot.slane %v2947_v20, 5  ;;  %v6251_v6 = vrot.slane %v2953_v59, 5  ;;  %v2744_v9 = vor.u32 %v2743_v13, %v6239_v53  ;;  %v4655_v49 = vld [vmem:[%s5288_s22 + $0x68] sm:$0x1] }
 0x126   : > { %3388 = vst.msk [vmem:[#allocation2 + $0x18] sm:$0xff] %vm3384_vm14, %v3343_v58  ;;  %2303 = vrot.lane.b32.xlu0 %v4514_v41, %s5235_s27  ;;  %v2942_v8 = vsel %vm5340_vm5, %v2937_v44, %v2941_v47  ;;  %v2957_v10 = vshrl.u32 %v4617_v48, 16  ;;  %v2963_v12 = vshll.u32 %v4618_v43, 16  ;;  %v2752_v19 = vshrl.u32 %v4592_v63, 16  ;;  %v4654_v41 = vld [vmem:[%s5288_s22 + $0x64] sm:$0xf] }
 0x127   : > { %v4633_v15 = vcombine.low %v2932_v2, %v2942_v8  ;;  %v2740_v16 = vsel %vm5340_vm5, %v2735_v3, %v6239_v53  ;;  %v2950_v17 = vor.u32 %v2949_v4, %v2946_v61  ;;  %v2745_v24 = vrot.slane %v2744_v9, 4  ;;  %v4681_v58 = vld [vmem:[%s5288_s22 + $0xd0] sm:$0xf]  ;;  %v4682_v13 = vld [vmem:[%s5288_s22 + $0xd4] sm:$0x1] }
 0x128   : > { %v2959_v25 = vrot.slane %v2957_v10, 4  ;;  %v2965_v26 = vrot.slane %v2963_v12, 5  ;;  %v2755_v22 = vshll.u32 %v4592_v63, 16  ;;  %v2754_v31 = vrot.slane %v2752_v19, 4  ;;  %v4657_v8 = vld [vmem:[%s5288_s22 + $0x70] sm:$0xf] }
 0x129   : > { %2500 = vrot.lane.b32.xlu1 %v5069_v1, %s5236_s28  ;;  %v2951_v30 = vrot.slane %v2950_v17, 4  ;;  %v2761_v32 = vshll.u32 %v4593_v14, 16  ;;  %v2765_v33 = vshrl.u32 %v4593_v14, 16  ;;  %v2750_v35 = vsel %vm5340_vm5, %v2745_v24, %v2749_v60 }
 0x12a   : > { %2482 = vrot.lane.b32.xlu0 %v5068_v7, %s5236_s28  ;;  %v2960_v36 = vor.u32 %v2959_v25, %v6251_v6  ;;  %v2757_v38 = vrot.slane %v2755_v22, 5  ;;  %v2771_v39 = vshll.u32 %v4594_v18, 16  ;;  %v4625_v42 = vcombine.low %v2740_v16, %v2750_v35  ;;  %v4656_v7 = vld [vmem:[%s5288_s22 + $0x6c] sm:$0xe] }
 0x12b   : > { %v945_v34 = vpop.permute.xlu1 %944  ;;  %v3412_v62 = vld [vmem:[#allocation2 + $0x58] sm:$0xff]  ;;  %v2956_v45 = vsel %vm5340_vm5, %v2951_v30, %v6251_v6  ;;  %v2763_v47 = vrot.slane %v2761_v32, 5  ;;  %v2767_v48 = vrot.slane %v2765_v33, 4  ;;  %v4697_v37 = vrot.slane %v4677_v23, 9 }
 0x12c   : > { %980 = vst.msk [vmem:[#allocation2 + $0x68] sm:$0xff] %vm966_vm7, %v945_v34  ;;  %4976 = vmatmul.mubr.msk.bf16.gmra.mrb[4].mxu1 %vm3437_vm15, %v3412_v62  ;;  %v2961_v51 = vrot.slane %v2960_v36, 4  ;;  %v2758_v52 = vor.u32 %v2757_v38, %v2754_v31  ;;  %v2773_v53 = vrot.slane %v2771_v39, 5  ;;  %v3276_v11 = vrot.slane %v4678_v27, 5 }
 0x12d   : > { %v3404_v50 = vld [vmem:[#allocation2 + $0x18] sm:$0xff]  ;;  %v929_v21 = vpop.permute.xlu0 %928  ;;  %3043 = vrot.lane.b32.xlu1 %v4633_v15, %s5237_s29  ;;  %v2768_v55 = vor.u32 %v2767_v48, %v2763_v47  ;;  %v3279_v57 = vrot.slane %v4679_v28, 5  ;;  %v4689_v46 = vrot.slane %v4653_v40, 9  ;;  %v3220_v59 = vrot.slane %v4654_v41, 5  ;;  %v4658_v15 = vld [vmem:[%s5288_s22 + $0x74] sm:$0x1]  ;;  %s6424_s22 = scalar_lea.vmem %s6524_s4, %s4802_s19 }
 0x12e   : > { %4960 = vmatmul.mubr.msk.bf16.gmra.mrb[4].mxu0 %vm3437_vm15, %v3404_v50  ;;  %972 = vst.msk [vmem:[#allocation2 + $0x28] sm:$0xff] %vm966_vm7, %v929_v21  ;;  %2484 = vrot.lane.b32.xlu0 %v5070_v29, %s5236_s28  ;;  %v2966_v43 = vsel %vm5340_vm5, %v2961_v51, %v2965_v26  ;;  %v2759_v20 = vrot.slane %v2758_v52, 4  ;;  %v3223_v44 = vrot.slane %v4655_v49, 5  ;;  %v3277_v63 = vsel %vm5290_vm2, %v4697_v37, %v3276_v11 }
 0x12f   : > { %v1267_v56 = vpop.permute.xlu1 %1266  ;;  %v4634_v60 = vcombine.low %v2956_v45, %v2966_v43  ;;  %v2769_v61 = vrot.slane %v2768_v55, 4  ;;  %v3278_v1 = vrot.slane %v3276_v11, 4  ;;  %v3222_v3 = vrot.slane %v3220_v59, 4 }
 0x130   : > { %1303 = vst.msk [vmem:[#allocation2 + $0x60] sm:$0xff] %vm1290_vm8, %v1267_v56  ;;  %v2764_v2 = vsel %vm5340_vm5, %v2759_v20, %v2763_v47  ;;  %v4698_v6 = vrot.slane %v4680_v54, 9  ;;  %v3283_v12 = vrot.slane %v4681_v58, 5  ;;  %v3286_v14 = vrot.slane %v4682_v13, 5 }
 0x131   : > { %v1251_v4 = vpop.permute.xlu0 %1250  ;;  %3045 = vrot.lane.b32.xlu1 %v4634_v60, %s5237_s29  ;;  %v2774_v9 = vsel %vm5340_vm5, %v2769_v61, %v2773_v53  ;;  %v3280_v10 = vsel %vm5290_vm2, %v3278_v1, %v3279_v57  ;;  %v3221_v19 = vsel %vm5290_vm2, %v4689_v46, %v3220_v59  ;;  %v3224_v5 = vsel %vm5290_vm2, %v3222_v3, %v3223_v44 }
 0x132   : > { %1295 = vst.msk [vmem:[#allocation2 + $0x20] sm:$0xff] %vm1290_vm8, %v1251_v4  ;;  %3027 = vrot.lane.b32.xlu0 %v4625_v42, %s5237_s29  ;;  %v4626_v17 = vcombine.low %v2764_v2, %v2774_v9  ;;  %v4713_v18 = vcombine.low %v3277_v63, %v3280_v10  ;;  %v3284_v23 = vsel %vm5290_vm2, %v4698_v6, %v3283_v12  ;;  %v3285_v24 = vrot.slane %v3283_v12, 4 }
 0x133   : > { %v1269_v16 = vpop.permute.xlu1 %1268  ;;  %v4690_v25 = vrot.slane %v4656_v7, 9  ;;  %v3227_v26 = vrot.slane %v4657_v8, 5  ;;  %v3230_v22 = vrot.slane %v4658_v15, 5  ;;  %v4705_v31 = vcombine.low %v3221_v19, %v3224_v5 }
 0x134   : > { %1304 = vst.msk [vmem:[#allocation2 + $0x68] sm:$0xff] %vm1290_vm8, %v1269_v16  ;;  %v3287_v28 = vsel %vm5290_vm2, %v3285_v24, %v3286_v14 }
 0x135   : > { %v1253_v27 = vpop.permute.xlu0 %1252  ;;  %3364 = vrot.lane.b32.xlu1 %v4713_v18, %s5238_s30  ;;  %v3229_v29 = vrot.slane %v3227_v26, 4  ;;  %v4714_v32 = vcombine.low %v3284_v23, %v3287_v28  ;;  %v3228_v33 = vsel %vm5290_vm2, %v4690_v25, %v3227_v26 }
 0x136   : > { %1296 = vst.msk [vmem:[#allocation2 + $0x28] sm:$0xff] %vm1290_vm8, %v1253_v27  ;;  %3029 = vrot.lane.b32.xlu0 %v4626_v17, %s5237_s29 }
 0x137   : > { %v1448_v30 = vpop.permute.xlu1 %1447  ;;  %v3231_v34 = vsel %vm5290_vm2, %v3229_v29, %v3230_v22 }
 0x138   : > { %1484 = vst.msk [vmem:[#allocation2 + $0x60] sm:$0xff] %vm1471_vm9, %v1448_v30  ;;  %v4706_v36 = vcombine.low %v3228_v33, %v3231_v34 }
 0x139   : > { %v1432_v62 = vpop.permute.xlu0 %1431  ;;  %3366 = vrot.lane.b32.xlu1 %v4714_v32, %s5238_s30 }
 0x13a   : > { %1476 = vst.msk [vmem:[#allocation2 + $0x20] sm:$0xff] %vm1471_vm9, %v1432_v62  ;;  %3348 = vrot.lane.b32.xlu0 %v4705_v31, %s5238_s30  ;;  %v6390_v62 = vld [vmem:[%s6522_s2] ss:$0 sm:$0xff] }
 0x13b   : > { %v1450_v35 = vpop.permute.xlu1 %1449 }
 0x13c   : > { %1485 = vst.msk [vmem:[#allocation2 + $0x68] sm:$0xff] %vm1471_vm9, %v1450_v35 }
 0x13d   : > { %v1434_v38 = vpop.permute.xlu0 %1433 }
 0x13e   : > { %1477 = vst.msk [vmem:[#allocation2 + $0x28] sm:$0xff] %vm1471_vm9, %v1434_v38  ;;  %3350 = vrot.lane.b32.xlu0 %v4706_v36, %s5238_s30  ;;  %v6395_v36 = vld [vmem:[%s6523_s3] ss:$0 sm:$0xff] }
 0x13f   : > { %v1993_v39 = vpop.permute.xlu1 %1992 }
 0x140   : > { %2029 = vst.msk [vmem:[#allocation2 + $0x60] sm:$0xff] %vm2016_vm10, %v1993_v39 }
 0x141   : > { %v1977_v0 = vpop.permute.xlu0 %1976 }
 0x142   : > { %2021 = vst.msk [vmem:[#allocation2 + $0x20] sm:$0xff] %vm2016_vm10, %v1977_v0 }
 0x143   : > { %v1995_v40 = vpop.permute.xlu1 %1994 }
 0x144   : > { %2030 = vst.msk [vmem:[#allocation2 + $0x68] sm:$0xff] %vm2016_vm10, %v1995_v40 }
 0x147   : > { %v2314_v41 = vpop.permute.xlu1 %2313  ;;  %v1979_v42 = vpop.permute.xlu0 %1978 }
 0x148   : > { %2350 = vst.msk [vmem:[#allocation2 + $0x60] sm:$0xff] %vm2337_vm11, %v2314_v41 }
 0x149   : > { %2022 = vst.msk [vmem:[#allocation2 + $0x28] sm:$0xff] %vm2016_vm10, %v1979_v42 }
 0x14b   : > { %v2316_v45 = vpop.permute.xlu1 %2315  ;;  %v2298_v47 = vpop.permute.xlu0 %2297 }
 0x14c   : > { %2351 = vst.msk [vmem:[#allocation2 + $0x68] sm:$0xff] %vm2337_vm11, %v2316_v45  ;;  %2342 = vst.msk [vmem:[#allocation2 + $0x20] sm:$0xff] %vm2337_vm11, %v2298_v47 }
 0x14f   : > { %v2495_v48 = vpop.permute.xlu1 %2494  ;;  %v2300_v49 = vpop.permute.xlu0 %2299 }
 0x150   : > { %2531 = vst.msk [vmem:[#allocation2 + $0x60] sm:$0xff] %vm2518_vm12, %v2495_v48 }
 0x151   : > { %2343 = vst.msk [vmem:[#allocation2 + $0x28] sm:$0xff] %vm2337_vm11, %v2300_v49 }
 0x153   : > { %v2497_v50 = vpop.permute.xlu1 %2496  ;;  %v2479_v51 = vpop.permute.xlu0 %2478 }
 0x154   : > { %2532 = vst.msk [vmem:[#allocation2 + $0x68] sm:$0xff] %vm2518_vm12, %v2497_v50  ;;  %2523 = vst.msk [vmem:[#allocation2 + $0x20] sm:$0xff] %vm2518_vm12, %v2479_v51 }
 0x157   : > { %v3040_v52 = vpop.permute.xlu1 %3039  ;;  %v2481_v53 = vpop.permute.xlu0 %2480 }
 0x158   : > { %3076 = vst.msk [vmem:[#allocation2 + $0x60] sm:$0xff] %vm3063_vm13, %v3040_v52 }
 0x159   : > { %2524 = vst.msk [vmem:[#allocation2 + $0x28] sm:$0xff] %vm2518_vm12, %v2481_v53 }
 0x15b   : > { %v3024_v21 = vpop.permute.xlu0 %3023  ;;  %v3042_v37 = vpop.permute.xlu1 %3041 }
 0x15c   : > { %3068 = vst.msk [vmem:[#allocation2 + $0x20] sm:$0xff] %vm3063_vm13, %v3024_v21  ;;  %3077 = vst.msk [vmem:[#allocation2 + $0x68] sm:$0xff] %vm3063_vm13, %v3042_v37 }
 0x15f   : > { %v3026_v54 = vpop.permute.xlu0 %3025  ;;  %v3361_v55 = vpop.permute.xlu1 %3360 }
 0x160   : > { %3069 = vst.msk [vmem:[#allocation2 + $0x28] sm:$0xff] %vm3063_vm13, %v3026_v54 }
 0x161   : > { %3397 = vst.msk [vmem:[#allocation2 + $0x60] sm:$0xff] %vm3384_vm14, %v3361_v55 }
 0x163   : > { %v3345_v11 = vpop.permute.xlu0 %3344 }
 0x164   : > { %3389 = vst.msk [vmem:[#allocation2 + $0x20] sm:$0xff] %vm3384_vm14, %v3345_v11 }
 0x168   : > { %v3413_v57 = vld [vmem:[#allocation2 + $0x60] sm:$0xff]  ;;  %v947_v46 = vpop.permute.xlu1 %946 }
 0x169   : > { %4979 = vmatprep.mubr.msk.bf16.mxu1 %vm3437_vm15, %v3413_v57  ;;  %981 = vst.msk [vmem:[#allocation2 + $0x70] sm:$0xff] %vm966_vm7, %v947_v46 }
 0x16a   : > { %v931_v56 = vpop.permute.xlu0 %930 }
 0x16b   : > { %v3405_v58 = vld [vmem:[#allocation2 + $0x20] sm:$0xff]  ;;  %973 = vst.msk [vmem:[#allocation2 + $0x30] sm:$0xff] %vm966_vm7, %v931_v56 }
 0x16c   : > { %4963 = vmatprep.mubr.msk.bf16.mxu0 %vm3437_vm15, %v3405_v58  ;;  %v3363_v43 = vpop.permute.xlu1 %3362 }
 0x16d   : > { %3398 = vst.msk [vmem:[#allocation2 + $0x68] sm:$0xff] %vm3384_vm14, %v3363_v43 }
 0x16e   : > { %v3347_v20 = vpop.permute.xlu0 %3346 }
 0x16f   : > { %3390 = vst.msk [vmem:[#allocation2 + $0x28] sm:$0xff] %vm3384_vm14, %v3347_v20 }
 0x173   : > { %v949_v59 = vpop.permute.xlu1 %948 }
 0x174   : > { %982 = vst.msk [vmem:[#allocation2 + $0x78] sm:$0xff] %vm966_vm7, %v949_v59  ;;  %v3414_v44 = vld [vmem:[#allocation2 + $0x68] sm:$0xff] }
 0x175   : > { %4980 = vmatmul.mubr.msk.bf16.gmra.mrb[8].mxu1 %vm3437_vm15, %v3414_v44 }
 0x176   : > { %v3406_v13 = vld [vmem:[#allocation2 + $0x28] sm:$0xff]  ;;  %v933_v60 = vpop.permute.xlu0 %932 }
 0x177   : > { %v1271_v61 = vpop.permute.xlu1 %1270  ;;  %4964 = vmatmul.mubr.msk.bf16.gmra.mrb[8].mxu0 %vm3437_vm15, %v3406_v13  ;;  %974 = vst.msk [vmem:[#allocation2 + $0x38] sm:$0xff] %vm966_vm7, %v933_v60 }
 0x178   : > { %1305 = vst.msk [vmem:[#allocation2 + $0x70] sm:$0xff] %vm1290_vm8, %v1271_v61 }
 0x17a   : > { %v1255_v63 = vpop.permute.xlu0 %1254 }
 0x17b   : > { %v1273_v1 = vpop.permute.xlu1 %1272  ;;  %1297 = vst.msk [vmem:[#allocation2 + $0x30] sm:$0xff] %vm1290_vm8, %v1255_v63 }
 0x17c   : > { %1306 = vst.msk [vmem:[#allocation2 + $0x78] sm:$0xff] %vm1290_vm8, %v1273_v1 }
 0x17e   : > { %v1257_v2 = vpop.permute.xlu0 %1256 }
 0x17f   : > { %v1452_v3 = vpop.permute.xlu1 %1451  ;;  %1298 = vst.msk [vmem:[#allocation2 + $0x38] sm:$0xff] %vm1290_vm8, %v1257_v2 }
 0x180   : > { %1486 = vst.msk [vmem:[#allocation2 + $0x70] sm:$0xff] %vm1471_vm9, %v1452_v3 }
 0x182   : > { %v1436_v4 = vpop.permute.xlu0 %1435 }
 0x183   : > { %v1454_v6 = vpop.permute.xlu1 %1453  ;;  %1478 = vst.msk [vmem:[#allocation2 + $0x30] sm:$0xff] %vm1471_vm9, %v1436_v4 }
 0x184   : > { %1487 = vst.msk [vmem:[#allocation2 + $0x78] sm:$0xff] %vm1471_vm9, %v1454_v6 }
 0x186   : > { %v1438_v7 = vpop.permute.xlu0 %1437 }
 0x187   : > { %v1997_v8 = vpop.permute.xlu1 %1996  ;;  %1479 = vst.msk [vmem:[#allocation2 + $0x38] sm:$0xff] %vm1471_vm9, %v1438_v7 }
 0x188   : > { %2031 = vst.msk [vmem:[#allocation2 + $0x70] sm:$0xff] %vm2016_vm10, %v1997_v8 }
 0x18a   : > { %v1981_v9 = vpop.permute.xlu0 %1980 }
 0x18b   : > { %v1999_v10 = vpop.permute.xlu1 %1998  ;;  %2023 = vst.msk [vmem:[#allocation2 + $0x30] sm:$0xff] %vm2016_vm10, %v1981_v9 }
 0x18c   : > { %2032 = vst.msk [vmem:[#allocation2 + $0x78] sm:$0xff] %vm2016_vm10, %v1999_v10 }
 0x18f   : > { %v2318_v12 = vpop.permute.xlu1 %2317 }
 0x190   : > { %v1983_v14 = vpop.permute.xlu0 %1982  ;;  %2352 = vst.msk [vmem:[#allocation2 + $0x70] sm:$0xff] %vm2337_vm11, %v2318_v12 }
 0x191   : > { %2024 = vst.msk [vmem:[#allocation2 + $0x38] sm:$0xff] %vm2016_vm10, %v1983_v14 }
 0x193   : > { %v2320_v15 = vpop.permute.xlu1 %2319 }
 0x194   : > { %v2302_v16 = vpop.permute.xlu0 %2301  ;;  %2353 = vst.msk [vmem:[#allocation2 + $0x78] sm:$0xff] %vm2337_vm11, %v2320_v15 }
 0x195   : > { %2344 = vst.msk [vmem:[#allocation2 + $0x30] sm:$0xff] %vm2337_vm11, %v2302_v16 }
 0x197   : > { %v2499_v17 = vpop.permute.xlu1 %2498 }
 0x198   : > { %v2304_v18 = vpop.permute.xlu0 %2303  ;;  %2533 = vst.msk [vmem:[#allocation2 + $0x70] sm:$0xff] %vm2518_vm12, %v2499_v17 }
 0x199   : > { %2345 = vst.msk [vmem:[#allocation2 + $0x38] sm:$0xff] %vm2337_vm11, %v2304_v18 }
 0x19b   : > { %v2501_v19 = vpop.permute.xlu1 %2500 }
 0x19c   : > { %v2483_v5 = vpop.permute.xlu0 %2482  ;;  %2534 = vst.msk [vmem:[#allocation2 + $0x78] sm:$0xff] %vm2518_vm12, %v2501_v19 }
 0x19d   : > { %2525 = vst.msk [vmem:[#allocation2 + $0x30] sm:$0xff] %vm2518_vm12, %v2483_v5 }
 0x19f   : > { %v3044_v23 = vpop.permute.xlu1 %3043 }
 0x1a0   : > { %v2485_v24 = vpop.permute.xlu0 %2484  ;;  %3078 = vst.msk [vmem:[#allocation2 + $0x70] sm:$0xff] %vm3063_vm13, %v3044_v23 }
 0x1a1   : > { %2526 = vst.msk [vmem:[#allocation2 + $0x38] sm:$0xff] %vm2518_vm12, %v2485_v24 }
 0x1a3   : > { %v3046_v25 = vpop.permute.xlu1 %3045 }
 0x1a4   : > { %v3028_v26 = vpop.permute.xlu0 %3027  ;;  %3079 = vst.msk [vmem:[#allocation2 + $0x78] sm:$0xff] %vm3063_vm13, %v3046_v25 }
 0x1a5   : > { %3070 = vst.msk [vmem:[#allocation2 + $0x30] sm:$0xff] %vm3063_vm13, %v3028_v26 }
 0x1a7   : > { %v3365_v22 = vpop.permute.xlu1 %3364 }
 0x1a8   : > { %v3030_v27 = vpop.permute.xlu0 %3029  ;;  %3399 = vst.msk [vmem:[#allocation2 + $0x70] sm:$0xff] %vm3384_vm14, %v3365_v22 }
 0x1a9   : > { %3071 = vst.msk [vmem:[#allocation2 + $0x38] sm:$0xff] %vm3063_vm13, %v3030_v27 }
 0x1ab   : > { %v3367_v28 = vpop.permute.xlu1 %3366 }
 0x1ac   : > { %v3349_v29 = vpop.permute.xlu0 %3348  ;;  %3400 = vst.msk [vmem:[#allocation2 + $0x78] sm:$0xff] %vm3384_vm14, %v3367_v28 }
 0x1ad   : > { %3391 = vst.msk [vmem:[#allocation2 + $0x30] sm:$0xff] %vm3384_vm14, %v3349_v29 }
 0x1af   : > { %v3415_v30 = vld [vmem:[#allocation2 + $0x70] sm:$0xff] }
 0x1b0   : > { %v3351_v31 = vpop.permute.xlu0 %3350  ;;  %4983 = vmatprep.mubr.msk.bf16.mxu1 %vm3437_vm15, %v3415_v30 }
 0x1b1   : > { %3392 = vst.msk [vmem:[#allocation2 + $0x38] sm:$0xff] %vm3384_vm14, %v3351_v31 }
 0x1b3   : > { %v3416_v32 = vld [vmem:[#allocation2 + $0x78] sm:$0xff] }
 0x1b4   : > { %v3407_v33 = vld [vmem:[#allocation2 + $0x30] sm:$0xff]  ;;  %4984 = vmatmul.mubr.msk.bf16.gmra.mrb[12].mxu1 %vm3437_vm15, %v3416_v32 }
 0x1b5   : > { %4967 = vmatprep.mubr.msk.bf16.mxu0 %vm3437_vm15, %v3407_v33 }
 0x1b8   : > { %v3408_v34 = vld [vmem:[#allocation2 + $0x38] sm:$0xff] }
 0x1b9   : > { %4968 = vmatmul.mubr.msk.bf16.gmra.mrb[12].mxu0 %vm3437_vm15, %v3408_v34 }
 0x1bd   : > { %v4957_v35 = vpop.f32.mrb[0].mxu0  ;;  %v4973_v38 = vpop.f32.mrb[0].mxu1 }
 0x1be   : > { %v3660_v39 = vmul.f32 %v4957_v35, %v6390_v62  ;;  %v3676_v0 = vmul.f32 %v4973_v38, %v6390_v62  ;;  %v3524_v40 = vpop.f32.mrb[1].mxu0  ;;  %v3588_v41 = vpop.f32.mrb[1].mxu1 }
 0x1bf   : > { %v3658_v42 = vmul.f32 %v6390_v62, %v3524_v40  ;;  %v3674_v45 = vmul.f32 %v6390_v62, %v3588_v41  ;;  %v4958_v47 = vpop.f32.mrb[2].mxu0  ;;  %v4974_v48 = vpop.f32.mrb[2].mxu1 }
 0x1c0   : > { %v3699_v49 = vadd.f32 %v6395_v36, %v3660_v39  ;;  %v6403_v50 = vadd.f32 %v6395_v36, %v3676_v0  ;;  %v3661_v51 = vmul.f32 %v4958_v47, %v6390_v62  ;;  %v3677_v52 = vmul.f32 %v4974_v48, %v6390_v62  ;;  %v3527_v53 = vpop.f32.mrb[3].mxu0  ;;  %v3591_v21 = vpop.f32.mrb[3].mxu1 }
 0x1c1   : > { %v3697_v37 = vadd.f32 %v6395_v36, %v3658_v42  ;;  %v6409_v54 = vadd.f32 %v6395_v36, %v3674_v45  ;;  %v3659_v55 = vmul.f32 %v6390_v62, %v3527_v53  ;;  %v3675_v11 = vmul.f32 %v6390_v62, %v3591_v21 }
 0x1c2   : > { %v4738_v57 = vmul.f32 -1.442695, %v3699_v49  ;;  %v4754_v46 = vmul.f32 -1.442695, %v6403_v50  ;;  %v3700_v56 = vadd.f32 %v6395_v36, %v3661_v51  ;;  %v3716_v58 = vadd.f32 %v6395_v36, %v3677_v52 }
 0x1c3   : > { %v4736_v43 = vmul.f32 -1.442695, %v3697_v37  ;;  %v4752_v20 = vmul.f32 -1.442695, %v6409_v54  ;;  %v3698_v59 = vadd.f32 %v6395_v36, %v3659_v55  ;;  %v3714_v44 = vadd.f32 %v6395_v36, %v3675_v11 }
 0x1c4   : > { %5079 = vpow2.f32 %v4738_v57  ;;  %v4739_v13 = vmul.f32 -1.442695, %v3700_v56  ;;  %v4755_v60 = vmul.f32 -1.442695, %v3716_v58 }
 0x1c5   : > { %5081 = vpow2.f32 %v4754_v46  ;;  %v4737_v61 = vmul.f32 -1.442695, %v3698_v59  ;;  %v4753_v63 = vmul.f32 -1.442695, %v3714_v44 }
 0x1c6   : > { %5083 = vpow2.f32 %v4736_v43 }
 0x1c7   : > { %5085 = vpow2.f32 %v4752_v20 }
 0x1c8   : > { %5087 = vpow2.f32 %v4739_v13 }
 0x1c9   : > { %5089 = vpow2.f32 %v4755_v60 }
 0x1ca   : > { %5091 = vpow2.f32 %v4737_v61 }
 0x1cb   : > { %5093 = vpow2.f32 %v4753_v63 }
 0x1ce   : > { %v5080_v1 = vpop.eup %5079 }
 0x1cf   : > { %v5082_v2 = vpop.eup %5081  ;;  %v3827_v3 = vadd.f32 1.0, %v5080_v1 }
 0x1d0   : > { %v5084_v4 = vpop.eup %5083  ;;  %v3843_v6 = vadd.f32 1.0, %v5082_v2 }
 0x1d1   : > { %v5086_v7 = vpop.eup %5085  ;;  %5095 = vrcp.f32 %v3827_v3  ;;  %v3825_v8 = vadd.f32 1.0, %v5084_v4 }
 0x1d2   : > { %v5088_v9 = vpop.eup %5087  ;;  %5097 = vrcp.f32 %v3843_v6  ;;  %v3841_v10 = vadd.f32 1.0, %v5086_v7 }
 0x1d3   : > { %v5090_v12 = vpop.eup %5089  ;;  %5099 = vrcp.f32 %v3825_v8  ;;  %v3828_v14 = vadd.f32 1.0, %v5088_v9 }
 0x1d4   : > { %v5092_v15 = vpop.eup %5091  ;;  %5101 = vrcp.f32 %v3841_v10  ;;  %v3844_v16 = vadd.f32 1.0, %v5090_v12 }
 0x1d5   : > { %v5094_v17 = vpop.eup %5093  ;;  %5103 = vrcp.f32 %v3828_v14  ;;  %v3826_v18 = vadd.f32 1.0, %v5092_v15 }
 0x1d6   : > { %5105 = vrcp.f32 %v3844_v16  ;;  %v3842_v19 = vadd.f32 1.0, %v5094_v17 }
 0x1d7   : > { %5107 = vrcp.f32 %v3826_v18 }
 0x1d8   : > { %5109 = vrcp.f32 %v3842_v19 }
 0x1db   : > { %v5096_v5 = vpop.eup %5095 }
 0x1dc   : > { %v5098_v23 = vpop.eup %5097  ;;  %v3923_v27 = vmul.f32 %v5096_v5, %v3699_v49 }
 0x1dd   : > { %v5100_v24 = vpop.eup %5099  ;;  %v3939_v30 = vmul.f32 %v5098_v23, %v6403_v50 }
 0x1de   : > { %v5102_v25 = vpop.eup %5101  ;;  %v3921_v33 = vmul.f32 %v5100_v24, %v3697_v37 }
 0x1df   : > { %v5104_v26 = vpop.eup %5103  ;;  %v3937_v38 = vmul.f32 %v5102_v25, %v6409_v54 }
 0x1e0   : > { %v5106_v22 = vpop.eup %5105  ;;  %v3924_v28 = vmul.f32 %v5104_v26, %v3700_v56 }
 0x1e1   : > { %v5108_v29 = vpop.eup %5107  ;;  %v3940_v31 = vmul.f32 %v5106_v22, %v3716_v58 }
 0x1e2   : > { %v5110_v32 = vpop.eup %5109  ;;  %v4843_v34 = vpack.c.bf16 %v3924_v28, %v3923_v27  ;;  %v3922_v35 = vmul.f32 %v5108_v29, %v3698_v59 }
 0x1e3   : > { %v4883_v39 = vpack.c.bf16 %v3940_v31, %v3939_v30  ;;  %v3938_v0 = vmul.f32 %v5110_v32, %v3714_v44 }
 0x1e4   : > { %4915 = vst [vmem:[%s6424_s22 + $0x8] sm:$0xff] %v4843_v34   ;;  %v4838_v40 = vpack.c.bf16 %v3922_v35, %v3921_v33 }
 0x1e5   : > { %4923 = vst [vmem:[%s6424_s22 + $0x48] sm:$0xff] %v4883_v39   ;;  %v4878_v41 = vpack.c.bf16 %v3938_v0, %v3937_v38 }
 0x1e6   : > { %4839 = vst [vmem:[%s6424_s22] sm:$0xff] %v4838_v40  }
 0x1e7   : > { %4922 = vst [vmem:[%s6424_s22 + $0x40] sm:$0xff] %v4878_v41  }
 0x1ff   : > { %v4977_v42 = vpop.f32.mrb[4].mxu1 }
 0x200   : > { %v3680_v45 = vmul.f32 %v4977_v42, %v6390_v62  ;;  %v3604_v47 = vpop.f32.mrb[5].mxu1 }
 0x201   : > { %v4961_v48 = vpop.f32.mrb[4].mxu0  ;;  %v3678_v49 = vmul.f32 %v6390_v62, %v3604_v47  ;;  %v4978_v50 = vpop.f32.mrb[6].mxu1 }
 0x202   : > { %v3664_v51 = vmul.f32 %v4961_v48, %v6390_v62  ;;  %v6435_v52 = vadd.f32 %v6395_v36, %v3680_v45  ;;  %v3540_v53 = vpop.f32.mrb[5].mxu0  ;;  %v3681_v21 = vmul.f32 %v4978_v50, %v6390_v62  ;;  %v3607_v37 = vpop.f32.mrb[7].mxu1 }
 0x203   : > { %v3662_v54 = vmul.f32 %v6390_v62, %v3540_v53  ;;  %v6440_v55 = vadd.f32 %v6395_v36, %v3678_v49  ;;  %v4962_v11 = vpop.f32.mrb[6].mxu0  ;;  %v3679_v57 = vmul.f32 %v6390_v62, %v3607_v37 }
 0x204   : > { %v3703_v46 = vadd.f32 %v6395_v36, %v3664_v51  ;;  %v4758_v56 = vmul.f32 -1.442695, %v6435_v52  ;;  %v3665_v58 = vmul.f32 %v4962_v11, %v6390_v62  ;;  %v3720_v43 = vadd.f32 %v6395_v36, %v3681_v21  ;;  %v3543_v20 = vpop.f32.mrb[7].mxu0 }
 0x205   : > { %v3701_v59 = vadd.f32 %v6395_v36, %v3662_v54  ;;  %v4756_v44 = vmul.f32 -1.442695, %v6440_v55  ;;  %v3663_v13 = vmul.f32 %v6390_v62, %v3543_v20  ;;  %v3718_v60 = vadd.f32 %v6395_v36, %v3679_v57 }
 0x206   : > { %v4742_v61 = vmul.f32 -1.442695, %v3703_v46  ;;  %5111 = vpow2.f32 %v4758_v56  ;;  %v3704_v63 = vadd.f32 %v6395_v36, %v3665_v58  ;;  %v4759_v2 = vmul.f32 -1.442695, %v3720_v43 }
 0x207   : > { %v4740_v1 = vmul.f32 -1.442695, %v3701_v59  ;;  %5113 = vpow2.f32 %v4756_v44  ;;  %v3702_v3 = vadd.f32 %v6395_v36, %v3663_v13  ;;  %v4757_v7 = vmul.f32 -1.442695, %v3718_v60 }
 0x208   : > { %5115 = vpow2.f32 %v4742_v61  ;;  %v4743_v4 = vmul.f32 -1.442695, %v3704_v63 }
 0x209   : > { %5117 = vpow2.f32 %v4740_v1  ;;  %v4741_v6 = vmul.f32 -1.442695, %v3702_v3 }
 0x20a   : > { %5119 = vpow2.f32 %v4743_v4 }
 0x20b   : > { %5121 = vpow2.f32 %v4759_v2 }
 0x20c   : > { %5123 = vpow2.f32 %v4741_v6 }
 0x20d   : > { %5125 = vpow2.f32 %v4757_v7 }
 0x210   : > { %v5112_v8 = vpop.eup %5111 }
 0x211   : > { %v5114_v9 = vpop.eup %5113  ;;  %v3847_v10 = vadd.f32 1.0, %v5112_v8 }
 0x212   : > { %v5116_v12 = vpop.eup %5115  ;;  %v3845_v14 = vadd.f32 1.0, %v5114_v9 }
 0x213   : > { %v5118_v15 = vpop.eup %5117  ;;  %v3831_v16 = vadd.f32 1.0, %v5116_v12  ;;  %5127 = vrcp.f32 %v3847_v10 }
 0x214   : > { %v5120_v17 = vpop.eup %5119  ;;  %v3829_v18 = vadd.f32 1.0, %v5118_v15  ;;  %5129 = vrcp.f32 %v3845_v14 }
 0x215   : > { %v5122_v19 = vpop.eup %5121  ;;  %5131 = vrcp.f32 %v3831_v16  ;;  %v3832_v5 = vadd.f32 1.0, %v5120_v17 }
 0x216   : > { %v5124_v23 = vpop.eup %5123  ;;  %5133 = vrcp.f32 %v3829_v18  ;;  %v3848_v24 = vadd.f32 1.0, %v5122_v19 }
 0x217   : > { %v5126_v25 = vpop.eup %5125  ;;  %5135 = vrcp.f32 %v3832_v5  ;;  %v3830_v26 = vadd.f32 1.0, %v5124_v23 }
 0x218   : > { %5137 = vrcp.f32 %v3848_v24  ;;  %v3846_v22 = vadd.f32 1.0, %v5126_v25 }
 0x219   : > { %5139 = vrcp.f32 %v3830_v26 }
 0x21a   : > { %5141 = vrcp.f32 %v3846_v22 }
 0x21d   : > { %v5128_v27 = vpop.eup %5127 }
 0x21e   : > { %v5130_v28 = vpop.eup %5129  ;;  %v3943_v38 = vmul.f32 %v5128_v27, %v6435_v52 }
 0x21f   : > { %v5132_v29 = vpop.eup %5131  ;;  %v3941_v45 = vmul.f32 %v5130_v28, %v6440_v55 }
 0x220   : > { %v5134_v30 = vpop.eup %5133  ;;  %v3927_v33 = vmul.f32 %v5132_v29, %v3703_v46 }
 0x221   : > { %v5136_v31 = vpop.eup %5135  ;;  %v3925_v40 = vmul.f32 %v5134_v30, %v3701_v59 }
 0x222   : > { %v5138_v32 = vpop.eup %5137  ;;  %v3928_v34 = vmul.f32 %v5136_v31, %v3704_v63 }
 0x223   : > { %v5140_v35 = vpop.eup %5139  ;;  %v3944_v39 = vmul.f32 %v5138_v32, %v3720_v43 }
 0x224   : > { %v5142_v0 = vpop.eup %5141  ;;  %v4853_v41 = vpack.c.bf16 %v3928_v34, %v3927_v33  ;;  %v3926_v42 = vmul.f32 %v5140_v35, %v3702_v3 }
 0x225   : > { %v4893_v47 = vpack.c.bf16 %v3944_v39, %v3943_v38  ;;  %v3942_v48 = vmul.f32 %v5142_v0, %v3718_v60 }
 0x226   : > { %4917 = vst [vmem:[%s6424_s22 + $0x18] sm:$0xff] %v4853_v41   ;;  %v4848_v49 = vpack.c.bf16 %v3926_v42, %v3925_v40 }
 0x227   : > { %4925 = vst [vmem:[%s6424_s22 + $0x58] sm:$0xff] %v4893_v47   ;;  %v4888_v50 = vpack.c.bf16 %v3942_v48, %v3941_v45 }
 0x228   : > { %4916 = vst [vmem:[%s6424_s22 + $0x10] sm:$0xff] %v4848_v49  }
 0x229   : > { %4924 = vst [vmem:[%s6424_s22 + $0x50] sm:$0xff] %v4888_v50  }
 0x248   : > { %v4981_v51 = vpop.f32.mrb[8].mxu1 }
 0x249   : > { %v3684_v53 = vmul.f32 %v4981_v51, %v6390_v62  ;;  %v3620_v21 = vpop.f32.mrb[9].mxu1 }
 0x24a   : > { %v4965_v52 = vpop.f32.mrb[8].mxu0  ;;  %v3682_v37 = vmul.f32 %v6390_v62, %v3620_v21  ;;  %v4982_v54 = vpop.f32.mrb[10].mxu1 }
 0x24b   : > { %v3668_v11 = vmul.f32 %v4965_v52, %v6390_v62  ;;  %v6463_v55 = vadd.f32 %v6395_v36, %v3684_v53  ;;  %v3556_v57 = vpop.f32.mrb[9].mxu0  ;;  %v3685_v46 = vmul.f32 %v4982_v54, %v6390_v62  ;;  %v3623_v56 = vpop.f32.mrb[11].mxu1 }
 0x24c   : > { %v3666_v58 = vmul.f32 %v6390_v62, %v3556_v57  ;;  %v6468_v43 = vadd.f32 %v6395_v36, %v3682_v37  ;;  %v4966_v20 = vpop.f32.mrb[10].mxu0  ;;  %v3683_v59 = vmul.f32 %v6390_v62, %v3623_v56 }
 0x24d   : > { %v3707_v44 = vadd.f32 %v6395_v36, %v3668_v11  ;;  %v4762_v13 = vmul.f32 -1.442695, %v6463_v55  ;;  %v3669_v60 = vmul.f32 %v4966_v20, %v6390_v62  ;;  %v3724_v61 = vadd.f32 %v6395_v36, %v3685_v46  ;;  %v3559_v63 = vpop.f32.mrb[11].mxu0 }
 0x24e   : > { %v3705_v1 = vadd.f32 %v6395_v36, %v3666_v58  ;;  %v4760_v2 = vmul.f32 -1.442695, %v6468_v43  ;;  %v3667_v3 = vmul.f32 %v6390_v62, %v3559_v63  ;;  %v3722_v4 = vadd.f32 %v6395_v36, %v3683_v59 }
 0x24f   : > { %v4746_v6 = vmul.f32 -1.442695, %v3707_v44  ;;  %5143 = vpow2.f32 %v4762_v13  ;;  %v3708_v7 = vadd.f32 %v6395_v36, %v3669_v60  ;;  %v4763_v9 = vmul.f32 -1.442695, %v3724_v61 }
 0x250   : > { %v4744_v8 = vmul.f32 -1.442695, %v3705_v1  ;;  %5145 = vpow2.f32 %v4760_v2  ;;  %v3706_v10 = vadd.f32 %v6395_v36, %v3667_v3  ;;  %v4761_v15 = vmul.f32 -1.442695, %v3722_v4 }
 0x251   : > { %5147 = vpow2.f32 %v4746_v6  ;;  %v4747_v12 = vmul.f32 -1.442695, %v3708_v7 }
 0x252   : > { %5149 = vpow2.f32 %v4744_v8  ;;  %v4745_v14 = vmul.f32 -1.442695, %v3706_v10 }
 0x253   : > { %5151 = vpow2.f32 %v4747_v12 }
 0x254   : > { %5153 = vpow2.f32 %v4763_v9 }
 0x255   : > { %5155 = vpow2.f32 %v4745_v14 }
 0x256   : > { %5157 = vpow2.f32 %v4761_v15 }
 0x259   : > { %v5144_v16 = vpop.eup %5143 }
 0x25a   : > { %v5146_v17 = vpop.eup %5145  ;;  %v3851_v18 = vadd.f32 1.0, %v5144_v16 }
 0x25b   : > { %v5148_v19 = vpop.eup %5147  ;;  %v3849_v5 = vadd.f32 1.0, %v5146_v17 }
 0x25c   : > { %v5150_v23 = vpop.eup %5149  ;;  %v3835_v24 = vadd.f32 1.0, %v5148_v19  ;;  %5159 = vrcp.f32 %v3851_v18 }
 0x25d   : > { %v5152_v25 = vpop.eup %5151  ;;  %v3833_v26 = vadd.f32 1.0, %v5150_v23  ;;  %5161 = vrcp.f32 %v3849_v5 }
 0x25e   : > { %v5154_v22 = vpop.eup %5153  ;;  %5163 = vrcp.f32 %v3835_v24  ;;  %v3836_v27 = vadd.f32 1.0, %v5152_v25 }
 0x25f   : > { %v5156_v28 = vpop.eup %5155  ;;  %5165 = vrcp.f32 %v3833_v26  ;;  %v3852_v29 = vadd.f32 1.0, %v5154_v22 }
 0x260   : > { %v5158_v30 = vpop.eup %5157  ;;  %5167 = vrcp.f32 %v3836_v27  ;;  %v3834_v31 = vadd.f32 1.0, %v5156_v28 }
 0x261   : > { %5169 = vrcp.f32 %v3852_v29  ;;  %v3850_v32 = vadd.f32 1.0, %v5158_v30 }
 0x262   : > { %5171 = vrcp.f32 %v3834_v31 }
 0x263   : > { %5173 = vrcp.f32 %v3850_v32 }
 0x266   : > { %v5160_v33 = vpop.eup %5159 }
 0x267   : > { %v5162_v34 = vpop.eup %5161  ;;  %v3947_v45 = vmul.f32 %v5160_v33, %v6463_v55 }
 0x268   : > { %v5164_v35 = vpop.eup %5163  ;;  %v3945_v53 = vmul.f32 %v5162_v34, %v6468_v43 }
 0x269   : > { %v5166_v38 = vpop.eup %5165  ;;  %v3931_v40 = vmul.f32 %v5164_v35, %v3707_v44 }
 0x26a   : > { %v5168_v39 = vpop.eup %5167  ;;  %v3929_v49 = vmul.f32 %v5166_v38, %v3705_v1 }
 0x26b   : > { %v5170_v0 = vpop.eup %5169  ;;  %v3932_v41 = vmul.f32 %v5168_v39, %v3708_v7 }
 0x26c   : > { %v5172_v42 = vpop.eup %5171  ;;  %v3948_v47 = vmul.f32 %v5170_v0, %v3724_v61 }
 0x26d   : > { %v5174_v48 = vpop.eup %5173  ;;  %v4863_v50 = vpack.c.bf16 %v3932_v41, %v3931_v40  ;;  %v3930_v51 = vmul.f32 %v5172_v42, %v3706_v10 }
 0x26e   : > { %v4903_v21 = vpack.c.bf16 %v3948_v47, %v3947_v45  ;;  %v3946_v52 = vmul.f32 %v5174_v48, %v3722_v4 }
 0x26f   : > { %4919 = vst [vmem:[%s6424_s22 + $0x28] sm:$0xff] %v4863_v50   ;;  %v4858_v37 = vpack.c.bf16 %v3930_v51, %v3929_v49 }
 0x270   : > { %4927 = vst [vmem:[%s6424_s22 + $0x68] sm:$0xff] %v4903_v21   ;;  %v4898_v54 = vpack.c.bf16 %v3946_v52, %v3945_v53 }
 0x271   : > { %4918 = vst [vmem:[%s6424_s22 + $0x20] sm:$0xff] %v4858_v37  }
 0x272   : > { %4926 = vst [vmem:[%s6424_s22 + $0x60] sm:$0xff] %v4898_v54  }
 0x287   : > { %v4985_v11 = vpop.f32.mrb[12].mxu1 }
 0x288   : > { %v3688_v57 = vmul.f32 %v4985_v11, %v6390_v62  ;;  %v3636_v46 = vpop.f32.mrb[13].mxu1 }
 0x289   : > { %v3686_v55 = vmul.f32 %v6390_v62, %v3636_v46  ;;  %v4986_v56 = vpop.f32.mrb[14].mxu1 }
 0x28a   : > { %v6490_v58 = vadd.f32 %v6395_v36, %v3688_v57  ;;  %v3689_v43 = vmul.f32 %v4986_v56, %v6390_v62  ;;  %v3639_v20 = vpop.f32.mrb[15].mxu1 }
 0x28b   : > { %v3725_v59 = vadd.f32 %v6395_v36, %v3686_v55  ;;  %v3687_v44 = vmul.f32 %v6390_v62, %v3639_v20 }
 0x28c   : > { %v4969_v13 = vpop.f32.mrb[12].mxu0  ;;  %v4766_v60 = vmul.f32 -1.442695, %v6490_v58  ;;  %v3728_v61 = vadd.f32 %v6395_v36, %v3689_v43 }
 0x28d   : > { %v3672_v63 = vmul.f32 %v4969_v13, %v6390_v62  ;;  %v3572_v1 = vpop.f32.mrb[13].mxu0  ;;  %v4764_v2 = vmul.f32 -1.442695, %v3725_v59  ;;  %v3726_v3 = vadd.f32 %v6395_v36, %v3687_v44 }
 0x28e   : > { %5175 = vpow2.f32 %v4766_v60  ;;  %v3670_v4 = vmul.f32 %v6390_v62, %v3572_v1  ;;  %v4970_v6 = vpop.f32.mrb[14].mxu0  ;;  %v4767_v7 = vmul.f32 -1.442695, %v3728_v61 }
 0x28f   : > { %v3711_v8 = vadd.f32 %v6395_v36, %v3672_v63  ;;  %5177 = vpow2.f32 %v4764_v2  ;;  %v3673_v9 = vmul.f32 %v4970_v6, %v6390_v62  ;;  %v3575_v10 = vpop.f32.mrb[15].mxu0  ;;  %v4765_v12 = vmul.f32 -1.442695, %v3726_v3 }
 0x290   : > { %v3709_v14 = vadd.f32 %v6395_v36, %v3670_v4  ;;  %5179 = vpow2.f32 %v4767_v7  ;;  %v3671_v15 = vmul.f32 %v6390_v62, %v3575_v10 }
 0x291   : > { %v4750_v16 = vmul.f32 -1.442695, %v3711_v8  ;;  %v3712_v17 = vadd.f32 %v6395_v36, %v3673_v9  ;;  %5181 = vpow2.f32 %v4765_v12 }
 0x292   : > { %v4748_v18 = vmul.f32 -1.442695, %v3709_v14  ;;  %v3710_v19 = vadd.f32 %v6395_v36, %v3671_v15 }
 0x293   : > { %5183 = vpow2.f32 %v4750_v16  ;;  %v4751_v5 = vmul.f32 -1.442695, %v3712_v17 }
 0x294   : > { %5185 = vpow2.f32 %v4748_v18  ;;  %v4749_v23 = vmul.f32 -1.442695, %v3710_v19 }
 0x295   : > { %5187 = vpow2.f32 %v4751_v5 }
 0x296   : > { %5189 = vpow2.f32 %v4749_v23 }
 0x298   : > { %v5176_v24 = vpop.eup %5175 }
 0x299   : > { %v5178_v25 = vpop.eup %5177  ;;  %v3855_v26 = vadd.f32 1.0, %v5176_v24 }
 0x29a   : > { %v5180_v22 = vpop.eup %5179  ;;  %v3853_v27 = vadd.f32 1.0, %v5178_v25 }
 0x29b   : > { %v5182_v28 = vpop.eup %5181  ;;  %5191 = vrcp.f32 %v3855_v26  ;;  %v3856_v62 = vadd.f32 1.0, %v5180_v22 }
 0x29c   : > { %5193 = vrcp.f32 %v3853_v27  ;;  %v3854_v29 = vadd.f32 1.0, %v5182_v28 }
 0x29d   : > { %v5184_v30 = vpop.eup %5183  ;;  %5195 = vrcp.f32 %v3856_v62 }
 0x29e   : > { %v5186_v31 = vpop.eup %5185  ;;  %v3839_v36 = vadd.f32 1.0, %v5184_v30  ;;  %5197 = vrcp.f32 %v3854_v29 }
 0x29f   : > { %v5188_v32 = vpop.eup %5187  ;;  %v3837_v33 = vadd.f32 1.0, %v5186_v31 }
 0x2a0   : > { %v5190_v34 = vpop.eup %5189  ;;  %5199 = vrcp.f32 %v3839_v36  ;;  %v3840_v35 = vadd.f32 1.0, %v5188_v32 }
 0x2a1   : > { %5201 = vrcp.f32 %v3837_v33  ;;  %v3838_v38 = vadd.f32 1.0, %v5190_v34 }
 0x2a2   : > { %5203 = vrcp.f32 %v3840_v35 }
 0x2a3   : > { %5205 = vrcp.f32 %v3838_v38 }
 0x2a5   : > { %v5192_v39 = vpop.eup %5191 }
 0x2a6   : > { %v5194_v0 = vpop.eup %5193  ;;  %v3951_v42 = vmul.f32 %v5192_v39, %v6490_v58 }
 0x2a7   : > { %v5196_v40 = vpop.eup %5195  ;;  %v3949_v47 = vmul.f32 %v5194_v0, %v3725_v59 }
 0x2a8   : > { %v5198_v41 = vpop.eup %5197  ;;  %v3952_v45 = vmul.f32 %v5196_v40, %v3728_v61 }
 0x2a9   : > { %v3950_v48 = vmul.f32 %v5198_v41, %v3726_v3 }
 0x2aa   : > { %v5200_v49 = vpop.eup %5199  ;;  %v4913_v50 = vpack.c.bf16 %v3952_v45, %v3951_v42 }
 0x2ab   : > { %v5202_v51 = vpop.eup %5201  ;;  %v4908_v53 = vpack.c.bf16 %v3950_v48, %v3949_v47  ;;  %v3935_v37 = vmul.f32 %v5200_v49, %v3711_v8 }
 0x2ac   : > { %v5204_v21 = vpop.eup %5203  ;;  %4929 = vst [vmem:[%s6424_s22 + $0x78] sm:$0xff] %v4913_v50   ;;  %v3933_v11 = vmul.f32 %v5202_v51, %v3709_v14 }
 0x2ad   : > { %v5206_v52 = vpop.eup %5205  ;;  %v3936_v54 = vmul.f32 %v5204_v21, %v3712_v17  ;;  %4928 = vst [vmem:[%s6424_s22 + $0x70] sm:$0xff] %v4908_v53  }
 0x2ae   : > { %v3934_v57 = vmul.f32 %v5206_v52, %v3710_v19 }
 0x2af   : > { %v4873_v46 = vpack.c.bf16 %v3936_v54, %v3935_v37 }
 0x2b0   : > { %v4868_v55 = vpack.c.bf16 %v3934_v57, %v3933_v11 }
 0x2b1   : > { %4921 = vst [vmem:[%s6424_s22 + $0x38] sm:$0xff] %v4873_v46  }
 0x2b2   : > { %4920 = vst [vmem:[%s6424_s22 + $0x30] sm:$0xff] %v4868_v55  }
 0x2b3 PF: > { %s14_s17 = sadd.s32 1, %s5229_s17   ;;  %s6529_s15 = smov %s5225_s16 }
 0x2b4   : > { %p11_p5 = scmp.ge.s32.totalorder %s14_s17, 4   ;;  %s6530_s16 = smov %s6532_s18 }
 0x2b6   :  { %13 = sbr.rel (!%p11_p5) target bundleno = 2 (0x2), region = 82 }

</bundles_post_ra>
